<compile_context>
chip_gen: v7x
topology: tpu7x:2x2x1
jax: 0.10.0
libtpu: 0.0.40
codegen_flags: <defaults>
</compile_context>

<pallas_src>
import functools

import numpy as np
import jax
import jax.numpy as jnp
from jax import lax
from jax.experimental import pallas as pl
from jax.experimental.pallas import tpu as pltpu

_UNROLL_S_MAX = 64   # fully unroll forward/backtrack below this sequence length


def viterbi_kernel(feats_ref, trans_ref, len_ref, out_ref, bp_ref):
    # feats_ref: (S, T, bb) f32     trans_ref: (T, T, bb) f32 (each row lane-broadcast)
    # len_ref:   (1, bb)    i32     out_ref:   (SP, bb)   i32
    # bp_ref:    (S, T, bb) i32 scratch back pointers (row S-1 unused)
    S, T, bb = feats_ref.shape
    SP = out_ref.shape[0]

    lengths = len_ref[...]                                      # (1, bb)
    tag_sub = lax.broadcasted_iota(jnp.int32, (T, bb), 0)       # tag index on sublanes
    pos_sub = lax.broadcasted_iota(jnp.int32, (SP, bb), 0)      # seq position on sublanes

    def max_argmax(part):
        # mx[j,b] = max_i(trans[i,j] + part[i,b]); bp = first argmax index i.
        # Running max over the leading from-tag axis: pure VPU, no XLU reduce.
        mx = trans_ref[0] + part[0:1, :]                        # (T, bb)
        bp = jnp.zeros((T, bb), jnp.int32)
        for i in range(1, T):
            cand = trans_ref[i] + part[i:i + 1, :]              # sublane-broadcast add
            gt = cand > mx                                      # strict > keeps first max
            mx = jnp.where(gt, cand, mx)
            bp = jnp.where(gt, jnp.int32(i), bp)
        return mx, bp

    # ---- t = 0 : partition = feats[0] + transitions[START_TAG, :] -------------
    part = feats_ref[0] + trans_ref[T - 2]                      # START_TAG == T-2, (T, bb)
    lastp = part                                                # partition at t == len-1

    def fwd_step(t, part, lastp):
        mx, bp = max_argmax(part)
        bp = jnp.where(lengths > t, bp, 0)                      # masked_fill_ on padding
        bp_ref[t - 1] = bp                                      # dense (T, bb) store
        part = mx + feats_ref[t]
        lastp = jnp.where(lengths == t + 1, part, lastp)
        return part, lastp

    if S <= _UNROLL_S_MAX:
        for t in range(1, S):
            part, lastp = fwd_step(t, part, lastp)
    else:
        part, lastp = lax.fori_loop(
            1, S, lambda t, c: fwd_step(t, *c), (part, lastp), unroll=4)

    # ---- termination: argmax_i(last_partition[i] + trans[i, j]) at j = STOP ---
    _, last_bp = max_argmax(lastp)
    ptr0 = last_bp[T - 1:T, :]                                  # STOP_TAG row -> (1, bb)

    def gather_row(row, ptr):
        # row[ptr[b], b] per lane b: one-hot over sublanes + sublane max-reduce.
        return jnp.max(jnp.where(tag_sub == ptr, row, 0), axis=0, keepdims=True)

    def back_row(idx, ptr):
        row = bp_ref[idx]                                       # (T, bb)
        row = jnp.where(lengths == idx + 1, ptr0, row)          # scatter of term. pointer
        return gather_row(row, ptr)

    # ---- backtrack -------------------------------------------------------------
    if S <= _UNROLL_S_MAX:
        dec = jnp.where(pos_sub == S - 1, ptr0, 0)              # (SP, bb)
        ptr = ptr0
        for idx in range(S - 2, -1, -1):
            ptr = back_row(idx, ptr)
            dec = jnp.where(pos_sub == idx, ptr, dec)
        out_ref[...] = dec                                      # single dense store
    else:
        out_ref[pl.ds(S - 1, 1), :] = ptr0
        if SP > S:                                              # zero sublane padding rows
            out_ref[pl.ds(S, SP - S), :] = jnp.zeros((SP - S, bb), jnp.int32)

        def bwd_body(k, ptr):
            idx = S - 2 - k
            ptr = back_row(idx, ptr)
            out_ref[pl.ds(idx, 1), :] = ptr
            return ptr

        lax.fori_loop(0, S - 1, bwd_body, ptr0, unroll=4)


@functools.partial(jax.jit, static_argnames=("block_b",))
def crf_viterbi_decode(feats, mask, transitions, *, block_b=128):
    """Pallas CRF._viterbi_decode: returns decode_idx (B, S) int32 (path_score is None)."""
    B, S, T = feats.shape
    assert block_b % 128 == 0, "batch block must be a multiple of the 128-lane width"
    bb = block_b
    nb = -(-B // bb)
    Bp = nb * bb

    lengths = jnp.sum(mask.astype(jnp.int32), axis=1)               # (B,)
    feats_r = jnp.transpose(feats.astype(jnp.float32), (1, 2, 0))   # (S, T, B)
    if Bp != B:
        feats_r = jnp.pad(feats_r, ((0, 0), (0, 0), (0, Bp - B)))
        lengths = jnp.pad(lengths, (0, Bp - B))
    lengths2 = lengths.reshape(1, Bp).astype(jnp.int32)
    # Lane-broadcast transitions once on the host (128 KiB): row i is a dense
    # (T, bb) tile in-kernel -> no per-step broadcast / relayout inside the loop.
    trans_b = jnp.broadcast_to(transitions.astype(jnp.float32)[:, :, None], (T, T, bb))

    SP = -(-S // 8) * 8                                             # sublane-pad seq axis

    grid_spec = pltpu.PrefetchScalarGridSpec(
        num_scalar_prefetch=0,
        grid=(nb,),
        in_specs=[
            pl.BlockSpec((S, T, bb), lambda i: (0, 0, i)),          # feats (batch on lanes)
            pl.BlockSpec((T, T, bb), lambda i: (0, 0, 0)),          # lane-broadcast transitions
            pl.BlockSpec((1, bb), lambda i: (0, i)),                # per-lane lengths
        ],
        out_specs=pl.BlockSpec((SP, bb), lambda i: (0, i)),
        scratch_shapes=[pltpu.VMEM((S, T, bb), jnp.int32)],         # back pointers (dense)
    )
    out = pl.pallas_call(
        viterbi_kernel,
        out_shape=jax.ShapeDtypeStruct((SP, Bp), jnp.int32),
        grid_spec=grid_spec,
        compiler_params=pltpu.CompilerParams(dimension_semantics=("parallel",)),
    )(feats_r, trans_b, lengths2)
    return out[:S, :B].T                                            # (B, S)


def viterbi_reference(feats, mask, trans):
    """Pure numpy replica of CRF._viterbi_decode (same FP grouping as the kernel)."""
    feats = np.asarray(feats, np.float32)
    mask = np.asarray(mask, np.int32)
    trans = np.asarray(trans, np.float32)
    B, S, T = feats.shape
    START, STOP = T - 2, T - 1
    lengths = mask.sum(axis=1)
    decode = np.zeros((B, S), np.int64)
    for b in range(B):
        part = feats[b, 0, :] + trans[START, :]
        lastp = part.copy()
        bp_rows = np.zeros((S, T), np.int64)
        last_pos = int(lengths[b]) - 1
        for t in range(1, S):
            cur = trans + part[:, None]                      # [from i, to j]
            mx = cur.max(axis=0)
            bp = cur.argmax(axis=0)                          # first max, like the kernel
            if mask[b, t] == 0:
                bp = np.zeros(T, np.int64)
            bp_rows[t - 1] = bp
            part = mx + feats[b, t, :]
            if t == last_pos:
                lastp = part.copy()
        last_vals = trans + lastp[:, None]
        pointer = int(last_vals.argmax(axis=0)[STOP])
        decode[b, S - 1] = pointer
        ptr = pointer
        for idx in range(S - 2, -1, -1):
            row = bp_rows[idx]
            if idx == last_pos:
                row = np.full(T, pointer, np.int64)          # scatter of termination pointer
            ptr = int(row[ptr])
            decode[b, idx] = ptr
    return decode


if __name__ == "__main__":
    TAGSET_SIZE = 14
    T = TAGSET_SIZE + 2           # tag_size = tagset_size + 2 = 16
    B, S = 2, 8

    key = jax.random.PRNGKey(0)
    kf, kt = jax.random.split(key)
    feats = jax.random.normal(kf, (B, S, T), dtype=jnp.float32)
    # Deterministic small-random transitions (see TODO(synk) above).
    trans = 0.1 * jax.random.normal(kt, (T, T), dtype=jnp.float32)
    lengths = jnp.array([S, 5], dtype=jnp.int32)
    mask = (jnp.arange(S)[None, :] < lengths[:, None]).astype(jnp.int32)

    decode = crf_viterbi_decode(feats, mask, trans)
    decode = jax.block_until_ready(decode)

    ref = viterbi_reference(feats, mask, trans)
    assert np.array_equal(np.asarray(decode), ref.astype(np.int32)), "mismatch vs reference"
    print("KERNEL_OK")
</pallas_src>

<mosaic_0001>
module attributes {stable_mosaic.version = 11 : i64} {
  func.func @viterbi_kernel(%arg0: i32, %arg1: memref<8x16x128xf32, #tpu.memory_space<vmem>>, %arg2: memref<16x16x128xf32, #tpu.memory_space<vmem>>, %arg3: memref<1x128xi32, #tpu.memory_space<vmem>>, %arg4: memref<8x128xi32, #tpu.memory_space<vmem>>, %arg5: memref<8x16x128xi32, #tpu.memory_space<vmem>>) attributes {dimension_semantics = [#tpu.dimension_semantics<parallel>], iteration_bounds = array<i64: 1>, scalar_prefetch = 0 : i64, scratch_operands = 1 : i64, tpu.core_type = #tpu.core_type<tc>, window_params = [{transform_indices = @transform_0, window_bounds = array<i64: 8, 16, 128>}, {pipeline_mode = #tpu.pipeline_mode<synchronous>, transform_indices = @transform_1, window_bounds = array<i64: 16, 16, 128>}, {transform_indices = @transform_2, window_bounds = array<i64: 1, 128>}, {transform_indices = @transform_3, window_bounds = array<i64: 8, 128>}]} {
    %c0 = arith.constant 0 : index
    %c0_0 = arith.constant 0 : index
    %0 = vector.load %arg3[%c0, %c0_0] : memref<1x128xi32, #tpu.memory_space<vmem>>, vector<1x128xi32>
    %1 = tpu.iota {dimensions = array<i32: 0>} : vector<16x128xi32>
    %2 = tpu.iota {dimensions = array<i32: 0>} : vector<8x128xi32>
    %c0_1 = arith.constant 0 : index
    %c0_2 = arith.constant 0 : index
    %c0_3 = arith.constant 0 : index
    %3 = vector.load %arg1[%c0_1, %c0_2, %c0_3] : memref<8x16x128xf32, #tpu.memory_space<vmem>>, vector<1x16x128xf32>
    %4 = vector.shape_cast %3 : vector<1x16x128xf32> to vector<16x128xf32>
    %c14 = arith.constant 14 : index
    %c0_4 = arith.constant 0 : index
    %c0_5 = arith.constant 0 : index
    %5 = vector.load %arg2[%c14, %c0_4, %c0_5] : memref<16x16x128xf32, #tpu.memory_space<vmem>>, vector<1x16x128xf32>
    %6 = vector.shape_cast %5 : vector<1x16x128xf32> to vector<16x128xf32>
    %7 = arith.addf %4, %6 : vector<16x128xf32>
    %c0_6 = arith.constant 0 : index
    %c0_7 = arith.constant 0 : index
    %c0_8 = arith.constant 0 : index
    %8 = vector.load %arg2[%c0_6, %c0_7, %c0_8] : memref<16x16x128xf32, #tpu.memory_space<vmem>>, vector<1x16x128xf32>
    %9 = vector.shape_cast %8 : vector<1x16x128xf32> to vector<16x128xf32>
    %10 = vector.extract_strided_slice %7 {offsets = [0, 0], sizes = [1, 128], strides = [1, 1]} : vector<16x128xf32> to vector<1x128xf32>
    %11 = vector.broadcast %10 : vector<1x128xf32> to vector<16x128xf32>
    %12 = arith.addf %9, %11 : vector<16x128xf32>
    %c0_i32 = arith.constant 0 : i32
    %13 = vector.broadcast %c0_i32 : i32 to vector<16x128xi32>
    %c1 = arith.constant 1 : index
    %c0_9 = arith.constant 0 : index
    %c0_10 = arith.constant 0 : index
    %14 = vector.load %arg2[%c1, %c0_9, %c0_10] : memref<16x16x128xf32, #tpu.memory_space<vmem>>, vector<1x16x128xf32>
    %15 = vector.shape_cast %14 : vector<1x16x128xf32> to vector<16x128xf32>
    %16 = vector.extract_strided_slice %7 {offsets = [1, 0], sizes = [1, 128], strides = [1, 1]} : vector<16x128xf32> to vector<1x128xf32>
    %17 = vector.broadcast %16 : vector<1x128xf32> to vector<16x128xf32>
    %18 = arith.addf %15, %17 : vector<16x128xf32>
    %19 = arith.cmpf ogt, %18, %12 : vector<16x128xf32>
    %20 = arith.select %19, %18, %12 : vector<16x128xi1>, vector<16x128xf32>
    %c1_i32 = arith.constant 1 : i32
    %21 = vector.broadcast %c1_i32 : i32 to vector<16x128xi32>
    %22 = arith.select %19, %21, %13 : vector<16x128xi1>, vector<16x128xi32>
    %c2 = arith.constant 2 : index
    %c0_11 = arith.constant 0 : index
    %c0_12 = arith.constant 0 : index
    %23 = vector.load %arg2[%c2, %c0_11, %c0_12] : memref<16x16x128xf32, #tpu.memory_space<vmem>>, vector<1x16x128xf32>
    %24 = vector.shape_cast %23 : vector<1x16x128xf32> to vector<16x128xf32>
    %25 = vector.extract_strided_slice %7 {offsets = [2, 0], sizes = [1, 128], strides = [1, 1]} : vector<16x128xf32> to vector<1x128xf32>
    %26 = vector.broadcast %25 : vector<1x128xf32> to vector<16x128xf32>
    %27 = arith.addf %24, %26 : vector<16x128xf32>
    %28 = arith.cmpf ogt, %27, %20 : vector<16x128xf32>
    %29 = arith.select %28, %27, %20 : vector<16x128xi1>, vector<16x128xf32>
    %c2_i32 = arith.constant 2 : i32
    %30 = vector.broadcast %c2_i32 : i32 to vector<16x128xi32>
    %31 = arith.select %28, %30, %22 : vector<16x128xi1>, vector<16x128xi32>
    %c3 = arith.constant 3 : index
    %c0_13 = arith.constant 0 : index
    %c0_14 = arith.constant 0 : index
    %32 = vector.load %arg2[%c3, %c0_13, %c0_14] : memref<16x16x128xf32, #tpu.memory_space<vmem>>, vector<1x16x128xf32>
    %33 = vector.shape_cast %32 : vector<1x16x128xf32> to vector<16x128xf32>
    %34 = vector.extract_strided_slice %7 {offsets = [3, 0], sizes = [1, 128], strides = [1, 1]} : vector<16x128xf32> to vector<1x128xf32>
    %35 = vector.broadcast %34 : vector<1x128xf32> to vector<16x128xf32>
    %36 = arith.addf %33, %35 : vector<16x128xf32>
    %37 = arith.cmpf ogt, %36, %29 : vector<16x128xf32>
    %38 = arith.select %37, %36, %29 : vector<16x128xi1>, vector<16x128xf32>
    %c3_i32 = arith.constant 3 : i32
    %39 = vector.broadcast %c3_i32 : i32 to vector<16x128xi32>
    %40 = arith.select %37, %39, %31 : vector<16x128xi1>, vector<16x128xi32>
    %c4 = arith.constant 4 : index
    %c0_15 = arith.constant 0 : index
    %c0_16 = arith.constant 0 : index
    %41 = vector.load %arg2[%c4, %c0_15, %c0_16] : memref<16x16x128xf32, #tpu.memory_space<vmem>>, vector<1x16x128xf32>
    %42 = vector.shape_cast %41 : vector<1x16x128xf32> to vector<16x128xf32>
    %43 = vector.extract_strided_slice %7 {offsets = [4, 0], sizes = [1, 128], strides = [1, 1]} : vector<16x128xf32> to vector<1x128xf32>
    %44 = vector.broadcast %43 : vector<1x128xf32> to vector<16x128xf32>
    %45 = arith.addf %42, %44 : vector<16x128xf32>
    %46 = arith.cmpf ogt, %45, %38 : vector<16x128xf32>
    %47 = arith.select %46, %45, %38 : vector<16x128xi1>, vector<16x128xf32>
    %c4_i32 = arith.constant 4 : i32
    %48 = vector.broadcast %c4_i32 : i32 to vector<16x128xi32>
    %49 = arith.select %46, %48, %40 : vector<16x128xi1>, vector<16x128xi32>
    %c5 = arith.constant 5 : index
    %c0_17 = arith.constant 0 : index
    %c0_18 = arith.constant 0 : index
    %50 = vector.load %arg2[%c5, %c0_17, %c0_18] : memref<16x16x128xf32, #tpu.memory_space<vmem>>, vector<1x16x128xf32>
    %51 = vector.shape_cast %50 : vector<1x16x128xf32> to vector<16x128xf32>
    %52 = vector.extract_strided_slice %7 {offsets = [5, 0], sizes = [1, 128], strides = [1, 1]} : vector<16x128xf32> to vector<1x128xf32>
    %53 = vector.broadcast %52 : vector<1x128xf32> to vector<16x128xf32>
    %54 = arith.addf %51, %53 : vector<16x128xf32>
    %55 = arith.cmpf ogt, %54, %47 : vector<16x128xf32>
    %56 = arith.select %55, %54, %47 : vector<16x128xi1>, vector<16x128xf32>
    %c5_i32 = arith.constant 5 : i32
    %57 = vector.broadcast %c5_i32 : i32 to vector<16x128xi32>
    %58 = arith.select %55, %57, %49 : vector<16x128xi1>, vector<16x128xi32>
    %c6 = arith.constant 6 : index
    %c0_19 = arith.constant 0 : index
    %c0_20 = arith.constant 0 : index
    %59 = vector.load %arg2[%c6, %c0_19, %c0_20] : memref<16x16x128xf32, #tpu.memory_space<vmem>>, vector<1x16x128xf32>
    %60 = vector.shape_cast %59 : vector<1x16x128xf32> to vector<16x128xf32>
    %61 = vector.extract_strided_slice %7 {offsets = [6, 0], sizes = [1, 128], strides = [1, 1]} : vector<16x128xf32> to vector<1x128xf32>
    %62 = vector.broadcast %61 : vector<1x128xf32> to vector<16x128xf32>
    %63 = arith.addf %60, %62 : vector<16x128xf32>
    %64 = arith.cmpf ogt, %63, %56 : vector<16x128xf32>
    %65 = arith.select %64, %63, %56 : vector<16x128xi1>, vector<16x128xf32>
    %c6_i32 = arith.constant 6 : i32
    %66 = vector.broadcast %c6_i32 : i32 to vector<16x128xi32>
    %67 = arith.select %64, %66, %58 : vector<16x128xi1>, vector<16x128xi32>
    %c7 = arith.constant 7 : index
    %c0_21 = arith.constant 0 : index
    %c0_22 = arith.constant 0 : index
    %68 = vector.load %arg2[%c7, %c0_21, %c0_22] : memref<16x16x128xf32, #tpu.memory_space<vmem>>, vector<1x16x128xf32>
    %69 = vector.shape_cast %68 : vector<1x16x128xf32> to vector<16x128xf32>
    %70 = vector.extract_strided_slice %7 {offsets = [7, 0], sizes = [1, 128], strides = [1, 1]} : vector<16x128xf32> to vector<1x128xf32>
    %71 = vector.broadcast %70 : vector<1x128xf32> to vector<16x128xf32>
    %72 = arith.addf %69, %71 : vector<16x128xf32>
    %73 = arith.cmpf ogt, %72, %65 : vector<16x128xf32>
    %74 = arith.select %73, %72, %65 : vector<16x128xi1>, vector<16x128xf32>
    %c7_i32 = arith.constant 7 : i32
    %75 = vector.broadcast %c7_i32 : i32 to vector<16x128xi32>
    %76 = arith.select %73, %75, %67 : vector<16x128xi1>, vector<16x128xi32>
    %c8 = arith.constant 8 : index
    %c0_23 = arith.constant 0 : index
    %c0_24 = arith.constant 0 : index
    %77 = vector.load %arg2[%c8, %c0_23, %c0_24] : memref<16x16x128xf32, #tpu.memory_space<vmem>>, vector<1x16x128xf32>
    %78 = vector.shape_cast %77 : vector<1x16x128xf32> to vector<16x128xf32>
    %79 = vector.extract_strided_slice %7 {offsets = [8, 0], sizes = [1, 128], strides = [1, 1]} : vector<16x128xf32> to vector<1x128xf32>
    %80 = vector.broadcast %79 : vector<1x128xf32> to vector<16x128xf32>
    %81 = arith.addf %78, %80 : vector<16x128xf32>
    %82 = arith.cmpf ogt, %81, %74 : vector<16x128xf32>
    %83 = arith.select %82, %81, %74 : vector<16x128xi1>, vector<16x128xf32>
    %c8_i32 = arith.constant 8 : i32
    %84 = vector.broadcast %c8_i32 : i32 to vector<16x128xi32>
    %85 = arith.select %82, %84, %76 : vector<16x128xi1>, vector<16x128xi32>
    %c9 = arith.constant 9 : index
    %c0_25 = arith.constant 0 : index
    %c0_26 = arith.constant 0 : index
    %86 = vector.load %arg2[%c9, %c0_25, %c0_26] : memref<16x16x128xf32, #tpu.memory_space<vmem>>, vector<1x16x128xf32>
    %87 = vector.shape_cast %86 : vector<1x16x128xf32> to vector<16x128xf32>
    %88 = vector.extract_strided_slice %7 {offsets = [9, 0], sizes = [1, 128], strides = [1, 1]} : vector<16x128xf32> to vector<1x128xf32>
    %89 = vector.broadcast %88 : vector<1x128xf32> to vector<16x128xf32>
    %90 = arith.addf %87, %89 : vector<16x128xf32>
    %91 = arith.cmpf ogt, %90, %83 : vector<16x128xf32>
    %92 = arith.select %91, %90, %83 : vector<16x128xi1>, vector<16x128xf32>
    %c9_i32 = arith.constant 9 : i32
    %93 = vector.broadcast %c9_i32 : i32 to vector<16x128xi32>
    %94 = arith.select %91, %93, %85 : vector<16x128xi1>, vector<16x128xi32>
    %c10 = arith.constant 10 : index
    %c0_27 = arith.constant 0 : index
    %c0_28 = arith.constant 0 : index
    %95 = vector.load %arg2[%c10, %c0_27, %c0_28] : memref<16x16x128xf32, #tpu.memory_space<vmem>>, vector<1x16x128xf32>
    %96 = vector.shape_cast %95 : vector<1x16x128xf32> to vector<16x128xf32>
    %97 = vector.extract_strided_slice %7 {offsets = [10, 0], sizes = [1, 128], strides = [1, 1]} : vector<16x128xf32> to vector<1x128xf32>
    %98 = vector.broadcast %97 : vector<1x128xf32> to vector<16x128xf32>
    %99 = arith.addf %96, %98 : vector<16x128xf32>
    %100 = arith.cmpf ogt, %99, %92 : vector<16x128xf32>
    %101 = arith.select %100, %99, %92 : vector<16x128xi1>, vector<16x128xf32>
    %c10_i32 = arith.constant 10 : i32
    %102 = vector.broadcast %c10_i32 : i32 to vector<16x128xi32>
    %103 = arith.select %100, %102, %94 : vector<16x128xi1>, vector<16x128xi32>
    %c11 = arith.constant 11 : index
    %c0_29 = arith.constant 0 : index
    %c0_30 = arith.constant 0 : index
    %104 = vector.load %arg2[%c11, %c0_29, %c0_30] : memref<16x16x128xf32, #tpu.memory_space<vmem>>, vector<1x16x128xf32>
    %105 = vector.shape_cast %104 : vector<1x16x128xf32> to vector<16x128xf32>
    %106 = vector.extract_strided_slice %7 {offsets = [11, 0], sizes = [1, 128], strides = [1, 1]} : vector<16x128xf32> to vector<1x128xf32>
    %107 = vector.broadcast %106 : vector<1x128xf32> to vector<16x128xf32>
    %108 = arith.addf %105, %107 : vector<16x128xf32>
    %109 = arith.cmpf ogt, %108, %101 : vector<16x128xf32>
    %110 = arith.select %109, %108, %101 : vector<16x128xi1>, vector<16x128xf32>
    %c11_i32 = arith.constant 11 : i32
    %111 = vector.broadcast %c11_i32 : i32 to vector<16x128xi32>
    %112 = arith.select %109, %111, %103 : vector<16x128xi1>, vector<16x128xi32>
    %c12 = arith.constant 12 : index
    %c0_31 = arith.constant 0 : index
    %c0_32 = arith.constant 0 : index
    %113 = vector.load %arg2[%c12, %c0_31, %c0_32] : memref<16x16x128xf32, #tpu.memory_space<vmem>>, vector<1x16x128xf32>
    %114 = vector.shape_cast %113 : vector<1x16x128xf32> to vector<16x128xf32>
    %115 = vector.extract_strided_slice %7 {offsets = [12, 0], sizes = [1, 128], strides = [1, 1]} : vector<16x128xf32> to vector<1x128xf32>
    %116 = vector.broadcast %115 : vector<1x128xf32> to vector<16x128xf32>
    %117 = arith.addf %114, %116 : vector<16x128xf32>
    %118 = arith.cmpf ogt, %117, %110 : vector<16x128xf32>
    %119 = arith.select %118, %117, %110 : vector<16x128xi1>, vector<16x128xf32>
    %c12_i32 = arith.constant 12 : i32
    %120 = vector.broadcast %c12_i32 : i32 to vector<16x128xi32>
    %121 = arith.select %118, %120, %112 : vector<16x128xi1>, vector<16x128xi32>
    %c13 = arith.constant 13 : index
    %c0_33 = arith.constant 0 : index
    %c0_34 = arith.constant 0 : index
    %122 = vector.load %arg2[%c13, %c0_33, %c0_34] : memref<16x16x128xf32, #tpu.memory_space<vmem>>, vector<1x16x128xf32>
    %123 = vector.shape_cast %122 : vector<1x16x128xf32> to vector<16x128xf32>
    %124 = vector.extract_strided_slice %7 {offsets = [13, 0], sizes = [1, 128], strides = [1, 1]} : vector<16x128xf32> to vector<1x128xf32>
    %125 = vector.broadcast %124 : vector<1x128xf32> to vector<16x128xf32>
    %126 = arith.addf %123, %125 : vector<16x128xf32>
    %127 = arith.cmpf ogt, %126, %119 : vector<16x128xf32>
    %128 = arith.select %127, %126, %119 : vector<16x128xi1>, vector<16x128xf32>
    %c13_i32 = arith.constant 13 : i32
    %129 = vector.broadcast %c13_i32 : i32 to vector<16x128xi32>
    %130 = arith.select %127, %129, %121 : vector<16x128xi1>, vector<16x128xi32>
    %c14_35 = arith.constant 14 : index
    %c0_36 = arith.constant 0 : index
    %c0_37 = arith.constant 0 : index
    %131 = vector.load %arg2[%c14_35, %c0_36, %c0_37] : memref<16x16x128xf32, #tpu.memory_space<vmem>>, vector<1x16x128xf32>
    %132 = vector.shape_cast %131 : vector<1x16x128xf32> to vector<16x128xf32>
    %133 = vector.extract_strided_slice %7 {offsets = [14, 0], sizes = [1, 128], strides = [1, 1]} : vector<16x128xf32> to vector<1x128xf32>
    %134 = vector.broadcast %133 : vector<1x128xf32> to vector<16x128xf32>
    %135 = arith.addf %132, %134 : vector<16x128xf32>
    %136 = arith.cmpf ogt, %135, %128 : vector<16x128xf32>
    %137 = arith.select %136, %135, %128 : vector<16x128xi1>, vector<16x128xf32>
    %c14_i32 = arith.constant 14 : i32
    %138 = vector.broadcast %c14_i32 : i32 to vector<16x128xi32>
    %139 = arith.select %136, %138, %130 : vector<16x128xi1>, vector<16x128xi32>
    %c15 = arith.constant 15 : index
    %c0_38 = arith.constant 0 : index
    %c0_39 = arith.constant 0 : index
    %140 = vector.load %arg2[%c15, %c0_38, %c0_39] : memref<16x16x128xf32, #tpu.memory_space<vmem>>, vector<1x16x128xf32>
    %141 = vector.shape_cast %140 : vector<1x16x128xf32> to vector<16x128xf32>
    %142 = vector.extract_strided_slice %7 {offsets = [15, 0], sizes = [1, 128], strides = [1, 1]} : vector<16x128xf32> to vector<1x128xf32>
    %143 = vector.broadcast %142 : vector<1x128xf32> to vector<16x128xf32>
    %144 = arith.addf %141, %143 : vector<16x128xf32>
    %145 = arith.cmpf ogt, %144, %137 : vector<16x128xf32>
    %146 = arith.select %145, %144, %137 : vector<16x128xi1>, vector<16x128xf32>
    %c15_i32 = arith.constant 15 : i32
    %147 = vector.broadcast %c15_i32 : i32 to vector<16x128xi32>
    %148 = arith.select %145, %147, %139 : vector<16x128xi1>, vector<16x128xi32>
    %c1_i32_40 = arith.constant 1 : i32
    %149 = vector.broadcast %c1_i32_40 : i32 to vector<1x128xi32>
    %150 = arith.cmpi sgt, %0, %149 : vector<1x128xi32>
    %c0_i32_41 = arith.constant 0 : i32
    %151 = vector.shape_cast %150 : vector<1x128xi1> to vector<1x128xi1>
    %152 = vector.broadcast %151 : vector<1x128xi1> to vector<16x128xi1>
    %153 = vector.broadcast %c0_i32_41 : i32 to vector<16x128xi32>
    %154 = arith.select %152, %148, %153 : vector<16x128xi1>, vector<16x128xi32>
    %c0_42 = arith.constant 0 : index
    %c0_43 = arith.constant 0 : index
    %c0_44 = arith.constant 0 : index
    %155 = vector.load %arg5[%c0_42, %c0_43, %c0_44] : memref<8x16x128xi32, #tpu.memory_space<vmem>>, vector<1x16x128xi32>
    %156 = vector.shape_cast %155 : vector<1x16x128xi32> to vector<16x128xi32>
    %157 = vector.shape_cast %154 : vector<16x128xi32> to vector<1x16x128xi32>
    tpu.vector_store %arg5[%c0_42, %c0_43, %c0_44], %157 {strides = array<i32>} : memref<8x16x128xi32, #tpu.memory_space<vmem>>, vector<1x16x128xi32>,
    %c1_45 = arith.constant 1 : index
    %c0_46 = arith.constant 0 : index
    %c0_47 = arith.constant 0 : index
    %158 = vector.load %arg1[%c1_45, %c0_46, %c0_47] : memref<8x16x128xf32, #tpu.memory_space<vmem>>, vector<1x16x128xf32>
    %159 = vector.shape_cast %158 : vector<1x16x128xf32> to vector<16x128xf32>
    %160 = arith.addf %146, %159 : vector<16x128xf32>
    %c2_i32_48 = arith.constant 2 : i32
    %161 = vector.broadcast %c2_i32_48 : i32 to vector<1x128xi32>
    %162 = arith.cmpi eq, %0, %161 : vector<1x128xi32>
    %163 = vector.shape_cast %162 : vector<1x128xi1> to vector<1x128xi1>
    %164 = vector.broadcast %163 : vector<1x128xi1> to vector<16x128xi1>
    %165 = arith.select %164, %160, %7 : vector<16x128xi1>, vector<16x128xf32>
    %c0_49 = arith.constant 0 : index
    %c0_50 = arith.constant 0 : index
    %c0_51 = arith.constant 0 : index
    %166 = vector.load %arg2[%c0_49, %c0_50, %c0_51] : memref<16x16x128xf32, #tpu.memory_space<vmem>>, vector<1x16x128xf32>
    %167 = vector.shape_cast %166 : vector<1x16x128xf32> to vector<16x128xf32>
    %168 = vector.extract_strided_slice %160 {offsets = [0, 0], sizes = [1, 128], strides = [1, 1]} : vector<16x128xf32> to vector<1x128xf32>
    %169 = vector.broadcast %168 : vector<1x128xf32> to vector<16x128xf32>
    %170 = arith.addf %167, %169 : vector<16x128xf32>
    %c0_i32_52 = arith.constant 0 : i32
    %171 = vector.broadcast %c0_i32_52 : i32 to vector<16x128xi32>
    %c1_53 = arith.constant 1 : index
    %c0_54 = arith.constant 0 : index
    %c0_55 = arith.constant 0 : index
    %172 = vector.load %arg2[%c1_53, %c0_54, %c0_55] : memref<16x16x128xf32, #tpu.memory_space<vmem>>, vector<1x16x128xf32>
    %173 = vector.shape_cast %172 : vector<1x16x128xf32> to vector<16x128xf32>
    %174 = vector.extract_strided_slice %160 {offsets = [1, 0], sizes = [1, 128], strides = [1, 1]} : vector<16x128xf32> to vector<1x128xf32>
    %175 = vector.broadcast %174 : vector<1x128xf32> to vector<16x128xf32>
    %176 = arith.addf %173, %175 : vector<16x128xf32>
    %177 = arith.cmpf ogt, %176, %170 : vector<16x128xf32>
    %178 = arith.select %177, %176, %170 : vector<16x128xi1>, vector<16x128xf32>
    %c1_i32_56 = arith.constant 1 : i32
    %179 = vector.broadcast %c1_i32_56 : i32 to vector<16x128xi32>
    %180 = arith.select %177, %179, %171 : vector<16x128xi1>, vector<16x128xi32>
    %c2_57 = arith.constant 2 : index
    %c0_58 = arith.constant 0 : index
    %c0_59 = arith.constant 0 : index
    %181 = vector.load %arg2[%c2_57, %c0_58, %c0_59] : memref<16x16x128xf32, #tpu.memory_space<vmem>>, vector<1x16x128xf32>
    %182 = vector.shape_cast %181 : vector<1x16x128xf32> to vector<16x128xf32>
    %183 = vector.extract_strided_slice %160 {offsets = [2, 0], sizes = [1, 128], strides = [1, 1]} : vector<16x128xf32> to vector<1x128xf32>
    %184 = vector.broadcast %183 : vector<1x128xf32> to vector<16x128xf32>
    %185 = arith.addf %182, %184 : vector<16x128xf32>
    %186 = arith.cmpf ogt, %185, %178 : vector<16x128xf32>
    %187 = arith.select %186, %185, %178 : vector<16x128xi1>, vector<16x128xf32>
    %c2_i32_60 = arith.constant 2 : i32
    %188 = vector.broadcast %c2_i32_60 : i32 to vector<16x128xi32>
    %189 = arith.select %186, %188, %180 : vector<16x128xi1>, vector<16x128xi32>
    %c3_61 = arith.constant 3 : index
    %c0_62 = arith.constant 0 : index
    %c0_63 = arith.constant 0 : index
    %190 = vector.load %arg2[%c3_61, %c0_62, %c0_63] : memref<16x16x128xf32, #tpu.memory_space<vmem>>, vector<1x16x128xf32>
    %191 = vector.shape_cast %190 : vector<1x16x128xf32> to vector<16x128xf32>
    %192 = vector.extract_strided_slice %160 {offsets = [3, 0], sizes = [1, 128], strides = [1, 1]} : vector<16x128xf32> to vector<1x128xf32>
    %193 = vector.broadcast %192 : vector<1x128xf32> to vector<16x128xf32>
    %194 = arith.addf %191, %193 : vector<16x128xf32>
    %195 = arith.cmpf ogt, %194, %187 : vector<16x128xf32>
    %196 = arith.select %195, %194, %187 : vector<16x128xi1>, vector<16x128xf32>
    %c3_i32_64 = arith.constant 3 : i32
    %197 = vector.broadcast %c3_i32_64 : i32 to vector<16x128xi32>
    %198 = arith.select %195, %197, %189 : vector<16x128xi1>, vector<16x128xi32>
    %c4_65 = arith.constant 4 : index
    %c0_66 = arith.constant 0 : index
    %c0_67 = arith.constant 0 : index
    %199 = vector.load %arg2[%c4_65, %c0_66, %c0_67] : memref<16x16x128xf32, #tpu.memory_space<vmem>>, vector<1x16x128xf32>
    %200 = vector.shape_cast %199 : vector<1x16x128xf32> to vector<16x128xf32>
    %201 = vector.extract_strided_slice %160 {offsets = [4, 0], sizes = [1, 128], strides = [1, 1]} : vector<16x128xf32> to vector<1x128xf32>
    %202 = vector.broadcast %201 : vector<1x128xf32> to vector<16x128xf32>
    %203 = arith.addf %200, %202 : vector<16x128xf32>
    %204 = arith.cmpf ogt, %203, %196 : vector<16x128xf32>
    %205 = arith.select %204, %203, %196 : vector<16x128xi1>, vector<16x128xf32>
    %c4_i32_68 = arith.constant 4 : i32
    %206 = vector.broadcast %c4_i32_68 : i32 to vector<16x128xi32>
    %207 = arith.select %204, %206, %198 : vector<16x128xi1>, vector<16x128xi32>
    %c5_69 = arith.constant 5 : index
    %c0_70 = arith.constant 0 : index
    %c0_71 = arith.constant 0 : index
    %208 = vector.load %arg2[%c5_69, %c0_70, %c0_71] : memref<16x16x128xf32, #tpu.memory_space<vmem>>, vector<1x16x128xf32>
    %209 = vector.shape_cast %208 : vector<1x16x128xf32> to vector<16x128xf32>
    %210 = vector.extract_strided_slice %160 {offsets = [5, 0], sizes = [1, 128], strides = [1, 1]} : vector<16x128xf32> to vector<1x128xf32>
    %211 = vector.broadcast %210 : vector<1x128xf32> to vector<16x128xf32>
    %212 = arith.addf %209, %211 : vector<16x128xf32>
    %213 = arith.cmpf ogt, %212, %205 : vector<16x128xf32>
    %214 = arith.select %213, %212, %205 : vector<16x128xi1>, vector<16x128xf32>
    %c5_i32_72 = arith.constant 5 : i32
    %215 = vector.broadcast %c5_i32_72 : i32 to vector<16x128xi32>
    %216 = arith.select %213, %215, %207 : vector<16x128xi1>, vector<16x128xi32>
    %c6_73 = arith.constant 6 : index
    %c0_74 = arith.constant 0 : index
    %c0_75 = arith.constant 0 : index
    %217 = vector.load %arg2[%c6_73, %c0_74, %c0_75] : memref<16x16x128xf32, #tpu.memory_space<vmem>>, vector<1x16x128xf32>
    %218 = vector.shape_cast %217 : vector<1x16x128xf32> to vector<16x128xf32>
    %219 = vector.extract_strided_slice %160 {offsets = [6, 0], sizes = [1, 128], strides = [1, 1]} : vector<16x128xf32> to vector<1x128xf32>
    %220 = vector.broadcast %219 : vector<1x128xf32> to vector<16x128xf32>
    %221 = arith.addf %218, %220 : vector<16x128xf32>
    %222 = arith.cmpf ogt, %221, %214 : vector<16x128xf32>
    %223 = arith.select %222, %221, %214 : vector<16x128xi1>, vector<16x128xf32>
    %c6_i32_76 = arith.constant 6 : i32
    %224 = vector.broadcast %c6_i32_76 : i32 to vector<16x128xi32>
    %225 = arith.select %222, %224, %216 : vector<16x128xi1>, vector<16x128xi32>
    %c7_77 = arith.constant 7 : index
    %c0_78 = arith.constant 0 : index
    %c0_79 = arith.constant 0 : index
    %226 = vector.load %arg2[%c7_77, %c0_78, %c0_79] : memref<16x16x128xf32, #tpu.memory_space<vmem>>, vector<1x16x128xf32>
    %227 = vector.shape_cast %226 : vector<1x16x128xf32> to vector<16x128xf32>
    %228 = vector.extract_strided_slice %160 {offsets = [7, 0], sizes = [1, 128], strides = [1, 1]} : vector<16x128xf32> to vector<1x128xf32>
    %229 = vector.broadcast %228 : vector<1x128xf32> to vector<16x128xf32>
    %230 = arith.addf %227, %229 : vector<16x128xf32>
    %231 = arith.cmpf ogt, %230, %223 : vector<16x128xf32>
    %232 = arith.select %231, %230, %223 : vector<16x128xi1>, vector<16x128xf32>
    %c7_i32_80 = arith.constant 7 : i32
    %233 = vector.broadcast %c7_i32_80 : i32 to vector<16x128xi32>
    %234 = arith.select %231, %233, %225 : vector<16x128xi1>, vector<16x128xi32>
    %c8_81 = arith.constant 8 : index
    %c0_82 = arith.constant 0 : index
    %c0_83 = arith.constant 0 : index
    %235 = vector.load %arg2[%c8_81, %c0_82, %c0_83] : memref<16x16x128xf32, #tpu.memory_space<vmem>>, vector<1x16x128xf32>
    %236 = vector.shape_cast %235 : vector<1x16x128xf32> to vector<16x128xf32>
    %237 = vector.extract_strided_slice %160 {offsets = [8, 0], sizes = [1, 128], strides = [1, 1]} : vector<16x128xf32> to vector<1x128xf32>
    %238 = vector.broadcast %237 : vector<1x128xf32> to vector<16x128xf32>
    %239 = arith.addf %236, %238 : vector<16x128xf32>
    %240 = arith.cmpf ogt, %239, %232 : vector<16x128xf32>
    %241 = arith.select %240, %239, %232 : vector<16x128xi1>, vector<16x128xf32>
    %c8_i32_84 = arith.constant 8 : i32
    %242 = vector.broadcast %c8_i32_84 : i32 to vector<16x128xi32>
    %243 = arith.select %240, %242, %234 : vector<16x128xi1>, vector<16x128xi32>
    %c9_85 = arith.constant 9 : index
    %c0_86 = arith.constant 0 : index
    %c0_87 = arith.constant 0 : index
    %244 = vector.load %arg2[%c9_85, %c0_86, %c0_87] : memref<16x16x128xf32, #tpu.memory_space<vmem>>, vector<1x16x128xf32>
    %245 = vector.shape_cast %244 : vector<1x16x128xf32> to vector<16x128xf32>
    %246 = vector.extract_strided_slice %160 {offsets = [9, 0], sizes = [1, 128], strides = [1, 1]} : vector<16x128xf32> to vector<1x128xf32>
    %247 = vector.broadcast %246 : vector<1x128xf32> to vector<16x128xf32>
    %248 = arith.addf %245, %247 : vector<16x128xf32>
    %249 = arith.cmpf ogt, %248, %241 : vector<16x128xf32>
    %250 = arith.select %249, %248, %241 : vector<16x128xi1>, vector<16x128xf32>
    %c9_i32_88 = arith.constant 9 : i32
    %251 = vector.broadcast %c9_i32_88 : i32 to vector<16x128xi32>
    %252 = arith.select %249, %251, %243 : vector<16x128xi1>, vector<16x128xi32>
    %c10_89 = arith.constant 10 : index
    %c0_90 = arith.constant 0 : index
    %c0_91 = arith.constant 0 : index
    %253 = vector.load %arg2[%c10_89, %c0_90, %c0_91] : memref<16x16x128xf32, #tpu.memory_space<vmem>>, vector<1x16x128xf32>
    %254 = vector.shape_cast %253 : vector<1x16x128xf32> to vector<16x128xf32>
    %255 = vector.extract_strided_slice %160 {offsets = [10, 0], sizes = [1, 128], strides = [1, 1]} : vector<16x128xf32> to vector<1x128xf32>
    %256 = vector.broadcast %255 : vector<1x128xf32> to vector<16x128xf32>
    %257 = arith.addf %254, %256 : vector<16x128xf32>
    %258 = arith.cmpf ogt, %257, %250 : vector<16x128xf32>
    %259 = arith.select %258, %257, %250 : vector<16x128xi1>, vector<16x128xf32>
    %c10_i32_92 = arith.constant 10 : i32
    %260 = vector.broadcast %c10_i32_92 : i32 to vector<16x128xi32>
    %261 = arith.select %258, %260, %252 : vector<16x128xi1>, vector<16x128xi32>
    %c11_93 = arith.constant 11 : index
    %c0_94 = arith.constant 0 : index
    %c0_95 = arith.constant 0 : index
    %262 = vector.load %arg2[%c11_93, %c0_94, %c0_95] : memref<16x16x128xf32, #tpu.memory_space<vmem>>, vector<1x16x128xf32>
    %263 = vector.shape_cast %262 : vector<1x16x128xf32> to vector<16x128xf32>
    %264 = vector.extract_strided_slice %160 {offsets = [11, 0], sizes = [1, 128], strides = [1, 1]} : vector<16x128xf32> to vector<1x128xf32>
    %265 = vector.broadcast %264 : vector<1x128xf32> to vector<16x128xf32>
    %266 = arith.addf %263, %265 : vector<16x128xf32>
    %267 = arith.cmpf ogt, %266, %259 : vector<16x128xf32>
    %268 = arith.select %267, %266, %259 : vector<16x128xi1>, vector<16x128xf32>
    %c11_i32_96 = arith.constant 11 : i32
    %269 = vector.broadcast %c11_i32_96 : i32 to vector<16x128xi32>
    %270 = arith.select %267, %269, %261 : vector<16x128xi1>, vector<16x128xi32>
    %c12_97 = arith.constant 12 : index
    %c0_98 = arith.constant 0 : index
    %c0_99 = arith.constant 0 : index
    %271 = vector.load %arg2[%c12_97, %c0_98, %c0_99] : memref<16x16x128xf32, #tpu.memory_space<vmem>>, vector<1x16x128xf32>
    %272 = vector.shape_cast %271 : vector<1x16x128xf32> to vector<16x128xf32>
    %273 = vector.extract_strided_slice %160 {offsets = [12, 0], sizes = [1, 128], strides = [1, 1]} : vector<16x128xf32> to vector<1x128xf32>
    %274 = vector.broadcast %273 : vector<1x128xf32> to vector<16x128xf32>
    %275 = arith.addf %272, %274 : vector<16x128xf32>
    %276 = arith.cmpf ogt, %275, %268 : vector<16x128xf32>
    %277 = arith.select %276, %275, %268 : vector<16x128xi1>, vector<16x128xf32>
    %c12_i32_100 = arith.constant 12 : i32
    %278 = vector.broadcast %c12_i32_100 : i32 to vector<16x128xi32>
    %279 = arith.select %276, %278, %270 : vector<16x128xi1>, vector<16x128xi32>
    %c13_101 = arith.constant 13 : index
    %c0_102 = arith.constant 0 : index
    %c0_103 = arith.constant 0 : index
    %280 = vector.load %arg2[%c13_101, %c0_102, %c0_103] : memref<16x16x128xf32, #tpu.memory_space<vmem>>, vector<1x16x128xf32>
    %281 = vector.shape_cast %280 : vector<1x16x128xf32> to vector<16x128xf32>
    %282 = vector.extract_strided_slice %160 {offsets = [13, 0], sizes = [1, 128], strides = [1, 1]} : vector<16x128xf32> to vector<1x128xf32>
    %283 = vector.broadcast %282 : vector<1x128xf32> to vector<16x128xf32>
    %284 = arith.addf %281, %283 : vector<16x128xf32>
    %285 = arith.cmpf ogt, %284, %277 : vector<16x128xf32>
    %286 = arith.select %285, %284, %277 : vector<16x128xi1>, vector<16x128xf32>
    %c13_i32_104 = arith.constant 13 : i32
    %287 = vector.broadcast %c13_i32_104 : i32 to vector<16x128xi32>
    %288 = arith.select %285, %287, %279 : vector<16x128xi1>, vector<16x128xi32>
    %c14_105 = arith.constant 14 : index
    %c0_106 = arith.constant 0 : index
    %c0_107 = arith.constant 0 : index
    %289 = vector.load %arg2[%c14_105, %c0_106, %c0_107] : memref<16x16x128xf32, #tpu.memory_space<vmem>>, vector<1x16x128xf32>
    %290 = vector.shape_cast %289 : vector<1x16x128xf32> to vector<16x128xf32>
    %291 = vector.extract_strided_slice %160 {offsets = [14, 0], sizes = [1, 128], strides = [1, 1]} : vector<16x128xf32> to vector<1x128xf32>
    %292 = vector.broadcast %291 : vector<1x128xf32> to vector<16x128xf32>
    %293 = arith.addf %290, %292 : vector<16x128xf32>
    %294 = arith.cmpf ogt, %293, %286 : vector<16x128xf32>
    %295 = arith.select %294, %293, %286 : vector<16x128xi1>, vector<16x128xf32>
    %c14_i32_108 = arith.constant 14 : i32
    %296 = vector.broadcast %c14_i32_108 : i32 to vector<16x128xi32>
    %297 = arith.select %294, %296, %288 : vector<16x128xi1>, vector<16x128xi32>
    %c15_109 = arith.constant 15 : index
    %c0_110 = arith.constant 0 : index
    %c0_111 = arith.constant 0 : index
    %298 = vector.load %arg2[%c15_109, %c0_110, %c0_111] : memref<16x16x128xf32, #tpu.memory_space<vmem>>, vector<1x16x128xf32>
    %299 = vector.shape_cast %298 : vector<1x16x128xf32> to vector<16x128xf32>
    %300 = vector.extract_strided_slice %160 {offsets = [15, 0], sizes = [1, 128], strides = [1, 1]} : vector<16x128xf32> to vector<1x128xf32>
    %301 = vector.broadcast %300 : vector<1x128xf32> to vector<16x128xf32>
    %302 = arith.addf %299, %301 : vector<16x128xf32>
    %303 = arith.cmpf ogt, %302, %295 : vector<16x128xf32>
    %304 = arith.select %303, %302, %295 : vector<16x128xi1>, vector<16x128xf32>
    %c15_i32_112 = arith.constant 15 : i32
    %305 = vector.broadcast %c15_i32_112 : i32 to vector<16x128xi32>
    %306 = arith.select %303, %305, %297 : vector<16x128xi1>, vector<16x128xi32>
    %c2_i32_113 = arith.constant 2 : i32
    %307 = vector.broadcast %c2_i32_113 : i32 to vector<1x128xi32>
    %308 = arith.cmpi sgt, %0, %307 : vector<1x128xi32>
    %c0_i32_114 = arith.constant 0 : i32
    %309 = vector.shape_cast %308 : vector<1x128xi1> to vector<1x128xi1>
    %310 = vector.broadcast %309 : vector<1x128xi1> to vector<16x128xi1>
    %311 = vector.broadcast %c0_i32_114 : i32 to vector<16x128xi32>
    %312 = arith.select %310, %306, %311 : vector<16x128xi1>, vector<16x128xi32>
    %c1_115 = arith.constant 1 : index
    %c0_116 = arith.constant 0 : index
    %c0_117 = arith.constant 0 : index
    %313 = vector.load %arg5[%c1_115, %c0_116, %c0_117] : memref<8x16x128xi32, #tpu.memory_space<vmem>>, vector<1x16x128xi32>
    %314 = vector.shape_cast %313 : vector<1x16x128xi32> to vector<16x128xi32>
    %315 = vector.shape_cast %312 : vector<16x128xi32> to vector<1x16x128xi32>
    tpu.vector_store %arg5[%c1_115, %c0_116, %c0_117], %315 {strides = array<i32>} : memref<8x16x128xi32, #tpu.memory_space<vmem>>, vector<1x16x128xi32>,
    %c2_118 = arith.constant 2 : index
    %c0_119 = arith.constant 0 : index
    %c0_120 = arith.constant 0 : index
    %316 = vector.load %arg1[%c2_118, %c0_119, %c0_120] : memref<8x16x128xf32, #tpu.memory_space<vmem>>, vector<1x16x128xf32>
    %317 = vector.shape_cast %316 : vector<1x16x128xf32> to vector<16x128xf32>
    %318 = arith.addf %304, %317 : vector<16x128xf32>
    %c3_i32_121 = arith.constant 3 : i32
    %319 = vector.broadcast %c3_i32_121 : i32 to vector<1x128xi32>
    %320 = arith.cmpi eq, %0, %319 : vector<1x128xi32>
    %321 = vector.shape_cast %320 : vector<1x128xi1> to vector<1x128xi1>
    %322 = vector.broadcast %321 : vector<1x128xi1> to vector<16x128xi1>
    %323 = arith.select %322, %318, %165 : vector<16x128xi1>, vector<16x128xf32>
    %c0_122 = arith.constant 0 : index
    %c0_123 = arith.constant 0 : index
    %c0_124 = arith.constant 0 : index
    %324 = vector.load %arg2[%c0_122, %c0_123, %c0_124] : memref<16x16x128xf32, #tpu.memory_space<vmem>>, vector<1x16x128xf32>
    %325 = vector.shape_cast %324 : vector<1x16x128xf32> to vector<16x128xf32>
    %326 = vector.extract_strided_slice %318 {offsets = [0, 0], sizes = [1, 128], strides = [1, 1]} : vector<16x128xf32> to vector<1x128xf32>
    %327 = vector.broadcast %326 : vector<1x128xf32> to vector<16x128xf32>
    %328 = arith.addf %325, %327 : vector<16x128xf32>
    %c0_i32_125 = arith.constant 0 : i32
    %329 = vector.broadcast %c0_i32_125 : i32 to vector<16x128xi32>
    %c1_126 = arith.constant 1 : index
    %c0_127 = arith.constant 0 : index
    %c0_128 = arith.constant 0 : index
    %330 = vector.load %arg2[%c1_126, %c0_127, %c0_128] : memref<16x16x128xf32, #tpu.memory_space<vmem>>, vector<1x16x128xf32>
    %331 = vector.shape_cast %330 : vector<1x16x128xf32> to vector<16x128xf32>
    %332 = vector.extract_strided_slice %318 {offsets = [1, 0], sizes = [1, 128], strides = [1, 1]} : vector<16x128xf32> to vector<1x128xf32>
    %333 = vector.broadcast %332 : vector<1x128xf32> to vector<16x128xf32>
    %334 = arith.addf %331, %333 : vector<16x128xf32>
    %335 = arith.cmpf ogt, %334, %328 : vector<16x128xf32>
    %336 = arith.select %335, %334, %328 : vector<16x128xi1>, vector<16x128xf32>
    %c1_i32_129 = arith.constant 1 : i32
    %337 = vector.broadcast %c1_i32_129 : i32 to vector<16x128xi32>
    %338 = arith.select %335, %337, %329 : vector<16x128xi1>, vector<16x128xi32>
    %c2_130 = arith.constant 2 : index
    %c0_131 = arith.constant 0 : index
    %c0_132 = arith.constant 0 : index
    %339 = vector.load %arg2[%c2_130, %c0_131, %c0_132] : memref<16x16x128xf32, #tpu.memory_space<vmem>>, vector<1x16x128xf32>
    %340 = vector.shape_cast %339 : vector<1x16x128xf32> to vector<16x128xf32>
    %341 = vector.extract_strided_slice %318 {offsets = [2, 0], sizes = [1, 128], strides = [1, 1]} : vector<16x128xf32> to vector<1x128xf32>
    %342 = vector.broadcast %341 : vector<1x128xf32> to vector<16x128xf32>
    %343 = arith.addf %340, %342 : vector<16x128xf32>
    %344 = arith.cmpf ogt, %343, %336 : vector<16x128xf32>
    %345 = arith.select %344, %343, %336 : vector<16x128xi1>, vector<16x128xf32>
    %c2_i32_133 = arith.constant 2 : i32
    %346 = vector.broadcast %c2_i32_133 : i32 to vector<16x128xi32>
    %347 = arith.select %344, %346, %338 : vector<16x128xi1>, vector<16x128xi32>
    %c3_134 = arith.constant 3 : index
    %c0_135 = arith.constant 0 : index
    %c0_136 = arith.constant 0 : index
    %348 = vector.load %arg2[%c3_134, %c0_135, %c0_136] : memref<16x16x128xf32, #tpu.memory_space<vmem>>, vector<1x16x128xf32>
    %349 = vector.shape_cast %348 : vector<1x16x128xf32> to vector<16x128xf32>
    %350 = vector.extract_strided_slice %318 {offsets = [3, 0], sizes = [1, 128], strides = [1, 1]} : vector<16x128xf32> to vector<1x128xf32>
    %351 = vector.broadcast %350 : vector<1x128xf32> to vector<16x128xf32>
    %352 = arith.addf %349, %351 : vector<16x128xf32>
    %353 = arith.cmpf ogt, %352, %345 : vector<16x128xf32>
    %354 = arith.select %353, %352, %345 : vector<16x128xi1>, vector<16x128xf32>
    %c3_i32_137 = arith.constant 3 : i32
    %355 = vector.broadcast %c3_i32_137 : i32 to vector<16x128xi32>
    %356 = arith.select %353, %355, %347 : vector<16x128xi1>, vector<16x128xi32>
    %c4_138 = arith.constant 4 : index
    %c0_139 = arith.constant 0 : index
    %c0_140 = arith.constant 0 : index
    %357 = vector.load %arg2[%c4_138, %c0_139, %c0_140] : memref<16x16x128xf32, #tpu.memory_space<vmem>>, vector<1x16x128xf32>
    %358 = vector.shape_cast %357 : vector<1x16x128xf32> to vector<16x128xf32>
    %359 = vector.extract_strided_slice %318 {offsets = [4, 0], sizes = [1, 128], strides = [1, 1]} : vector<16x128xf32> to vector<1x128xf32>
    %360 = vector.broadcast %359 : vector<1x128xf32> to vector<16x128xf32>
    %361 = arith.addf %358, %360 : vector<16x128xf32>
    %362 = arith.cmpf ogt, %361, %354 : vector<16x128xf32>
    %363 = arith.select %362, %361, %354 : vector<16x128xi1>, vector<16x128xf32>
    %c4_i32_141 = arith.constant 4 : i32
    %364 = vector.broadcast %c4_i32_141 : i32 to vector<16x128xi32>
    %365 = arith.select %362, %364, %356 : vector<16x128xi1>, vector<16x128xi32>
    %c5_142 = arith.constant 5 : index
    %c0_143 = arith.constant 0 : index
    %c0_144 = arith.constant 0 : index
    %366 = vector.load %arg2[%c5_142, %c0_143, %c0_144] : memref<16x16x128xf32, #tpu.memory_space<vmem>>, vector<1x16x128xf32>
    %367 = vector.shape_cast %366 : vector<1x16x128xf32> to vector<16x128xf32>
    %368 = vector.extract_strided_slice %318 {offsets = [5, 0], sizes = [1, 128], strides = [1, 1]} : vector<16x128xf32> to vector<1x128xf32>
    %369 = vector.broadcast %368 : vector<1x128xf32> to vector<16x128xf32>
    %370 = arith.addf %367, %369 : vector<16x128xf32>
    %371 = arith.cmpf ogt, %370, %363 : vector<16x128xf32>
    %372 = arith.select %371, %370, %363 : vector<16x128xi1>, vector<16x128xf32>
    %c5_i32_145 = arith.constant 5 : i32
    %373 = vector.broadcast %c5_i32_145 : i32 to vector<16x128xi32>
    %374 = arith.select %371, %373, %365 : vector<16x128xi1>, vector<16x128xi32>
    %c6_146 = arith.constant 6 : index
    %c0_147 = arith.constant 0 : index
    %c0_148 = arith.constant 0 : index
    %375 = vector.load %arg2[%c6_146, %c0_147, %c0_148] : memref<16x16x128xf32, #tpu.memory_space<vmem>>, vector<1x16x128xf32>
    %376 = vector.shape_cast %375 : vector<1x16x128xf32> to vector<16x128xf32>
    %377 = vector.extract_strided_slice %318 {offsets = [6, 0], sizes = [1, 128], strides = [1, 1]} : vector<16x128xf32> to vector<1x128xf32>
    %378 = vector.broadcast %377 : vector<1x128xf32> to vector<16x128xf32>
    %379 = arith.addf %376, %378 : vector<16x128xf32>
    %380 = arith.cmpf ogt, %379, %372 : vector<16x128xf32>
    %381 = arith.select %380, %379, %372 : vector<16x128xi1>, vector<16x128xf32>
    %c6_i32_149 = arith.constant 6 : i32
    %382 = vector.broadcast %c6_i32_149 : i32 to vector<16x128xi32>
    %383 = arith.select %380, %382, %374 : vector<16x128xi1>, vector<16x128xi32>
    %c7_150 = arith.constant 7 : index
    %c0_151 = arith.constant 0 : index
    %c0_152 = arith.constant 0 : index
    %384 = vector.load %arg2[%c7_150, %c0_151, %c0_152] : memref<16x16x128xf32, #tpu.memory_space<vmem>>, vector<1x16x128xf32>
    %385 = vector.shape_cast %384 : vector<1x16x128xf32> to vector<16x128xf32>
    %386 = vector.extract_strided_slice %318 {offsets = [7, 0], sizes = [1, 128], strides = [1, 1]} : vector<16x128xf32> to vector<1x128xf32>
    %387 = vector.broadcast %386 : vector<1x128xf32> to vector<16x128xf32>
    %388 = arith.addf %385, %387 : vector<16x128xf32>
    %389 = arith.cmpf ogt, %388, %381 : vector<16x128xf32>
    %390 = arith.select %389, %388, %381 : vector<16x128xi1>, vector<16x128xf32>
    %c7_i32_153 = arith.constant 7 : i32
    %391 = vector.broadcast %c7_i32_153 : i32 to vector<16x128xi32>
    %392 = arith.select %389, %391, %383 : vector<16x128xi1>, vector<16x128xi32>
    %c8_154 = arith.constant 8 : index
    %c0_155 = arith.constant 0 : index
    %c0_156 = arith.constant 0 : index
    %393 = vector.load %arg2[%c8_154, %c0_155, %c0_156] : memref<16x16x128xf32, #tpu.memory_space<vmem>>, vector<1x16x128xf32>
    %394 = vector.shape_cast %393 : vector<1x16x128xf32> to vector<16x128xf32>
    %395 = vector.extract_strided_slice %318 {offsets = [8, 0], sizes = [1, 128], strides = [1, 1]} : vector<16x128xf32> to vector<1x128xf32>
    %396 = vector.broadcast %395 : vector<1x128xf32> to vector<16x128xf32>
    %397 = arith.addf %394, %396 : vector<16x128xf32>
    %398 = arith.cmpf ogt, %397, %390 : vector<16x128xf32>
    %399 = arith.select %398, %397, %390 : vector<16x128xi1>, vector<16x128xf32>
    %c8_i32_157 = arith.constant 8 : i32
    %400 = vector.broadcast %c8_i32_157 : i32 to vector<16x128xi32>
    %401 = arith.select %398, %400, %392 : vector<16x128xi1>, vector<16x128xi32>
    %c9_158 = arith.constant 9 : index
    %c0_159 = arith.constant 0 : index
    %c0_160 = arith.constant 0 : index
    %402 = vector.load %arg2[%c9_158, %c0_159, %c0_160] : memref<16x16x128xf32, #tpu.memory_space<vmem>>, vector<1x16x128xf32>
    %403 = vector.shape_cast %402 : vector<1x16x128xf32> to vector<16x128xf32>
    %404 = vector.extract_strided_slice %318 {offsets = [9, 0], sizes = [1, 128], strides = [1, 1]} : vector<16x128xf32> to vector<1x128xf32>
    %405 = vector.broadcast %404 : vector<1x128xf32> to vector<16x128xf32>
    %406 = arith.addf %403, %405 : vector<16x128xf32>
    %407 = arith.cmpf ogt, %406, %399 : vector<16x128xf32>
    %408 = arith.select %407, %406, %399 : vector<16x128xi1>, vector<16x128xf32>
    %c9_i32_161 = arith.constant 9 : i32
    %409 = vector.broadcast %c9_i32_161 : i32 to vector<16x128xi32>
    %410 = arith.select %407, %409, %401 : vector<16x128xi1>, vector<16x128xi32>
    %c10_162 = arith.constant 10 : index
    %c0_163 = arith.constant 0 : index
    %c0_164 = arith.constant 0 : index
    %411 = vector.load %arg2[%c10_162, %c0_163, %c0_164] : memref<16x16x128xf32, #tpu.memory_space<vmem>>, vector<1x16x128xf32>
    %412 = vector.shape_cast %411 : vector<1x16x128xf32> to vector<16x128xf32>
    %413 = vector.extract_strided_slice %318 {offsets = [10, 0], sizes = [1, 128], strides = [1, 1]} : vector<16x128xf32> to vector<1x128xf32>
    %414 = vector.broadcast %413 : vector<1x128xf32> to vector<16x128xf32>
    %415 = arith.addf %412, %414 : vector<16x128xf32>
    %416 = arith.cmpf ogt, %415, %408 : vector<16x128xf32>
    %417 = arith.select %416, %415, %408 : vector<16x128xi1>, vector<16x128xf32>
    %c10_i32_165 = arith.constant 10 : i32
    %418 = vector.broadcast %c10_i32_165 : i32 to vector<16x128xi32>
    %419 = arith.select %416, %418, %410 : vector<16x128xi1>, vector<16x128xi32>
    %c11_166 = arith.constant 11 : index
    %c0_167 = arith.constant 0 : index
    %c0_168 = arith.constant 0 : index
    %420 = vector.load %arg2[%c11_166, %c0_167, %c0_168] : memref<16x16x128xf32, #tpu.memory_space<vmem>>, vector<1x16x128xf32>
    %421 = vector.shape_cast %420 : vector<1x16x128xf32> to vector<16x128xf32>
    %422 = vector.extract_strided_slice %318 {offsets = [11, 0], sizes = [1, 128], strides = [1, 1]} : vector<16x128xf32> to vector<1x128xf32>
    %423 = vector.broadcast %422 : vector<1x128xf32> to vector<16x128xf32>
    %424 = arith.addf %421, %423 : vector<16x128xf32>
    %425 = arith.cmpf ogt, %424, %417 : vector<16x128xf32>
    %426 = arith.select %425, %424, %417 : vector<16x128xi1>, vector<16x128xf32>
    %c11_i32_169 = arith.constant 11 : i32
    %427 = vector.broadcast %c11_i32_169 : i32 to vector<16x128xi32>
    %428 = arith.select %425, %427, %419 : vector<16x128xi1>, vector<16x128xi32>
    %c12_170 = arith.constant 12 : index
    %c0_171 = arith.constant 0 : index
    %c0_172 = arith.constant 0 : index
    %429 = vector.load %arg2[%c12_170, %c0_171, %c0_172] : memref<16x16x128xf32, #tpu.memory_space<vmem>>, vector<1x16x128xf32>
    %430 = vector.shape_cast %429 : vector<1x16x128xf32> to vector<16x128xf32>
    %431 = vector.extract_strided_slice %318 {offsets = [12, 0], sizes = [1, 128], strides = [1, 1]} : vector<16x128xf32> to vector<1x128xf32>
    %432 = vector.broadcast %431 : vector<1x128xf32> to vector<16x128xf32>
    %433 = arith.addf %430, %432 : vector<16x128xf32>
    %434 = arith.cmpf ogt, %433, %426 : vector<16x128xf32>
    %435 = arith.select %434, %433, %426 : vector<16x128xi1>, vector<16x128xf32>
    %c12_i32_173 = arith.constant 12 : i32
    %436 = vector.broadcast %c12_i32_173 : i32 to vector<16x128xi32>
    %437 = arith.select %434, %436, %428 : vector<16x128xi1>, vector<16x128xi32>
    %c13_174 = arith.constant 13 : index
    %c0_175 = arith.constant 0 : index
    %c0_176 = arith.constant 0 : index
    %438 = vector.load %arg2[%c13_174, %c0_175, %c0_176] : memref<16x16x128xf32, #tpu.memory_space<vmem>>, vector<1x16x128xf32>
    %439 = vector.shape_cast %438 : vector<1x16x128xf32> to vector<16x128xf32>
    %440 = vector.extract_strided_slice %318 {offsets = [13, 0], sizes = [1, 128], strides = [1, 1]} : vector<16x128xf32> to vector<1x128xf32>
    %441 = vector.broadcast %440 : vector<1x128xf32> to vector<16x128xf32>
    %442 = arith.addf %439, %441 : vector<16x128xf32>
    %443 = arith.cmpf ogt, %442, %435 : vector<16x128xf32>
    %444 = arith.select %443, %442, %435 : vector<16x128xi1>, vector<16x128xf32>
    %c13_i32_177 = arith.constant 13 : i32
    %445 = vector.broadcast %c13_i32_177 : i32 to vector<16x128xi32>
    %446 = arith.select %443, %445, %437 : vector<16x128xi1>, vector<16x128xi32>
    %c14_178 = arith.constant 14 : index
    %c0_179 = arith.constant 0 : index
    %c0_180 = arith.constant 0 : index
    %447 = vector.load %arg2[%c14_178, %c0_179, %c0_180] : memref<16x16x128xf32, #tpu.memory_space<vmem>>, vector<1x16x128xf32>
    %448 = vector.shape_cast %447 : vector<1x16x128xf32> to vector<16x128xf32>
    %449 = vector.extract_strided_slice %318 {offsets = [14, 0], sizes = [1, 128], strides = [1, 1]} : vector<16x128xf32> to vector<1x128xf32>
    %450 = vector.broadcast %449 : vector<1x128xf32> to vector<16x128xf32>
    %451 = arith.addf %448, %450 : vector<16x128xf32>
    %452 = arith.cmpf ogt, %451, %444 : vector<16x128xf32>
    %453 = arith.select %452, %451, %444 : vector<16x128xi1>, vector<16x128xf32>
    %c14_i32_181 = arith.constant 14 : i32
    %454 = vector.broadcast %c14_i32_181 : i32 to vector<16x128xi32>
    %455 = arith.select %452, %454, %446 : vector<16x128xi1>, vector<16x128xi32>
    %c15_182 = arith.constant 15 : index
    %c0_183 = arith.constant 0 : index
    %c0_184 = arith.constant 0 : index
    %456 = vector.load %arg2[%c15_182, %c0_183, %c0_184] : memref<16x16x128xf32, #tpu.memory_space<vmem>>, vector<1x16x128xf32>
    %457 = vector.shape_cast %456 : vector<1x16x128xf32> to vector<16x128xf32>
    %458 = vector.extract_strided_slice %318 {offsets = [15, 0], sizes = [1, 128], strides = [1, 1]} : vector<16x128xf32> to vector<1x128xf32>
    %459 = vector.broadcast %458 : vector<1x128xf32> to vector<16x128xf32>
    %460 = arith.addf %457, %459 : vector<16x128xf32>
    %461 = arith.cmpf ogt, %460, %453 : vector<16x128xf32>
    %462 = arith.select %461, %460, %453 : vector<16x128xi1>, vector<16x128xf32>
    %c15_i32_185 = arith.constant 15 : i32
    %463 = vector.broadcast %c15_i32_185 : i32 to vector<16x128xi32>
    %464 = arith.select %461, %463, %455 : vector<16x128xi1>, vector<16x128xi32>
    %c3_i32_186 = arith.constant 3 : i32
    %465 = vector.broadcast %c3_i32_186 : i32 to vector<1x128xi32>
    %466 = arith.cmpi sgt, %0, %465 : vector<1x128xi32>
    %c0_i32_187 = arith.constant 0 : i32
    %467 = vector.shape_cast %466 : vector<1x128xi1> to vector<1x128xi1>
    %468 = vector.broadcast %467 : vector<1x128xi1> to vector<16x128xi1>
    %469 = vector.broadcast %c0_i32_187 : i32 to vector<16x128xi32>
    %470 = arith.select %468, %464, %469 : vector<16x128xi1>, vector<16x128xi32>
    %c2_188 = arith.constant 2 : index
    %c0_189 = arith.constant 0 : index
    %c0_190 = arith.constant 0 : index
    %471 = vector.load %arg5[%c2_188, %c0_189, %c0_190] : memref<8x16x128xi32, #tpu.memory_space<vmem>>, vector<1x16x128xi32>
    %472 = vector.shape_cast %471 : vector<1x16x128xi32> to vector<16x128xi32>
    %473 = vector.shape_cast %470 : vector<16x128xi32> to vector<1x16x128xi32>
    tpu.vector_store %arg5[%c2_188, %c0_189, %c0_190], %473 {strides = array<i32>} : memref<8x16x128xi32, #tpu.memory_space<vmem>>, vector<1x16x128xi32>,
    %c3_191 = arith.constant 3 : index
    %c0_192 = arith.constant 0 : index
    %c0_193 = arith.constant 0 : index
    %474 = vector.load %arg1[%c3_191, %c0_192, %c0_193] : memref<8x16x128xf32, #tpu.memory_space<vmem>>, vector<1x16x128xf32>
    %475 = vector.shape_cast %474 : vector<1x16x128xf32> to vector<16x128xf32>
    %476 = arith.addf %462, %475 : vector<16x128xf32>
    %c4_i32_194 = arith.constant 4 : i32
    %477 = vector.broadcast %c4_i32_194 : i32 to vector<1x128xi32>
    %478 = arith.cmpi eq, %0, %477 : vector<1x128xi32>
    %479 = vector.shape_cast %478 : vector<1x128xi1> to vector<1x128xi1>
    %480 = vector.broadcast %479 : vector<1x128xi1> to vector<16x128xi1>
    %481 = arith.select %480, %476, %323 : vector<16x128xi1>, vector<16x128xf32>
    %c0_195 = arith.constant 0 : index
    %c0_196 = arith.constant 0 : index
    %c0_197 = arith.constant 0 : index
    %482 = vector.load %arg2[%c0_195, %c0_196, %c0_197] : memref<16x16x128xf32, #tpu.memory_space<vmem>>, vector<1x16x128xf32>
    %483 = vector.shape_cast %482 : vector<1x16x128xf32> to vector<16x128xf32>
    %484 = vector.extract_strided_slice %476 {offsets = [0, 0], sizes = [1, 128], strides = [1, 1]} : vector<16x128xf32> to vector<1x128xf32>
    %485 = vector.broadcast %484 : vector<1x128xf32> to vector<16x128xf32>
    %486 = arith.addf %483, %485 : vector<16x128xf32>
    %c0_i32_198 = arith.constant 0 : i32
    %487 = vector.broadcast %c0_i32_198 : i32 to vector<16x128xi32>
    %c1_199 = arith.constant 1 : index
    %c0_200 = arith.constant 0 : index
    %c0_201 = arith.constant 0 : index
    %488 = vector.load %arg2[%c1_199, %c0_200, %c0_201] : memref<16x16x128xf32, #tpu.memory_space<vmem>>, vector<1x16x128xf32>
    %489 = vector.shape_cast %488 : vector<1x16x128xf32> to vector<16x128xf32>
    %490 = vector.extract_strided_slice %476 {offsets = [1, 0], sizes = [1, 128], strides = [1, 1]} : vector<16x128xf32> to vector<1x128xf32>
    %491 = vector.broadcast %490 : vector<1x128xf32> to vector<16x128xf32>
    %492 = arith.addf %489, %491 : vector<16x128xf32>
    %493 = arith.cmpf ogt, %492, %486 : vector<16x128xf32>
    %494 = arith.select %493, %492, %486 : vector<16x128xi1>, vector<16x128xf32>
    %c1_i32_202 = arith.constant 1 : i32
    %495 = vector.broadcast %c1_i32_202 : i32 to vector<16x128xi32>
    %496 = arith.select %493, %495, %487 : vector<16x128xi1>, vector<16x128xi32>
    %c2_203 = arith.constant 2 : index
    %c0_204 = arith.constant 0 : index
    %c0_205 = arith.constant 0 : index
    %497 = vector.load %arg2[%c2_203, %c0_204, %c0_205] : memref<16x16x128xf32, #tpu.memory_space<vmem>>, vector<1x16x128xf32>
    %498 = vector.shape_cast %497 : vector<1x16x128xf32> to vector<16x128xf32>
    %499 = vector.extract_strided_slice %476 {offsets = [2, 0], sizes = [1, 128], strides = [1, 1]} : vector<16x128xf32> to vector<1x128xf32>
    %500 = vector.broadcast %499 : vector<1x128xf32> to vector<16x128xf32>
    %501 = arith.addf %498, %500 : vector<16x128xf32>
    %502 = arith.cmpf ogt, %501, %494 : vector<16x128xf32>
    %503 = arith.select %502, %501, %494 : vector<16x128xi1>, vector<16x128xf32>
    %c2_i32_206 = arith.constant 2 : i32
    %504 = vector.broadcast %c2_i32_206 : i32 to vector<16x128xi32>
    %505 = arith.select %502, %504, %496 : vector<16x128xi1>, vector<16x128xi32>
    %c3_207 = arith.constant 3 : index
    %c0_208 = arith.constant 0 : index
    %c0_209 = arith.constant 0 : index
    %506 = vector.load %arg2[%c3_207, %c0_208, %c0_209] : memref<16x16x128xf32, #tpu.memory_space<vmem>>, vector<1x16x128xf32>
    %507 = vector.shape_cast %506 : vector<1x16x128xf32> to vector<16x128xf32>
    %508 = vector.extract_strided_slice %476 {offsets = [3, 0], sizes = [1, 128], strides = [1, 1]} : vector<16x128xf32> to vector<1x128xf32>
    %509 = vector.broadcast %508 : vector<1x128xf32> to vector<16x128xf32>
    %510 = arith.addf %507, %509 : vector<16x128xf32>
    %511 = arith.cmpf ogt, %510, %503 : vector<16x128xf32>
    %512 = arith.select %511, %510, %503 : vector<16x128xi1>, vector<16x128xf32>
    %c3_i32_210 = arith.constant 3 : i32
    %513 = vector.broadcast %c3_i32_210 : i32 to vector<16x128xi32>
    %514 = arith.select %511, %513, %505 : vector<16x128xi1>, vector<16x128xi32>
    %c4_211 = arith.constant 4 : index
    %c0_212 = arith.constant 0 : index
    %c0_213 = arith.constant 0 : index
    %515 = vector.load %arg2[%c4_211, %c0_212, %c0_213] : memref<16x16x128xf32, #tpu.memory_space<vmem>>, vector<1x16x128xf32>
    %516 = vector.shape_cast %515 : vector<1x16x128xf32> to vector<16x128xf32>
    %517 = vector.extract_strided_slice %476 {offsets = [4, 0], sizes = [1, 128], strides = [1, 1]} : vector<16x128xf32> to vector<1x128xf32>
    %518 = vector.broadcast %517 : vector<1x128xf32> to vector<16x128xf32>
    %519 = arith.addf %516, %518 : vector<16x128xf32>
    %520 = arith.cmpf ogt, %519, %512 : vector<16x128xf32>
    %521 = arith.select %520, %519, %512 : vector<16x128xi1>, vector<16x128xf32>
    %c4_i32_214 = arith.constant 4 : i32
    %522 = vector.broadcast %c4_i32_214 : i32 to vector<16x128xi32>
    %523 = arith.select %520, %522, %514 : vector<16x128xi1>, vector<16x128xi32>
    %c5_215 = arith.constant 5 : index
    %c0_216 = arith.constant 0 : index
    %c0_217 = arith.constant 0 : index
    %524 = vector.load %arg2[%c5_215, %c0_216, %c0_217] : memref<16x16x128xf32, #tpu.memory_space<vmem>>, vector<1x16x128xf32>
    %525 = vector.shape_cast %524 : vector<1x16x128xf32> to vector<16x128xf32>
    %526 = vector.extract_strided_slice %476 {offsets = [5, 0], sizes = [1, 128], strides = [1, 1]} : vector<16x128xf32> to vector<1x128xf32>
    %527 = vector.broadcast %526 : vector<1x128xf32> to vector<16x128xf32>
    %528 = arith.addf %525, %527 : vector<16x128xf32>
    %529 = arith.cmpf ogt, %528, %521 : vector<16x128xf32>
    %530 = arith.select %529, %528, %521 : vector<16x128xi1>, vector<16x128xf32>
    %c5_i32_218 = arith.constant 5 : i32
    %531 = vector.broadcast %c5_i32_218 : i32 to vector<16x128xi32>
    %532 = arith.select %529, %531, %523 : vector<16x128xi1>, vector<16x128xi32>
    %c6_219 = arith.constant 6 : index
    %c0_220 = arith.constant 0 : index
    %c0_221 = arith.constant 0 : index
    %533 = vector.load %arg2[%c6_219, %c0_220, %c0_221] : memref<16x16x128xf32, #tpu.memory_space<vmem>>, vector<1x16x128xf32>
    %534 = vector.shape_cast %533 : vector<1x16x128xf32> to vector<16x128xf32>
    %535 = vector.extract_strided_slice %476 {offsets = [6, 0], sizes = [1, 128], strides = [1, 1]} : vector<16x128xf32> to vector<1x128xf32>
    %536 = vector.broadcast %535 : vector<1x128xf32> to vector<16x128xf32>
    %537 = arith.addf %534, %536 : vector<16x128xf32>
    %538 = arith.cmpf ogt, %537, %530 : vector<16x128xf32>
    %539 = arith.select %538, %537, %530 : vector<16x128xi1>, vector<16x128xf32>
    %c6_i32_222 = arith.constant 6 : i32
    %540 = vector.broadcast %c6_i32_222 : i32 to vector<16x128xi32>
    %541 = arith.select %538, %540, %532 : vector<16x128xi1>, vector<16x128xi32>
    %c7_223 = arith.constant 7 : index
    %c0_224 = arith.constant 0 : index
    %c0_225 = arith.constant 0 : index
    %542 = vector.load %arg2[%c7_223, %c0_224, %c0_225] : memref<16x16x128xf32, #tpu.memory_space<vmem>>, vector<1x16x128xf32>
    %543 = vector.shape_cast %542 : vector<1x16x128xf32> to vector<16x128xf32>
    %544 = vector.extract_strided_slice %476 {offsets = [7, 0], sizes = [1, 128], strides = [1, 1]} : vector<16x128xf32> to vector<1x128xf32>
    %545 = vector.broadcast %544 : vector<1x128xf32> to vector<16x128xf32>
    %546 = arith.addf %543, %545 : vector<16x128xf32>
    %547 = arith.cmpf ogt, %546, %539 : vector<16x128xf32>
    %548 = arith.select %547, %546, %539 : vector<16x128xi1>, vector<16x128xf32>
    %c7_i32_226 = arith.constant 7 : i32
    %549 = vector.broadcast %c7_i32_226 : i32 to vector<16x128xi32>
    %550 = arith.select %547, %549, %541 : vector<16x128xi1>, vector<16x128xi32>
    %c8_227 = arith.constant 8 : index
    %c0_228 = arith.constant 0 : index
    %c0_229 = arith.constant 0 : index
    %551 = vector.load %arg2[%c8_227, %c0_228, %c0_229] : memref<16x16x128xf32, #tpu.memory_space<vmem>>, vector<1x16x128xf32>
    %552 = vector.shape_cast %551 : vector<1x16x128xf32> to vector<16x128xf32>
    %553 = vector.extract_strided_slice %476 {offsets = [8, 0], sizes = [1, 128], strides = [1, 1]} : vector<16x128xf32> to vector<1x128xf32>
    %554 = vector.broadcast %553 : vector<1x128xf32> to vector<16x128xf32>
    %555 = arith.addf %552, %554 : vector<16x128xf32>
    %556 = arith.cmpf ogt, %555, %548 : vector<16x128xf32>
    %557 = arith.select %556, %555, %548 : vector<16x128xi1>, vector<16x128xf32>
    %c8_i32_230 = arith.constant 8 : i32
    %558 = vector.broadcast %c8_i32_230 : i32 to vector<16x128xi32>
    %559 = arith.select %556, %558, %550 : vector<16x128xi1>, vector<16x128xi32>
    %c9_231 = arith.constant 9 : index
    %c0_232 = arith.constant 0 : index
    %c0_233 = arith.constant 0 : index
    %560 = vector.load %arg2[%c9_231, %c0_232, %c0_233] : memref<16x16x128xf32, #tpu.memory_space<vmem>>, vector<1x16x128xf32>
    %561 = vector.shape_cast %560 : vector<1x16x128xf32> to vector<16x128xf32>
    %562 = vector.extract_strided_slice %476 {offsets = [9, 0], sizes = [1, 128], strides = [1, 1]} : vector<16x128xf32> to vector<1x128xf32>
    %563 = vector.broadcast %562 : vector<1x128xf32> to vector<16x128xf32>
    %564 = arith.addf %561, %563 : vector<16x128xf32>
    %565 = arith.cmpf ogt, %564, %557 : vector<16x128xf32>
    %566 = arith.select %565, %564, %557 : vector<16x128xi1>, vector<16x128xf32>
    %c9_i32_234 = arith.constant 9 : i32
    %567 = vector.broadcast %c9_i32_234 : i32 to vector<16x128xi32>
    %568 = arith.select %565, %567, %559 : vector<16x128xi1>, vector<16x128xi32>
    %c10_235 = arith.constant 10 : index
    %c0_236 = arith.constant 0 : index
    %c0_237 = arith.constant 0 : index
    %569 = vector.load %arg2[%c10_235, %c0_236, %c0_237] : memref<16x16x128xf32, #tpu.memory_space<vmem>>, vector<1x16x128xf32>
    %570 = vector.shape_cast %569 : vector<1x16x128xf32> to vector<16x128xf32>
    %571 = vector.extract_strided_slice %476 {offsets = [10, 0], sizes = [1, 128], strides = [1, 1]} : vector<16x128xf32> to vector<1x128xf32>
    %572 = vector.broadcast %571 : vector<1x128xf32> to vector<16x128xf32>
    %573 = arith.addf %570, %572 : vector<16x128xf32>
    %574 = arith.cmpf ogt, %573, %566 : vector<16x128xf32>
    %575 = arith.select %574, %573, %566 : vector<16x128xi1>, vector<16x128xf32>
    %c10_i32_238 = arith.constant 10 : i32
    %576 = vector.broadcast %c10_i32_238 : i32 to vector<16x128xi32>
    %577 = arith.select %574, %576, %568 : vector<16x128xi1>, vector<16x128xi32>
    %c11_239 = arith.constant 11 : index
    %c0_240 = arith.constant 0 : index
    %c0_241 = arith.constant 0 : index
    %578 = vector.load %arg2[%c11_239, %c0_240, %c0_241] : memref<16x16x128xf32, #tpu.memory_space<vmem>>, vector<1x16x128xf32>
    %579 = vector.shape_cast %578 : vector<1x16x128xf32> to vector<16x128xf32>
    %580 = vector.extract_strided_slice %476 {offsets = [11, 0], sizes = [1, 128], strides = [1, 1]} : vector<16x128xf32> to vector<1x128xf32>
    %581 = vector.broadcast %580 : vector<1x128xf32> to vector<16x128xf32>
    %582 = arith.addf %579, %581 : vector<16x128xf32>
    %583 = arith.cmpf ogt, %582, %575 : vector<16x128xf32>
    %584 = arith.select %583, %582, %575 : vector<16x128xi1>, vector<16x128xf32>
    %c11_i32_242 = arith.constant 11 : i32
    %585 = vector.broadcast %c11_i32_242 : i32 to vector<16x128xi32>
    %586 = arith.select %583, %585, %577 : vector<16x128xi1>, vector<16x128xi32>
    %c12_243 = arith.constant 12 : index
    %c0_244 = arith.constant 0 : index
    %c0_245 = arith.constant 0 : index
    %587 = vector.load %arg2[%c12_243, %c0_244, %c0_245] : memref<16x16x128xf32, #tpu.memory_space<vmem>>, vector<1x16x128xf32>
    %588 = vector.shape_cast %587 : vector<1x16x128xf32> to vector<16x128xf32>
    %589 = vector.extract_strided_slice %476 {offsets = [12, 0], sizes = [1, 128], strides = [1, 1]} : vector<16x128xf32> to vector<1x128xf32>
    %590 = vector.broadcast %589 : vector<1x128xf32> to vector<16x128xf32>
    %591 = arith.addf %588, %590 : vector<16x128xf32>
    %592 = arith.cmpf ogt, %591, %584 : vector<16x128xf32>
    %593 = arith.select %592, %591, %584 : vector<16x128xi1>, vector<16x128xf32>
    %c12_i32_246 = arith.constant 12 : i32
    %594 = vector.broadcast %c12_i32_246 : i32 to vector<16x128xi32>
    %595 = arith.select %592, %594, %586 : vector<16x128xi1>, vector<16x128xi32>
    %c13_247 = arith.constant 13 : index
    %c0_248 = arith.constant 0 : index
    %c0_249 = arith.constant 0 : index
    %596 = vector.load %arg2[%c13_247, %c0_248, %c0_249] : memref<16x16x128xf32, #tpu.memory_space<vmem>>, vector<1x16x128xf32>
    %597 = vector.shape_cast %596 : vector<1x16x128xf32> to vector<16x128xf32>
    %598 = vector.extract_strided_slice %476 {offsets = [13, 0], sizes = [1, 128], strides = [1, 1]} : vector<16x128xf32> to vector<1x128xf32>
    %599 = vector.broadcast %598 : vector<1x128xf32> to vector<16x128xf32>
    %600 = arith.addf %597, %599 : vector<16x128xf32>
    %601 = arith.cmpf ogt, %600, %593 : vector<16x128xf32>
    %602 = arith.select %601, %600, %593 : vector<16x128xi1>, vector<16x128xf32>
    %c13_i32_250 = arith.constant 13 : i32
    %603 = vector.broadcast %c13_i32_250 : i32 to vector<16x128xi32>
    %604 = arith.select %601, %603, %595 : vector<16x128xi1>, vector<16x128xi32>
    %c14_251 = arith.constant 14 : index
    %c0_252 = arith.constant 0 : index
    %c0_253 = arith.constant 0 : index
    %605 = vector.load %arg2[%c14_251, %c0_252, %c0_253] : memref<16x16x128xf32, #tpu.memory_space<vmem>>, vector<1x16x128xf32>
    %606 = vector.shape_cast %605 : vector<1x16x128xf32> to vector<16x128xf32>
    %607 = vector.extract_strided_slice %476 {offsets = [14, 0], sizes = [1, 128], strides = [1, 1]} : vector<16x128xf32> to vector<1x128xf32>
    %608 = vector.broadcast %607 : vector<1x128xf32> to vector<16x128xf32>
    %609 = arith.addf %606, %608 : vector<16x128xf32>
    %610 = arith.cmpf ogt, %609, %602 : vector<16x128xf32>
    %611 = arith.select %610, %609, %602 : vector<16x128xi1>, vector<16x128xf32>
    %c14_i32_254 = arith.constant 14 : i32
    %612 = vector.broadcast %c14_i32_254 : i32 to vector<16x128xi32>
    %613 = arith.select %610, %612, %604 : vector<16x128xi1>, vector<16x128xi32>
    %c15_255 = arith.constant 15 : index
    %c0_256 = arith.constant 0 : index
    %c0_257 = arith.constant 0 : index
    %614 = vector.load %arg2[%c15_255, %c0_256, %c0_257] : memref<16x16x128xf32, #tpu.memory_space<vmem>>, vector<1x16x128xf32>
    %615 = vector.shape_cast %614 : vector<1x16x128xf32> to vector<16x128xf32>
    %616 = vector.extract_strided_slice %476 {offsets = [15, 0], sizes = [1, 128], strides = [1, 1]} : vector<16x128xf32> to vector<1x128xf32>
    %617 = vector.broadcast %616 : vector<1x128xf32> to vector<16x128xf32>
    %618 = arith.addf %615, %617 : vector<16x128xf32>
    %619 = arith.cmpf ogt, %618, %611 : vector<16x128xf32>
    %620 = arith.select %619, %618, %611 : vector<16x128xi1>, vector<16x128xf32>
    %c15_i32_258 = arith.constant 15 : i32
    %621 = vector.broadcast %c15_i32_258 : i32 to vector<16x128xi32>
    %622 = arith.select %619, %621, %613 : vector<16x128xi1>, vector<16x128xi32>
    %c4_i32_259 = arith.constant 4 : i32
    %623 = vector.broadcast %c4_i32_259 : i32 to vector<1x128xi32>
    %624 = arith.cmpi sgt, %0, %623 : vector<1x128xi32>
    %c0_i32_260 = arith.constant 0 : i32
    %625 = vector.shape_cast %624 : vector<1x128xi1> to vector<1x128xi1>
    %626 = vector.broadcast %625 : vector<1x128xi1> to vector<16x128xi1>
    %627 = vector.broadcast %c0_i32_260 : i32 to vector<16x128xi32>
    %628 = arith.select %626, %622, %627 : vector<16x128xi1>, vector<16x128xi32>
    %c3_261 = arith.constant 3 : index
    %c0_262 = arith.constant 0 : index
    %c0_263 = arith.constant 0 : index
    %629 = vector.load %arg5[%c3_261, %c0_262, %c0_263] : memref<8x16x128xi32, #tpu.memory_space<vmem>>, vector<1x16x128xi32>
    %630 = vector.shape_cast %629 : vector<1x16x128xi32> to vector<16x128xi32>
    %631 = vector.shape_cast %628 : vector<16x128xi32> to vector<1x16x128xi32>
    tpu.vector_store %arg5[%c3_261, %c0_262, %c0_263], %631 {strides = array<i32>} : memref<8x16x128xi32, #tpu.memory_space<vmem>>, vector<1x16x128xi32>,
    %c4_264 = arith.constant 4 : index
    %c0_265 = arith.constant 0 : index
    %c0_266 = arith.constant 0 : index
    %632 = vector.load %arg1[%c4_264, %c0_265, %c0_266] : memref<8x16x128xf32, #tpu.memory_space<vmem>>, vector<1x16x128xf32>
    %633 = vector.shape_cast %632 : vector<1x16x128xf32> to vector<16x128xf32>
    %634 = arith.addf %620, %633 : vector<16x128xf32>
    %c5_i32_267 = arith.constant 5 : i32
    %635 = vector.broadcast %c5_i32_267 : i32 to vector<1x128xi32>
    %636 = arith.cmpi eq, %0, %635 : vector<1x128xi32>
    %637 = vector.shape_cast %636 : vector<1x128xi1> to vector<1x128xi1>
    %638 = vector.broadcast %637 : vector<1x128xi1> to vector<16x128xi1>
    %639 = arith.select %638, %634, %481 : vector<16x128xi1>, vector<16x128xf32>
    %c0_268 = arith.constant 0 : index
    %c0_269 = arith.constant 0 : index
    %c0_270 = arith.constant 0 : index
    %640 = vector.load %arg2[%c0_268, %c0_269, %c0_270] : memref<16x16x128xf32, #tpu.memory_space<vmem>>, vector<1x16x128xf32>
    %641 = vector.shape_cast %640 : vector<1x16x128xf32> to vector<16x128xf32>
    %642 = vector.extract_strided_slice %634 {offsets = [0, 0], sizes = [1, 128], strides = [1, 1]} : vector<16x128xf32> to vector<1x128xf32>
    %643 = vector.broadcast %642 : vector<1x128xf32> to vector<16x128xf32>
    %644 = arith.addf %641, %643 : vector<16x128xf32>
    %c0_i32_271 = arith.constant 0 : i32
    %645 = vector.broadcast %c0_i32_271 : i32 to vector<16x128xi32>
    %c1_272 = arith.constant 1 : index
    %c0_273 = arith.constant 0 : index
    %c0_274 = arith.constant 0 : index
    %646 = vector.load %arg2[%c1_272, %c0_273, %c0_274] : memref<16x16x128xf32, #tpu.memory_space<vmem>>, vector<1x16x128xf32>
    %647 = vector.shape_cast %646 : vector<1x16x128xf32> to vector<16x128xf32>
    %648 = vector.extract_strided_slice %634 {offsets = [1, 0], sizes = [1, 128], strides = [1, 1]} : vector<16x128xf32> to vector<1x128xf32>
    %649 = vector.broadcast %648 : vector<1x128xf32> to vector<16x128xf32>
    %650 = arith.addf %647, %649 : vector<16x128xf32>
    %651 = arith.cmpf ogt, %650, %644 : vector<16x128xf32>
    %652 = arith.select %651, %650, %644 : vector<16x128xi1>, vector<16x128xf32>
    %c1_i32_275 = arith.constant 1 : i32
    %653 = vector.broadcast %c1_i32_275 : i32 to vector<16x128xi32>
    %654 = arith.select %651, %653, %645 : vector<16x128xi1>, vector<16x128xi32>
    %c2_276 = arith.constant 2 : index
    %c0_277 = arith.constant 0 : index
    %c0_278 = arith.constant 0 : index
    %655 = vector.load %arg2[%c2_276, %c0_277, %c0_278] : memref<16x16x128xf32, #tpu.memory_space<vmem>>, vector<1x16x128xf32>
    %656 = vector.shape_cast %655 : vector<1x16x128xf32> to vector<16x128xf32>
    %657 = vector.extract_strided_slice %634 {offsets = [2, 0], sizes = [1, 128], strides = [1, 1]} : vector<16x128xf32> to vector<1x128xf32>
    %658 = vector.broadcast %657 : vector<1x128xf32> to vector<16x128xf32>
    %659 = arith.addf %656, %658 : vector<16x128xf32>
    %660 = arith.cmpf ogt, %659, %652 : vector<16x128xf32>
    %661 = arith.select %660, %659, %652 : vector<16x128xi1>, vector<16x128xf32>
    %c2_i32_279 = arith.constant 2 : i32
    %662 = vector.broadcast %c2_i32_279 : i32 to vector<16x128xi32>
    %663 = arith.select %660, %662, %654 : vector<16x128xi1>, vector<16x128xi32>
    %c3_280 = arith.constant 3 : index
    %c0_281 = arith.constant 0 : index
    %c0_282 = arith.constant 0 : index
    %664 = vector.load %arg2[%c3_280, %c0_281, %c0_282] : memref<16x16x128xf32, #tpu.memory_space<vmem>>, vector<1x16x128xf32>
    %665 = vector.shape_cast %664 : vector<1x16x128xf32> to vector<16x128xf32>
    %666 = vector.extract_strided_slice %634 {offsets = [3, 0], sizes = [1, 128], strides = [1, 1]} : vector<16x128xf32> to vector<1x128xf32>
    %667 = vector.broadcast %666 : vector<1x128xf32> to vector<16x128xf32>
    %668 = arith.addf %665, %667 : vector<16x128xf32>
    %669 = arith.cmpf ogt, %668, %661 : vector<16x128xf32>
    %670 = arith.select %669, %668, %661 : vector<16x128xi1>, vector<16x128xf32>
    %c3_i32_283 = arith.constant 3 : i32
    %671 = vector.broadcast %c3_i32_283 : i32 to vector<16x128xi32>
    %672 = arith.select %669, %671, %663 : vector<16x128xi1>, vector<16x128xi32>
    %c4_284 = arith.constant 4 : index
    %c0_285 = arith.constant 0 : index
    %c0_286 = arith.constant 0 : index
    %673 = vector.load %arg2[%c4_284, %c0_285, %c0_286] : memref<16x16x128xf32, #tpu.memory_space<vmem>>, vector<1x16x128xf32>
    %674 = vector.shape_cast %673 : vector<1x16x128xf32> to vector<16x128xf32>
    %675 = vector.extract_strided_slice %634 {offsets = [4, 0], sizes = [1, 128], strides = [1, 1]} : vector<16x128xf32> to vector<1x128xf32>
    %676 = vector.broadcast %675 : vector<1x128xf32> to vector<16x128xf32>
    %677 = arith.addf %674, %676 : vector<16x128xf32>
    %678 = arith.cmpf ogt, %677, %670 : vector<16x128xf32>
    %679 = arith.select %678, %677, %670 : vector<16x128xi1>, vector<16x128xf32>
    %c4_i32_287 = arith.constant 4 : i32
    %680 = vector.broadcast %c4_i32_287 : i32 to vector<16x128xi32>
    %681 = arith.select %678, %680, %672 : vector<16x128xi1>, vector<16x128xi32>
    %c5_288 = arith.constant 5 : index
    %c0_289 = arith.constant 0 : index
    %c0_290 = arith.constant 0 : index
    %682 = vector.load %arg2[%c5_288, %c0_289, %c0_290] : memref<16x16x128xf32, #tpu.memory_space<vmem>>, vector<1x16x128xf32>
    %683 = vector.shape_cast %682 : vector<1x16x128xf32> to vector<16x128xf32>
    %684 = vector.extract_strided_slice %634 {offsets = [5, 0], sizes = [1, 128], strides = [1, 1]} : vector<16x128xf32> to vector<1x128xf32>
    %685 = vector.broadcast %684 : vector<1x128xf32> to vector<16x128xf32>
    %686 = arith.addf %683, %685 : vector<16x128xf32>
    %687 = arith.cmpf ogt, %686, %679 : vector<16x128xf32>
    %688 = arith.select %687, %686, %679 : vector<16x128xi1>, vector<16x128xf32>
    %c5_i32_291 = arith.constant 5 : i32
    %689 = vector.broadcast %c5_i32_291 : i32 to vector<16x128xi32>
    %690 = arith.select %687, %689, %681 : vector<16x128xi1>, vector<16x128xi32>
    %c6_292 = arith.constant 6 : index
    %c0_293 = arith.constant 0 : index
    %c0_294 = arith.constant 0 : index
    %691 = vector.load %arg2[%c6_292, %c0_293, %c0_294] : memref<16x16x128xf32, #tpu.memory_space<vmem>>, vector<1x16x128xf32>
    %692 = vector.shape_cast %691 : vector<1x16x128xf32> to vector<16x128xf32>
    %693 = vector.extract_strided_slice %634 {offsets = [6, 0], sizes = [1, 128], strides = [1, 1]} : vector<16x128xf32> to vector<1x128xf32>
    %694 = vector.broadcast %693 : vector<1x128xf32> to vector<16x128xf32>
    %695 = arith.addf %692, %694 : vector<16x128xf32>
    %696 = arith.cmpf ogt, %695, %688 : vector<16x128xf32>
    %697 = arith.select %696, %695, %688 : vector<16x128xi1>, vector<16x128xf32>
    %c6_i32_295 = arith.constant 6 : i32
    %698 = vector.broadcast %c6_i32_295 : i32 to vector<16x128xi32>
    %699 = arith.select %696, %698, %690 : vector<16x128xi1>, vector<16x128xi32>
    %c7_296 = arith.constant 7 : index
    %c0_297 = arith.constant 0 : index
    %c0_298 = arith.constant 0 : index
    %700 = vector.load %arg2[%c7_296, %c0_297, %c0_298] : memref<16x16x128xf32, #tpu.memory_space<vmem>>, vector<1x16x128xf32>
    %701 = vector.shape_cast %700 : vector<1x16x128xf32> to vector<16x128xf32>
    %702 = vector.extract_strided_slice %634 {offsets = [7, 0], sizes = [1, 128], strides = [1, 1]} : vector<16x128xf32> to vector<1x128xf32>
    %703 = vector.broadcast %702 : vector<1x128xf32> to vector<16x128xf32>
    %704 = arith.addf %701, %703 : vector<16x128xf32>
    %705 = arith.cmpf ogt, %704, %697 : vector<16x128xf32>
    %706 = arith.select %705, %704, %697 : vector<16x128xi1>, vector<16x128xf32>
    %c7_i32_299 = arith.constant 7 : i32
    %707 = vector.broadcast %c7_i32_299 : i32 to vector<16x128xi32>
    %708 = arith.select %705, %707, %699 : vector<16x128xi1>, vector<16x128xi32>
    %c8_300 = arith.constant 8 : index
    %c0_301 = arith.constant 0 : index
    %c0_302 = arith.constant 0 : index
    %709 = vector.load %arg2[%c8_300, %c0_301, %c0_302] : memref<16x16x128xf32, #tpu.memory_space<vmem>>, vector<1x16x128xf32>
    %710 = vector.shape_cast %709 : vector<1x16x128xf32> to vector<16x128xf32>
    %711 = vector.extract_strided_slice %634 {offsets = [8, 0], sizes = [1, 128], strides = [1, 1]} : vector<16x128xf32> to vector<1x128xf32>
    %712 = vector.broadcast %711 : vector<1x128xf32> to vector<16x128xf32>
    %713 = arith.addf %710, %712 : vector<16x128xf32>
    %714 = arith.cmpf ogt, %713, %706 : vector<16x128xf32>
    %715 = arith.select %714, %713, %706 : vector<16x128xi1>, vector<16x128xf32>
    %c8_i32_303 = arith.constant 8 : i32
    %716 = vector.broadcast %c8_i32_303 : i32 to vector<16x128xi32>
    %717 = arith.select %714, %716, %708 : vector<16x128xi1>, vector<16x128xi32>
    %c9_304 = arith.constant 9 : index
    %c0_305 = arith.constant 0 : index
    %c0_306 = arith.constant 0 : index
    %718 = vector.load %arg2[%c9_304, %c0_305, %c0_306] : memref<16x16x128xf32, #tpu.memory_space<vmem>>, vector<1x16x128xf32>
    %719 = vector.shape_cast %718 : vector<1x16x128xf32> to vector<16x128xf32>
    %720 = vector.extract_strided_slice %634 {offsets = [9, 0], sizes = [1, 128], strides = [1, 1]} : vector<16x128xf32> to vector<1x128xf32>
    %721 = vector.broadcast %720 : vector<1x128xf32> to vector<16x128xf32>
    %722 = arith.addf %719, %721 : vector<16x128xf32>
    %723 = arith.cmpf ogt, %722, %715 : vector<16x128xf32>
    %724 = arith.select %723, %722, %715 : vector<16x128xi1>, vector<16x128xf32>
    %c9_i32_307 = arith.constant 9 : i32
    %725 = vector.broadcast %c9_i32_307 : i32 to vector<16x128xi32>
    %726 = arith.select %723, %725, %717 : vector<16x128xi1>, vector<16x128xi32>
    %c10_308 = arith.constant 10 : index
    %c0_309 = arith.constant 0 : index
    %c0_310 = arith.constant 0 : index
    %727 = vector.load %arg2[%c10_308, %c0_309, %c0_310] : memref<16x16x128xf32, #tpu.memory_space<vmem>>, vector<1x16x128xf32>
    %728 = vector.shape_cast %727 : vector<1x16x128xf32> to vector<16x128xf32>
    %729 = vector.extract_strided_slice %634 {offsets = [10, 0], sizes = [1, 128], strides = [1, 1]} : vector<16x128xf32> to vector<1x128xf32>
    %730 = vector.broadcast %729 : vector<1x128xf32> to vector<16x128xf32>
    %731 = arith.addf %728, %730 : vector<16x128xf32>
    %732 = arith.cmpf ogt, %731, %724 : vector<16x128xf32>
    %733 = arith.select %732, %731, %724 : vector<16x128xi1>, vector<16x128xf32>
    %c10_i32_311 = arith.constant 10 : i32
    %734 = vector.broadcast %c10_i32_311 : i32 to vector<16x128xi32>
    %735 = arith.select %732, %734, %726 : vector<16x128xi1>, vector<16x128xi32>
    %c11_312 = arith.constant 11 : index
    %c0_313 = arith.constant 0 : index
    %c0_314 = arith.constant 0 : index
    %736 = vector.load %arg2[%c11_312, %c0_313, %c0_314] : memref<16x16x128xf32, #tpu.memory_space<vmem>>, vector<1x16x128xf32>
    %737 = vector.shape_cast %736 : vector<1x16x128xf32> to vector<16x128xf32>
    %738 = vector.extract_strided_slice %634 {offsets = [11, 0], sizes = [1, 128], strides = [1, 1]} : vector<16x128xf32> to vector<1x128xf32>
    %739 = vector.broadcast %738 : vector<1x128xf32> to vector<16x128xf32>
    %740 = arith.addf %737, %739 : vector<16x128xf32>
    %741 = arith.cmpf ogt, %740, %733 : vector<16x128xf32>
    %742 = arith.select %741, %740, %733 : vector<16x128xi1>, vector<16x128xf32>
    %c11_i32_315 = arith.constant 11 : i32
    %743 = vector.broadcast %c11_i32_315 : i32 to vector<16x128xi32>
    %744 = arith.select %741, %743, %735 : vector<16x128xi1>, vector<16x128xi32>
    %c12_316 = arith.constant 12 : index
    %c0_317 = arith.constant 0 : index
    %c0_318 = arith.constant 0 : index
    %745 = vector.load %arg2[%c12_316, %c0_317, %c0_318] : memref<16x16x128xf32, #tpu.memory_space<vmem>>, vector<1x16x128xf32>
    %746 = vector.shape_cast %745 : vector<1x16x128xf32> to vector<16x128xf32>
    %747 = vector.extract_strided_slice %634 {offsets = [12, 0], sizes = [1, 128], strides = [1, 1]} : vector<16x128xf32> to vector<1x128xf32>
    %748 = vector.broadcast %747 : vector<1x128xf32> to vector<16x128xf32>
    %749 = arith.addf %746, %748 : vector<16x128xf32>
    %750 = arith.cmpf ogt, %749, %742 : vector<16x128xf32>
    %751 = arith.select %750, %749, %742 : vector<16x128xi1>, vector<16x128xf32>
    %c12_i32_319 = arith.constant 12 : i32
    %752 = vector.broadcast %c12_i32_319 : i32 to vector<16x128xi32>
    %753 = arith.select %750, %752, %744 : vector<16x128xi1>, vector<16x128xi32>
    %c13_320 = arith.constant 13 : index
    %c0_321 = arith.constant 0 : index
    %c0_322 = arith.constant 0 : index
    %754 = vector.load %arg2[%c13_320, %c0_321, %c0_322] : memref<16x16x128xf32, #tpu.memory_space<vmem>>, vector<1x16x128xf32>
    %755 = vector.shape_cast %754 : vector<1x16x128xf32> to vector<16x128xf32>
    %756 = vector.extract_strided_slice %634 {offsets = [13, 0], sizes = [1, 128], strides = [1, 1]} : vector<16x128xf32> to vector<1x128xf32>
    %757 = vector.broadcast %756 : vector<1x128xf32> to vector<16x128xf32>
    %758 = arith.addf %755, %757 : vector<16x128xf32>
    %759 = arith.cmpf ogt, %758, %751 : vector<16x128xf32>
    %760 = arith.select %759, %758, %751 : vector<16x128xi1>, vector<16x128xf32>
    %c13_i32_323 = arith.constant 13 : i32
    %761 = vector.broadcast %c13_i32_323 : i32 to vector<16x128xi32>
    %762 = arith.select %759, %761, %753 : vector<16x128xi1>, vector<16x128xi32>
    %c14_324 = arith.constant 14 : index
    %c0_325 = arith.constant 0 : index
    %c0_326 = arith.constant 0 : index
    %763 = vector.load %arg2[%c14_324, %c0_325, %c0_326] : memref<16x16x128xf32, #tpu.memory_space<vmem>>, vector<1x16x128xf32>
    %764 = vector.shape_cast %763 : vector<1x16x128xf32> to vector<16x128xf32>
    %765 = vector.extract_strided_slice %634 {offsets = [14, 0], sizes = [1, 128], strides = [1, 1]} : vector<16x128xf32> to vector<1x128xf32>
    %766 = vector.broadcast %765 : vector<1x128xf32> to vector<16x128xf32>
    %767 = arith.addf %764, %766 : vector<16x128xf32>
    %768 = arith.cmpf ogt, %767, %760 : vector<16x128xf32>
    %769 = arith.select %768, %767, %760 : vector<16x128xi1>, vector<16x128xf32>
    %c14_i32_327 = arith.constant 14 : i32
    %770 = vector.broadcast %c14_i32_327 : i32 to vector<16x128xi32>
    %771 = arith.select %768, %770, %762 : vector<16x128xi1>, vector<16x128xi32>
    %c15_328 = arith.constant 15 : index
    %c0_329 = arith.constant 0 : index
    %c0_330 = arith.constant 0 : index
    %772 = vector.load %arg2[%c15_328, %c0_329, %c0_330] : memref<16x16x128xf32, #tpu.memory_space<vmem>>, vector<1x16x128xf32>
    %773 = vector.shape_cast %772 : vector<1x16x128xf32> to vector<16x128xf32>
    %774 = vector.extract_strided_slice %634 {offsets = [15, 0], sizes = [1, 128], strides = [1, 1]} : vector<16x128xf32> to vector<1x128xf32>
    %775 = vector.broadcast %774 : vector<1x128xf32> to vector<16x128xf32>
    %776 = arith.addf %773, %775 : vector<16x128xf32>
    %777 = arith.cmpf ogt, %776, %769 : vector<16x128xf32>
    %778 = arith.select %777, %776, %769 : vector<16x128xi1>, vector<16x128xf32>
    %c15_i32_331 = arith.constant 15 : i32
    %779 = vector.broadcast %c15_i32_331 : i32 to vector<16x128xi32>
    %780 = arith.select %777, %779, %771 : vector<16x128xi1>, vector<16x128xi32>
    %c5_i32_332 = arith.constant 5 : i32
    %781 = vector.broadcast %c5_i32_332 : i32 to vector<1x128xi32>
    %782 = arith.cmpi sgt, %0, %781 : vector<1x128xi32>
    %c0_i32_333 = arith.constant 0 : i32
    %783 = vector.shape_cast %782 : vector<1x128xi1> to vector<1x128xi1>
    %784 = vector.broadcast %783 : vector<1x128xi1> to vector<16x128xi1>
    %785 = vector.broadcast %c0_i32_333 : i32 to vector<16x128xi32>
    %786 = arith.select %784, %780, %785 : vector<16x128xi1>, vector<16x128xi32>
    %c4_334 = arith.constant 4 : index
    %c0_335 = arith.constant 0 : index
    %c0_336 = arith.constant 0 : index
    %787 = vector.load %arg5[%c4_334, %c0_335, %c0_336] : memref<8x16x128xi32, #tpu.memory_space<vmem>>, vector<1x16x128xi32>
    %788 = vector.shape_cast %787 : vector<1x16x128xi32> to vector<16x128xi32>
    %789 = vector.shape_cast %786 : vector<16x128xi32> to vector<1x16x128xi32>
    tpu.vector_store %arg5[%c4_334, %c0_335, %c0_336], %789 {strides = array<i32>} : memref<8x16x128xi32, #tpu.memory_space<vmem>>, vector<1x16x128xi32>,
    %c5_337 = arith.constant 5 : index
    %c0_338 = arith.constant 0 : index
    %c0_339 = arith.constant 0 : index
    %790 = vector.load %arg1[%c5_337, %c0_338, %c0_339] : memref<8x16x128xf32, #tpu.memory_space<vmem>>, vector<1x16x128xf32>
    %791 = vector.shape_cast %790 : vector<1x16x128xf32> to vector<16x128xf32>
    %792 = arith.addf %778, %791 : vector<16x128xf32>
    %c6_i32_340 = arith.constant 6 : i32
    %793 = vector.broadcast %c6_i32_340 : i32 to vector<1x128xi32>
    %794 = arith.cmpi eq, %0, %793 : vector<1x128xi32>
    %795 = vector.shape_cast %794 : vector<1x128xi1> to vector<1x128xi1>
    %796 = vector.broadcast %795 : vector<1x128xi1> to vector<16x128xi1>
    %797 = arith.select %796, %792, %639 : vector<16x128xi1>, vector<16x128xf32>
    %c0_341 = arith.constant 0 : index
    %c0_342 = arith.constant 0 : index
    %c0_343 = arith.constant 0 : index
    %798 = vector.load %arg2[%c0_341, %c0_342, %c0_343] : memref<16x16x128xf32, #tpu.memory_space<vmem>>, vector<1x16x128xf32>
    %799 = vector.shape_cast %798 : vector<1x16x128xf32> to vector<16x128xf32>
    %800 = vector.extract_strided_slice %792 {offsets = [0, 0], sizes = [1, 128], strides = [1, 1]} : vector<16x128xf32> to vector<1x128xf32>
    %801 = vector.broadcast %800 : vector<1x128xf32> to vector<16x128xf32>
    %802 = arith.addf %799, %801 : vector<16x128xf32>
    %c0_i32_344 = arith.constant 0 : i32
    %803 = vector.broadcast %c0_i32_344 : i32 to vector<16x128xi32>
    %c1_345 = arith.constant 1 : index
    %c0_346 = arith.constant 0 : index
    %c0_347 = arith.constant 0 : index
    %804 = vector.load %arg2[%c1_345, %c0_346, %c0_347] : memref<16x16x128xf32, #tpu.memory_space<vmem>>, vector<1x16x128xf32>
    %805 = vector.shape_cast %804 : vector<1x16x128xf32> to vector<16x128xf32>
    %806 = vector.extract_strided_slice %792 {offsets = [1, 0], sizes = [1, 128], strides = [1, 1]} : vector<16x128xf32> to vector<1x128xf32>
    %807 = vector.broadcast %806 : vector<1x128xf32> to vector<16x128xf32>
    %808 = arith.addf %805, %807 : vector<16x128xf32>
    %809 = arith.cmpf ogt, %808, %802 : vector<16x128xf32>
    %810 = arith.select %809, %808, %802 : vector<16x128xi1>, vector<16x128xf32>
    %c1_i32_348 = arith.constant 1 : i32
    %811 = vector.broadcast %c1_i32_348 : i32 to vector<16x128xi32>
    %812 = arith.select %809, %811, %803 : vector<16x128xi1>, vector<16x128xi32>
    %c2_349 = arith.constant 2 : index
    %c0_350 = arith.constant 0 : index
    %c0_351 = arith.constant 0 : index
    %813 = vector.load %arg2[%c2_349, %c0_350, %c0_351] : memref<16x16x128xf32, #tpu.memory_space<vmem>>, vector<1x16x128xf32>
    %814 = vector.shape_cast %813 : vector<1x16x128xf32> to vector<16x128xf32>
    %815 = vector.extract_strided_slice %792 {offsets = [2, 0], sizes = [1, 128], strides = [1, 1]} : vector<16x128xf32> to vector<1x128xf32>
    %816 = vector.broadcast %815 : vector<1x128xf32> to vector<16x128xf32>
    %817 = arith.addf %814, %816 : vector<16x128xf32>
    %818 = arith.cmpf ogt, %817, %810 : vector<16x128xf32>
    %819 = arith.select %818, %817, %810 : vector<16x128xi1>, vector<16x128xf32>
    %c2_i32_352 = arith.constant 2 : i32
    %820 = vector.broadcast %c2_i32_352 : i32 to vector<16x128xi32>
    %821 = arith.select %818, %820, %812 : vector<16x128xi1>, vector<16x128xi32>
    %c3_353 = arith.constant 3 : index
    %c0_354 = arith.constant 0 : index
    %c0_355 = arith.constant 0 : index
    %822 = vector.load %arg2[%c3_353, %c0_354, %c0_355] : memref<16x16x128xf32, #tpu.memory_space<vmem>>, vector<1x16x128xf32>
    %823 = vector.shape_cast %822 : vector<1x16x128xf32> to vector<16x128xf32>
    %824 = vector.extract_strided_slice %792 {offsets = [3, 0], sizes = [1, 128], strides = [1, 1]} : vector<16x128xf32> to vector<1x128xf32>
    %825 = vector.broadcast %824 : vector<1x128xf32> to vector<16x128xf32>
    %826 = arith.addf %823, %825 : vector<16x128xf32>
    %827 = arith.cmpf ogt, %826, %819 : vector<16x128xf32>
    %828 = arith.select %827, %826, %819 : vector<16x128xi1>, vector<16x128xf32>
    %c3_i32_356 = arith.constant 3 : i32
    %829 = vector.broadcast %c3_i32_356 : i32 to vector<16x128xi32>
    %830 = arith.select %827, %829, %821 : vector<16x128xi1>, vector<16x128xi32>
    %c4_357 = arith.constant 4 : index
    %c0_358 = arith.constant 0 : index
    %c0_359 = arith.constant 0 : index
    %831 = vector.load %arg2[%c4_357, %c0_358, %c0_359] : memref<16x16x128xf32, #tpu.memory_space<vmem>>, vector<1x16x128xf32>
    %832 = vector.shape_cast %831 : vector<1x16x128xf32> to vector<16x128xf32>
    %833 = vector.extract_strided_slice %792 {offsets = [4, 0], sizes = [1, 128], strides = [1, 1]} : vector<16x128xf32> to vector<1x128xf32>
    %834 = vector.broadcast %833 : vector<1x128xf32> to vector<16x128xf32>
    %835 = arith.addf %832, %834 : vector<16x128xf32>
    %836 = arith.cmpf ogt, %835, %828 : vector<16x128xf32>
    %837 = arith.select %836, %835, %828 : vector<16x128xi1>, vector<16x128xf32>
    %c4_i32_360 = arith.constant 4 : i32
    %838 = vector.broadcast %c4_i32_360 : i32 to vector<16x128xi32>
    %839 = arith.select %836, %838, %830 : vector<16x128xi1>, vector<16x128xi32>
    %c5_361 = arith.constant 5 : index
    %c0_362 = arith.constant 0 : index
    %c0_363 = arith.constant 0 : index
    %840 = vector.load %arg2[%c5_361, %c0_362, %c0_363] : memref<16x16x128xf32, #tpu.memory_space<vmem>>, vector<1x16x128xf32>
    %841 = vector.shape_cast %840 : vector<1x16x128xf32> to vector<16x128xf32>
    %842 = vector.extract_strided_slice %792 {offsets = [5, 0], sizes = [1, 128], strides = [1, 1]} : vector<16x128xf32> to vector<1x128xf32>
    %843 = vector.broadcast %842 : vector<1x128xf32> to vector<16x128xf32>
    %844 = arith.addf %841, %843 : vector<16x128xf32>
    %845 = arith.cmpf ogt, %844, %837 : vector<16x128xf32>
    %846 = arith.select %845, %844, %837 : vector<16x128xi1>, vector<16x128xf32>
    %c5_i32_364 = arith.constant 5 : i32
    %847 = vector.broadcast %c5_i32_364 : i32 to vector<16x128xi32>
    %848 = arith.select %845, %847, %839 : vector<16x128xi1>, vector<16x128xi32>
    %c6_365 = arith.constant 6 : index
    %c0_366 = arith.constant 0 : index
    %c0_367 = arith.constant 0 : index
    %849 = vector.load %arg2[%c6_365, %c0_366, %c0_367] : memref<16x16x128xf32, #tpu.memory_space<vmem>>, vector<1x16x128xf32>
    %850 = vector.shape_cast %849 : vector<1x16x128xf32> to vector<16x128xf32>
    %851 = vector.extract_strided_slice %792 {offsets = [6, 0], sizes = [1, 128], strides = [1, 1]} : vector<16x128xf32> to vector<1x128xf32>
    %852 = vector.broadcast %851 : vector<1x128xf32> to vector<16x128xf32>
    %853 = arith.addf %850, %852 : vector<16x128xf32>
    %854 = arith.cmpf ogt, %853, %846 : vector<16x128xf32>
    %855 = arith.select %854, %853, %846 : vector<16x128xi1>, vector<16x128xf32>
    %c6_i32_368 = arith.constant 6 : i32
    %856 = vector.broadcast %c6_i32_368 : i32 to vector<16x128xi32>
    %857 = arith.select %854, %856, %848 : vector<16x128xi1>, vector<16x128xi32>
    %c7_369 = arith.constant 7 : index
    %c0_370 = arith.constant 0 : index
    %c0_371 = arith.constant 0 : index
    %858 = vector.load %arg2[%c7_369, %c0_370, %c0_371] : memref<16x16x128xf32, #tpu.memory_space<vmem>>, vector<1x16x128xf32>
    %859 = vector.shape_cast %858 : vector<1x16x128xf32> to vector<16x128xf32>
    %860 = vector.extract_strided_slice %792 {offsets = [7, 0], sizes = [1, 128], strides = [1, 1]} : vector<16x128xf32> to vector<1x128xf32>
    %861 = vector.broadcast %860 : vector<1x128xf32> to vector<16x128xf32>
    %862 = arith.addf %859, %861 : vector<16x128xf32>
    %863 = arith.cmpf ogt, %862, %855 : vector<16x128xf32>
    %864 = arith.select %863, %862, %855 : vector<16x128xi1>, vector<16x128xf32>
    %c7_i32_372 = arith.constant 7 : i32
    %865 = vector.broadcast %c7_i32_372 : i32 to vector<16x128xi32>
    %866 = arith.select %863, %865, %857 : vector<16x128xi1>, vector<16x128xi32>
    %c8_373 = arith.constant 8 : index
    %c0_374 = arith.constant 0 : index
    %c0_375 = arith.constant 0 : index
    %867 = vector.load %arg2[%c8_373, %c0_374, %c0_375] : memref<16x16x128xf32, #tpu.memory_space<vmem>>, vector<1x16x128xf32>
    %868 = vector.shape_cast %867 : vector<1x16x128xf32> to vector<16x128xf32>
    %869 = vector.extract_strided_slice %792 {offsets = [8, 0], sizes = [1, 128], strides = [1, 1]} : vector<16x128xf32> to vector<1x128xf32>
    %870 = vector.broadcast %869 : vector<1x128xf32> to vector<16x128xf32>
    %871 = arith.addf %868, %870 : vector<16x128xf32>
    %872 = arith.cmpf ogt, %871, %864 : vector<16x128xf32>
    %873 = arith.select %872, %871, %864 : vector<16x128xi1>, vector<16x128xf32>
    %c8_i32_376 = arith.constant 8 : i32
    %874 = vector.broadcast %c8_i32_376 : i32 to vector<16x128xi32>
    %875 = arith.select %872, %874, %866 : vector<16x128xi1>, vector<16x128xi32>
    %c9_377 = arith.constant 9 : index
    %c0_378 = arith.constant 0 : index
    %c0_379 = arith.constant 0 : index
    %876 = vector.load %arg2[%c9_377, %c0_378, %c0_379] : memref<16x16x128xf32, #tpu.memory_space<vmem>>, vector<1x16x128xf32>
    %877 = vector.shape_cast %876 : vector<1x16x128xf32> to vector<16x128xf32>
    %878 = vector.extract_strided_slice %792 {offsets = [9, 0], sizes = [1, 128], strides = [1, 1]} : vector<16x128xf32> to vector<1x128xf32>
    %879 = vector.broadcast %878 : vector<1x128xf32> to vector<16x128xf32>
    %880 = arith.addf %877, %879 : vector<16x128xf32>
    %881 = arith.cmpf ogt, %880, %873 : vector<16x128xf32>
    %882 = arith.select %881, %880, %873 : vector<16x128xi1>, vector<16x128xf32>
    %c9_i32_380 = arith.constant 9 : i32
    %883 = vector.broadcast %c9_i32_380 : i32 to vector<16x128xi32>
    %884 = arith.select %881, %883, %875 : vector<16x128xi1>, vector<16x128xi32>
    %c10_381 = arith.constant 10 : index
    %c0_382 = arith.constant 0 : index
    %c0_383 = arith.constant 0 : index
    %885 = vector.load %arg2[%c10_381, %c0_382, %c0_383] : memref<16x16x128xf32, #tpu.memory_space<vmem>>, vector<1x16x128xf32>
    %886 = vector.shape_cast %885 : vector<1x16x128xf32> to vector<16x128xf32>
    %887 = vector.extract_strided_slice %792 {offsets = [10, 0], sizes = [1, 128], strides = [1, 1]} : vector<16x128xf32> to vector<1x128xf32>
    %888 = vector.broadcast %887 : vector<1x128xf32> to vector<16x128xf32>
    %889 = arith.addf %886, %888 : vector<16x128xf32>
    %890 = arith.cmpf ogt, %889, %882 : vector<16x128xf32>
    %891 = arith.select %890, %889, %882 : vector<16x128xi1>, vector<16x128xf32>
    %c10_i32_384 = arith.constant 10 : i32
    %892 = vector.broadcast %c10_i32_384 : i32 to vector<16x128xi32>
    %893 = arith.select %890, %892, %884 : vector<16x128xi1>, vector<16x128xi32>
    %c11_385 = arith.constant 11 : index
    %c0_386 = arith.constant 0 : index
    %c0_387 = arith.constant 0 : index
    %894 = vector.load %arg2[%c11_385, %c0_386, %c0_387] : memref<16x16x128xf32, #tpu.memory_space<vmem>>, vector<1x16x128xf32>
    %895 = vector.shape_cast %894 : vector<1x16x128xf32> to vector<16x128xf32>
    %896 = vector.extract_strided_slice %792 {offsets = [11, 0], sizes = [1, 128], strides = [1, 1]} : vector<16x128xf32> to vector<1x128xf32>
    %897 = vector.broadcast %896 : vector<1x128xf32> to vector<16x128xf32>
    %898 = arith.addf %895, %897 : vector<16x128xf32>
    %899 = arith.cmpf ogt, %898, %891 : vector<16x128xf32>
    %900 = arith.select %899, %898, %891 : vector<16x128xi1>, vector<16x128xf32>
    %c11_i32_388 = arith.constant 11 : i32
    %901 = vector.broadcast %c11_i32_388 : i32 to vector<16x128xi32>
    %902 = arith.select %899, %901, %893 : vector<16x128xi1>, vector<16x128xi32>
    %c12_389 = arith.constant 12 : index
    %c0_390 = arith.constant 0 : index
    %c0_391 = arith.constant 0 : index
    %903 = vector.load %arg2[%c12_389, %c0_390, %c0_391] : memref<16x16x128xf32, #tpu.memory_space<vmem>>, vector<1x16x128xf32>
    %904 = vector.shape_cast %903 : vector<1x16x128xf32> to vector<16x128xf32>
    %905 = vector.extract_strided_slice %792 {offsets = [12, 0], sizes = [1, 128], strides = [1, 1]} : vector<16x128xf32> to vector<1x128xf32>
    %906 = vector.broadcast %905 : vector<1x128xf32> to vector<16x128xf32>
    %907 = arith.addf %904, %906 : vector<16x128xf32>
    %908 = arith.cmpf ogt, %907, %900 : vector<16x128xf32>
    %909 = arith.select %908, %907, %900 : vector<16x128xi1>, vector<16x128xf32>
    %c12_i32_392 = arith.constant 12 : i32
    %910 = vector.broadcast %c12_i32_392 : i32 to vector<16x128xi32>
    %911 = arith.select %908, %910, %902 : vector<16x128xi1>, vector<16x128xi32>
    %c13_393 = arith.constant 13 : index
    %c0_394 = arith.constant 0 : index
    %c0_395 = arith.constant 0 : index
    %912 = vector.load %arg2[%c13_393, %c0_394, %c0_395] : memref<16x16x128xf32, #tpu.memory_space<vmem>>, vector<1x16x128xf32>
    %913 = vector.shape_cast %912 : vector<1x16x128xf32> to vector<16x128xf32>
    %914 = vector.extract_strided_slice %792 {offsets = [13, 0], sizes = [1, 128], strides = [1, 1]} : vector<16x128xf32> to vector<1x128xf32>
    %915 = vector.broadcast %914 : vector<1x128xf32> to vector<16x128xf32>
    %916 = arith.addf %913, %915 : vector<16x128xf32>
    %917 = arith.cmpf ogt, %916, %909 : vector<16x128xf32>
    %918 = arith.select %917, %916, %909 : vector<16x128xi1>, vector<16x128xf32>
    %c13_i32_396 = arith.constant 13 : i32
    %919 = vector.broadcast %c13_i32_396 : i32 to vector<16x128xi32>
    %920 = arith.select %917, %919, %911 : vector<16x128xi1>, vector<16x128xi32>
    %c14_397 = arith.constant 14 : index
    %c0_398 = arith.constant 0 : index
    %c0_399 = arith.constant 0 : index
    %921 = vector.load %arg2[%c14_397, %c0_398, %c0_399] : memref<16x16x128xf32, #tpu.memory_space<vmem>>, vector<1x16x128xf32>
    %922 = vector.shape_cast %921 : vector<1x16x128xf32> to vector<16x128xf32>
    %923 = vector.extract_strided_slice %792 {offsets = [14, 0], sizes = [1, 128], strides = [1, 1]} : vector<16x128xf32> to vector<1x128xf32>
    %924 = vector.broadcast %923 : vector<1x128xf32> to vector<16x128xf32>
    %925 = arith.addf %922, %924 : vector<16x128xf32>
    %926 = arith.cmpf ogt, %925, %918 : vector<16x128xf32>
    %927 = arith.select %926, %925, %918 : vector<16x128xi1>, vector<16x128xf32>
    %c14_i32_400 = arith.constant 14 : i32
    %928 = vector.broadcast %c14_i32_400 : i32 to vector<16x128xi32>
    %929 = arith.select %926, %928, %920 : vector<16x128xi1>, vector<16x128xi32>
    %c15_401 = arith.constant 15 : index
    %c0_402 = arith.constant 0 : index
    %c0_403 = arith.constant 0 : index
    %930 = vector.load %arg2[%c15_401, %c0_402, %c0_403] : memref<16x16x128xf32, #tpu.memory_space<vmem>>, vector<1x16x128xf32>
    %931 = vector.shape_cast %930 : vector<1x16x128xf32> to vector<16x128xf32>
    %932 = vector.extract_strided_slice %792 {offsets = [15, 0], sizes = [1, 128], strides = [1, 1]} : vector<16x128xf32> to vector<1x128xf32>
    %933 = vector.broadcast %932 : vector<1x128xf32> to vector<16x128xf32>
    %934 = arith.addf %931, %933 : vector<16x128xf32>
    %935 = arith.cmpf ogt, %934, %927 : vector<16x128xf32>
    %936 = arith.select %935, %934, %927 : vector<16x128xi1>, vector<16x128xf32>
    %c15_i32_404 = arith.constant 15 : i32
    %937 = vector.broadcast %c15_i32_404 : i32 to vector<16x128xi32>
    %938 = arith.select %935, %937, %929 : vector<16x128xi1>, vector<16x128xi32>
    %c6_i32_405 = arith.constant 6 : i32
    %939 = vector.broadcast %c6_i32_405 : i32 to vector<1x128xi32>
    %940 = arith.cmpi sgt, %0, %939 : vector<1x128xi32>
    %c0_i32_406 = arith.constant 0 : i32
    %941 = vector.shape_cast %940 : vector<1x128xi1> to vector<1x128xi1>
    %942 = vector.broadcast %941 : vector<1x128xi1> to vector<16x128xi1>
    %943 = vector.broadcast %c0_i32_406 : i32 to vector<16x128xi32>
    %944 = arith.select %942, %938, %943 : vector<16x128xi1>, vector<16x128xi32>
    %c5_407 = arith.constant 5 : index
    %c0_408 = arith.constant 0 : index
    %c0_409 = arith.constant 0 : index
    %945 = vector.load %arg5[%c5_407, %c0_408, %c0_409] : memref<8x16x128xi32, #tpu.memory_space<vmem>>, vector<1x16x128xi32>
    %946 = vector.shape_cast %945 : vector<1x16x128xi32> to vector<16x128xi32>
    %947 = vector.shape_cast %944 : vector<16x128xi32> to vector<1x16x128xi32>
    tpu.vector_store %arg5[%c5_407, %c0_408, %c0_409], %947 {strides = array<i32>} : memref<8x16x128xi32, #tpu.memory_space<vmem>>, vector<1x16x128xi32>,
    %c6_410 = arith.constant 6 : index
    %c0_411 = arith.constant 0 : index
    %c0_412 = arith.constant 0 : index
    %948 = vector.load %arg1[%c6_410, %c0_411, %c0_412] : memref<8x16x128xf32, #tpu.memory_space<vmem>>, vector<1x16x128xf32>
    %949 = vector.shape_cast %948 : vector<1x16x128xf32> to vector<16x128xf32>
    %950 = arith.addf %936, %949 : vector<16x128xf32>
    %c7_i32_413 = arith.constant 7 : i32
    %951 = vector.broadcast %c7_i32_413 : i32 to vector<1x128xi32>
    %952 = arith.cmpi eq, %0, %951 : vector<1x128xi32>
    %953 = vector.shape_cast %952 : vector<1x128xi1> to vector<1x128xi1>
    %954 = vector.broadcast %953 : vector<1x128xi1> to vector<16x128xi1>
    %955 = arith.select %954, %950, %797 : vector<16x128xi1>, vector<16x128xf32>
    %c0_414 = arith.constant 0 : index
    %c0_415 = arith.constant 0 : index
    %c0_416 = arith.constant 0 : index
    %956 = vector.load %arg2[%c0_414, %c0_415, %c0_416] : memref<16x16x128xf32, #tpu.memory_space<vmem>>, vector<1x16x128xf32>
    %957 = vector.shape_cast %956 : vector<1x16x128xf32> to vector<16x128xf32>
    %958 = vector.extract_strided_slice %950 {offsets = [0, 0], sizes = [1, 128], strides = [1, 1]} : vector<16x128xf32> to vector<1x128xf32>
    %959 = vector.broadcast %958 : vector<1x128xf32> to vector<16x128xf32>
    %960 = arith.addf %957, %959 : vector<16x128xf32>
    %c0_i32_417 = arith.constant 0 : i32
    %961 = vector.broadcast %c0_i32_417 : i32 to vector<16x128xi32>
    %c1_418 = arith.constant 1 : index
    %c0_419 = arith.constant 0 : index
    %c0_420 = arith.constant 0 : index
    %962 = vector.load %arg2[%c1_418, %c0_419, %c0_420] : memref<16x16x128xf32, #tpu.memory_space<vmem>>, vector<1x16x128xf32>
    %963 = vector.shape_cast %962 : vector<1x16x128xf32> to vector<16x128xf32>
    %964 = vector.extract_strided_slice %950 {offsets = [1, 0], sizes = [1, 128], strides = [1, 1]} : vector<16x128xf32> to vector<1x128xf32>
    %965 = vector.broadcast %964 : vector<1x128xf32> to vector<16x128xf32>
    %966 = arith.addf %963, %965 : vector<16x128xf32>
    %967 = arith.cmpf ogt, %966, %960 : vector<16x128xf32>
    %968 = arith.select %967, %966, %960 : vector<16x128xi1>, vector<16x128xf32>
    %c1_i32_421 = arith.constant 1 : i32
    %969 = vector.broadcast %c1_i32_421 : i32 to vector<16x128xi32>
    %970 = arith.select %967, %969, %961 : vector<16x128xi1>, vector<16x128xi32>
    %c2_422 = arith.constant 2 : index
    %c0_423 = arith.constant 0 : index
    %c0_424 = arith.constant 0 : index
    %971 = vector.load %arg2[%c2_422, %c0_423, %c0_424] : memref<16x16x128xf32, #tpu.memory_space<vmem>>, vector<1x16x128xf32>
    %972 = vector.shape_cast %971 : vector<1x16x128xf32> to vector<16x128xf32>
    %973 = vector.extract_strided_slice %950 {offsets = [2, 0], sizes = [1, 128], strides = [1, 1]} : vector<16x128xf32> to vector<1x128xf32>
    %974 = vector.broadcast %973 : vector<1x128xf32> to vector<16x128xf32>
    %975 = arith.addf %972, %974 : vector<16x128xf32>
    %976 = arith.cmpf ogt, %975, %968 : vector<16x128xf32>
    %977 = arith.select %976, %975, %968 : vector<16x128xi1>, vector<16x128xf32>
    %c2_i32_425 = arith.constant 2 : i32
    %978 = vector.broadcast %c2_i32_425 : i32 to vector<16x128xi32>
    %979 = arith.select %976, %978, %970 : vector<16x128xi1>, vector<16x128xi32>
    %c3_426 = arith.constant 3 : index
    %c0_427 = arith.constant 0 : index
    %c0_428 = arith.constant 0 : index
    %980 = vector.load %arg2[%c3_426, %c0_427, %c0_428] : memref<16x16x128xf32, #tpu.memory_space<vmem>>, vector<1x16x128xf32>
    %981 = vector.shape_cast %980 : vector<1x16x128xf32> to vector<16x128xf32>
    %982 = vector.extract_strided_slice %950 {offsets = [3, 0], sizes = [1, 128], strides = [1, 1]} : vector<16x128xf32> to vector<1x128xf32>
    %983 = vector.broadcast %982 : vector<1x128xf32> to vector<16x128xf32>
    %984 = arith.addf %981, %983 : vector<16x128xf32>
    %985 = arith.cmpf ogt, %984, %977 : vector<16x128xf32>
    %986 = arith.select %985, %984, %977 : vector<16x128xi1>, vector<16x128xf32>
    %c3_i32_429 = arith.constant 3 : i32
    %987 = vector.broadcast %c3_i32_429 : i32 to vector<16x128xi32>
    %988 = arith.select %985, %987, %979 : vector<16x128xi1>, vector<16x128xi32>
    %c4_430 = arith.constant 4 : index
    %c0_431 = arith.constant 0 : index
    %c0_432 = arith.constant 0 : index
    %989 = vector.load %arg2[%c4_430, %c0_431, %c0_432] : memref<16x16x128xf32, #tpu.memory_space<vmem>>, vector<1x16x128xf32>
    %990 = vector.shape_cast %989 : vector<1x16x128xf32> to vector<16x128xf32>
    %991 = vector.extract_strided_slice %950 {offsets = [4, 0], sizes = [1, 128], strides = [1, 1]} : vector<16x128xf32> to vector<1x128xf32>
    %992 = vector.broadcast %991 : vector<1x128xf32> to vector<16x128xf32>
    %993 = arith.addf %990, %992 : vector<16x128xf32>
    %994 = arith.cmpf ogt, %993, %986 : vector<16x128xf32>
    %995 = arith.select %994, %993, %986 : vector<16x128xi1>, vector<16x128xf32>
    %c4_i32_433 = arith.constant 4 : i32
    %996 = vector.broadcast %c4_i32_433 : i32 to vector<16x128xi32>
    %997 = arith.select %994, %996, %988 : vector<16x128xi1>, vector<16x128xi32>
    %c5_434 = arith.constant 5 : index
    %c0_435 = arith.constant 0 : index
    %c0_436 = arith.constant 0 : index
    %998 = vector.load %arg2[%c5_434, %c0_435, %c0_436] : memref<16x16x128xf32, #tpu.memory_space<vmem>>, vector<1x16x128xf32>
    %999 = vector.shape_cast %998 : vector<1x16x128xf32> to vector<16x128xf32>
    %1000 = vector.extract_strided_slice %950 {offsets = [5, 0], sizes = [1, 128], strides = [1, 1]} : vector<16x128xf32> to vector<1x128xf32>
    %1001 = vector.broadcast %1000 : vector<1x128xf32> to vector<16x128xf32>
    %1002 = arith.addf %999, %1001 : vector<16x128xf32>
    %1003 = arith.cmpf ogt, %1002, %995 : vector<16x128xf32>
    %1004 = arith.select %1003, %1002, %995 : vector<16x128xi1>, vector<16x128xf32>
    %c5_i32_437 = arith.constant 5 : i32
    %1005 = vector.broadcast %c5_i32_437 : i32 to vector<16x128xi32>
    %1006 = arith.select %1003, %1005, %997 : vector<16x128xi1>, vector<16x128xi32>
    %c6_438 = arith.constant 6 : index
    %c0_439 = arith.constant 0 : index
    %c0_440 = arith.constant 0 : index
    %1007 = vector.load %arg2[%c6_438, %c0_439, %c0_440] : memref<16x16x128xf32, #tpu.memory_space<vmem>>, vector<1x16x128xf32>
    %1008 = vector.shape_cast %1007 : vector<1x16x128xf32> to vector<16x128xf32>
    %1009 = vector.extract_strided_slice %950 {offsets = [6, 0], sizes = [1, 128], strides = [1, 1]} : vector<16x128xf32> to vector<1x128xf32>
    %1010 = vector.broadcast %1009 : vector<1x128xf32> to vector<16x128xf32>
    %1011 = arith.addf %1008, %1010 : vector<16x128xf32>
    %1012 = arith.cmpf ogt, %1011, %1004 : vector<16x128xf32>
    %1013 = arith.select %1012, %1011, %1004 : vector<16x128xi1>, vector<16x128xf32>
    %c6_i32_441 = arith.constant 6 : i32
    %1014 = vector.broadcast %c6_i32_441 : i32 to vector<16x128xi32>
    %1015 = arith.select %1012, %1014, %1006 : vector<16x128xi1>, vector<16x128xi32>
    %c7_442 = arith.constant 7 : index
    %c0_443 = arith.constant 0 : index
    %c0_444 = arith.constant 0 : index
    %1016 = vector.load %arg2[%c7_442, %c0_443, %c0_444] : memref<16x16x128xf32, #tpu.memory_space<vmem>>, vector<1x16x128xf32>
    %1017 = vector.shape_cast %1016 : vector<1x16x128xf32> to vector<16x128xf32>
    %1018 = vector.extract_strided_slice %950 {offsets = [7, 0], sizes = [1, 128], strides = [1, 1]} : vector<16x128xf32> to vector<1x128xf32>
    %1019 = vector.broadcast %1018 : vector<1x128xf32> to vector<16x128xf32>
    %1020 = arith.addf %1017, %1019 : vector<16x128xf32>
    %1021 = arith.cmpf ogt, %1020, %1013 : vector<16x128xf32>
    %1022 = arith.select %1021, %1020, %1013 : vector<16x128xi1>, vector<16x128xf32>
    %c7_i32_445 = arith.constant 7 : i32
    %1023 = vector.broadcast %c7_i32_445 : i32 to vector<16x128xi32>
    %1024 = arith.select %1021, %1023, %1015 : vector<16x128xi1>, vector<16x128xi32>
    %c8_446 = arith.constant 8 : index
    %c0_447 = arith.constant 0 : index
    %c0_448 = arith.constant 0 : index
    %1025 = vector.load %arg2[%c8_446, %c0_447, %c0_448] : memref<16x16x128xf32, #tpu.memory_space<vmem>>, vector<1x16x128xf32>
    %1026 = vector.shape_cast %1025 : vector<1x16x128xf32> to vector<16x128xf32>
    %1027 = vector.extract_strided_slice %950 {offsets = [8, 0], sizes = [1, 128], strides = [1, 1]} : vector<16x128xf32> to vector<1x128xf32>
    %1028 = vector.broadcast %1027 : vector<1x128xf32> to vector<16x128xf32>
    %1029 = arith.addf %1026, %1028 : vector<16x128xf32>
    %1030 = arith.cmpf ogt, %1029, %1022 : vector<16x128xf32>
    %1031 = arith.select %1030, %1029, %1022 : vector<16x128xi1>, vector<16x128xf32>
    %c8_i32_449 = arith.constant 8 : i32
    %1032 = vector.broadcast %c8_i32_449 : i32 to vector<16x128xi32>
    %1033 = arith.select %1030, %1032, %1024 : vector<16x128xi1>, vector<16x128xi32>
    %c9_450 = arith.constant 9 : index
    %c0_451 = arith.constant 0 : index
    %c0_452 = arith.constant 0 : index
    %1034 = vector.load %arg2[%c9_450, %c0_451, %c0_452] : memref<16x16x128xf32, #tpu.memory_space<vmem>>, vector<1x16x128xf32>
    %1035 = vector.shape_cast %1034 : vector<1x16x128xf32> to vector<16x128xf32>
    %1036 = vector.extract_strided_slice %950 {offsets = [9, 0], sizes = [1, 128], strides = [1, 1]} : vector<16x128xf32> to vector<1x128xf32>
    %1037 = vector.broadcast %1036 : vector<1x128xf32> to vector<16x128xf32>
    %1038 = arith.addf %1035, %1037 : vector<16x128xf32>
    %1039 = arith.cmpf ogt, %1038, %1031 : vector<16x128xf32>
    %1040 = arith.select %1039, %1038, %1031 : vector<16x128xi1>, vector<16x128xf32>
    %c9_i32_453 = arith.constant 9 : i32
    %1041 = vector.broadcast %c9_i32_453 : i32 to vector<16x128xi32>
    %1042 = arith.select %1039, %1041, %1033 : vector<16x128xi1>, vector<16x128xi32>
    %c10_454 = arith.constant 10 : index
    %c0_455 = arith.constant 0 : index
    %c0_456 = arith.constant 0 : index
    %1043 = vector.load %arg2[%c10_454, %c0_455, %c0_456] : memref<16x16x128xf32, #tpu.memory_space<vmem>>, vector<1x16x128xf32>
    %1044 = vector.shape_cast %1043 : vector<1x16x128xf32> to vector<16x128xf32>
    %1045 = vector.extract_strided_slice %950 {offsets = [10, 0], sizes = [1, 128], strides = [1, 1]} : vector<16x128xf32> to vector<1x128xf32>
    %1046 = vector.broadcast %1045 : vector<1x128xf32> to vector<16x128xf32>
    %1047 = arith.addf %1044, %1046 : vector<16x128xf32>
    %1048 = arith.cmpf ogt, %1047, %1040 : vector<16x128xf32>
    %1049 = arith.select %1048, %1047, %1040 : vector<16x128xi1>, vector<16x128xf32>
    %c10_i32_457 = arith.constant 10 : i32
    %1050 = vector.broadcast %c10_i32_457 : i32 to vector<16x128xi32>
    %1051 = arith.select %1048, %1050, %1042 : vector<16x128xi1>, vector<16x128xi32>
    %c11_458 = arith.constant 11 : index
    %c0_459 = arith.constant 0 : index
    %c0_460 = arith.constant 0 : index
    %1052 = vector.load %arg2[%c11_458, %c0_459, %c0_460] : memref<16x16x128xf32, #tpu.memory_space<vmem>>, vector<1x16x128xf32>
    %1053 = vector.shape_cast %1052 : vector<1x16x128xf32> to vector<16x128xf32>
    %1054 = vector.extract_strided_slice %950 {offsets = [11, 0], sizes = [1, 128], strides = [1, 1]} : vector<16x128xf32> to vector<1x128xf32>
    %1055 = vector.broadcast %1054 : vector<1x128xf32> to vector<16x128xf32>
    %1056 = arith.addf %1053, %1055 : vector<16x128xf32>
    %1057 = arith.cmpf ogt, %1056, %1049 : vector<16x128xf32>
    %1058 = arith.select %1057, %1056, %1049 : vector<16x128xi1>, vector<16x128xf32>
    %c11_i32_461 = arith.constant 11 : i32
    %1059 = vector.broadcast %c11_i32_461 : i32 to vector<16x128xi32>
    %1060 = arith.select %1057, %1059, %1051 : vector<16x128xi1>, vector<16x128xi32>
    %c12_462 = arith.constant 12 : index
    %c0_463 = arith.constant 0 : index
    %c0_464 = arith.constant 0 : index
    %1061 = vector.load %arg2[%c12_462, %c0_463, %c0_464] : memref<16x16x128xf32, #tpu.memory_space<vmem>>, vector<1x16x128xf32>
    %1062 = vector.shape_cast %1061 : vector<1x16x128xf32> to vector<16x128xf32>
    %1063 = vector.extract_strided_slice %950 {offsets = [12, 0], sizes = [1, 128], strides = [1, 1]} : vector<16x128xf32> to vector<1x128xf32>
    %1064 = vector.broadcast %1063 : vector<1x128xf32> to vector<16x128xf32>
    %1065 = arith.addf %1062, %1064 : vector<16x128xf32>
    %1066 = arith.cmpf ogt, %1065, %1058 : vector<16x128xf32>
    %1067 = arith.select %1066, %1065, %1058 : vector<16x128xi1>, vector<16x128xf32>
    %c12_i32_465 = arith.constant 12 : i32
    %1068 = vector.broadcast %c12_i32_465 : i32 to vector<16x128xi32>
    %1069 = arith.select %1066, %1068, %1060 : vector<16x128xi1>, vector<16x128xi32>
    %c13_466 = arith.constant 13 : index
    %c0_467 = arith.constant 0 : index
    %c0_468 = arith.constant 0 : index
    %1070 = vector.load %arg2[%c13_466, %c0_467, %c0_468] : memref<16x16x128xf32, #tpu.memory_space<vmem>>, vector<1x16x128xf32>
    %1071 = vector.shape_cast %1070 : vector<1x16x128xf32> to vector<16x128xf32>
    %1072 = vector.extract_strided_slice %950 {offsets = [13, 0], sizes = [1, 128], strides = [1, 1]} : vector<16x128xf32> to vector<1x128xf32>
    %1073 = vector.broadcast %1072 : vector<1x128xf32> to vector<16x128xf32>
    %1074 = arith.addf %1071, %1073 : vector<16x128xf32>
    %1075 = arith.cmpf ogt, %1074, %1067 : vector<16x128xf32>
    %1076 = arith.select %1075, %1074, %1067 : vector<16x128xi1>, vector<16x128xf32>
    %c13_i32_469 = arith.constant 13 : i32
    %1077 = vector.broadcast %c13_i32_469 : i32 to vector<16x128xi32>
    %1078 = arith.select %1075, %1077, %1069 : vector<16x128xi1>, vector<16x128xi32>
    %c14_470 = arith.constant 14 : index
    %c0_471 = arith.constant 0 : index
    %c0_472 = arith.constant 0 : index
    %1079 = vector.load %arg2[%c14_470, %c0_471, %c0_472] : memref<16x16x128xf32, #tpu.memory_space<vmem>>, vector<1x16x128xf32>
    %1080 = vector.shape_cast %1079 : vector<1x16x128xf32> to vector<16x128xf32>
    %1081 = vector.extract_strided_slice %950 {offsets = [14, 0], sizes = [1, 128], strides = [1, 1]} : vector<16x128xf32> to vector<1x128xf32>
    %1082 = vector.broadcast %1081 : vector<1x128xf32> to vector<16x128xf32>
    %1083 = arith.addf %1080, %1082 : vector<16x128xf32>
    %1084 = arith.cmpf ogt, %1083, %1076 : vector<16x128xf32>
    %1085 = arith.select %1084, %1083, %1076 : vector<16x128xi1>, vector<16x128xf32>
    %c14_i32_473 = arith.constant 14 : i32
    %1086 = vector.broadcast %c14_i32_473 : i32 to vector<16x128xi32>
    %1087 = arith.select %1084, %1086, %1078 : vector<16x128xi1>, vector<16x128xi32>
    %c15_474 = arith.constant 15 : index
    %c0_475 = arith.constant 0 : index
    %c0_476 = arith.constant 0 : index
    %1088 = vector.load %arg2[%c15_474, %c0_475, %c0_476] : memref<16x16x128xf32, #tpu.memory_space<vmem>>, vector<1x16x128xf32>
    %1089 = vector.shape_cast %1088 : vector<1x16x128xf32> to vector<16x128xf32>
    %1090 = vector.extract_strided_slice %950 {offsets = [15, 0], sizes = [1, 128], strides = [1, 1]} : vector<16x128xf32> to vector<1x128xf32>
    %1091 = vector.broadcast %1090 : vector<1x128xf32> to vector<16x128xf32>
    %1092 = arith.addf %1089, %1091 : vector<16x128xf32>
    %1093 = arith.cmpf ogt, %1092, %1085 : vector<16x128xf32>
    %1094 = arith.select %1093, %1092, %1085 : vector<16x128xi1>, vector<16x128xf32>
    %c15_i32_477 = arith.constant 15 : i32
    %1095 = vector.broadcast %c15_i32_477 : i32 to vector<16x128xi32>
    %1096 = arith.select %1093, %1095, %1087 : vector<16x128xi1>, vector<16x128xi32>
    %c7_i32_478 = arith.constant 7 : i32
    %1097 = vector.broadcast %c7_i32_478 : i32 to vector<1x128xi32>
    %1098 = arith.cmpi sgt, %0, %1097 : vector<1x128xi32>
    %c0_i32_479 = arith.constant 0 : i32
    %1099 = vector.shape_cast %1098 : vector<1x128xi1> to vector<1x128xi1>
    %1100 = vector.broadcast %1099 : vector<1x128xi1> to vector<16x128xi1>
    %1101 = vector.broadcast %c0_i32_479 : i32 to vector<16x128xi32>
    %1102 = arith.select %1100, %1096, %1101 : vector<16x128xi1>, vector<16x128xi32>
    %c6_480 = arith.constant 6 : index
    %c0_481 = arith.constant 0 : index
    %c0_482 = arith.constant 0 : index
    %1103 = vector.load %arg5[%c6_480, %c0_481, %c0_482] : memref<8x16x128xi32, #tpu.memory_space<vmem>>, vector<1x16x128xi32>
    %1104 = vector.shape_cast %1103 : vector<1x16x128xi32> to vector<16x128xi32>
    %1105 = vector.shape_cast %1102 : vector<16x128xi32> to vector<1x16x128xi32>
    tpu.vector_store %arg5[%c6_480, %c0_481, %c0_482], %1105 {strides = array<i32>} : memref<8x16x128xi32, #tpu.memory_space<vmem>>, vector<1x16x128xi32>,
    %c7_483 = arith.constant 7 : index
    %c0_484 = arith.constant 0 : index
    %c0_485 = arith.constant 0 : index
    %1106 = vector.load %arg1[%c7_483, %c0_484, %c0_485] : memref<8x16x128xf32, #tpu.memory_space<vmem>>, vector<1x16x128xf32>
    %1107 = vector.shape_cast %1106 : vector<1x16x128xf32> to vector<16x128xf32>
    %1108 = arith.addf %1094, %1107 : vector<16x128xf32>
    %c8_i32_486 = arith.constant 8 : i32
    %1109 = vector.broadcast %c8_i32_486 : i32 to vector<1x128xi32>
    %1110 = arith.cmpi eq, %0, %1109 : vector<1x128xi32>
    %1111 = vector.shape_cast %1110 : vector<1x128xi1> to vector<1x128xi1>
    %1112 = vector.broadcast %1111 : vector<1x128xi1> to vector<16x128xi1>
    %1113 = arith.select %1112, %1108, %955 : vector<16x128xi1>, vector<16x128xf32>
    %c0_487 = arith.constant 0 : index
    %c0_488 = arith.constant 0 : index
    %c0_489 = arith.constant 0 : index
    %1114 = vector.load %arg2[%c0_487, %c0_488, %c0_489] : memref<16x16x128xf32, #tpu.memory_space<vmem>>, vector<1x16x128xf32>
    %1115 = vector.shape_cast %1114 : vector<1x16x128xf32> to vector<16x128xf32>
    %1116 = vector.extract_strided_slice %1113 {offsets = [0, 0], sizes = [1, 128], strides = [1, 1]} : vector<16x128xf32> to vector<1x128xf32>
    %1117 = vector.broadcast %1116 : vector<1x128xf32> to vector<16x128xf32>
    %1118 = arith.addf %1115, %1117 : vector<16x128xf32>
    %c0_i32_490 = arith.constant 0 : i32
    %1119 = vector.broadcast %c0_i32_490 : i32 to vector<16x128xi32>
    %c1_491 = arith.constant 1 : index
    %c0_492 = arith.constant 0 : index
    %c0_493 = arith.constant 0 : index
    %1120 = vector.load %arg2[%c1_491, %c0_492, %c0_493] : memref<16x16x128xf32, #tpu.memory_space<vmem>>, vector<1x16x128xf32>
    %1121 = vector.shape_cast %1120 : vector<1x16x128xf32> to vector<16x128xf32>
    %1122 = vector.extract_strided_slice %1113 {offsets = [1, 0], sizes = [1, 128], strides = [1, 1]} : vector<16x128xf32> to vector<1x128xf32>
    %1123 = vector.broadcast %1122 : vector<1x128xf32> to vector<16x128xf32>
    %1124 = arith.addf %1121, %1123 : vector<16x128xf32>
    %1125 = arith.cmpf ogt, %1124, %1118 : vector<16x128xf32>
    %1126 = arith.select %1125, %1124, %1118 : vector<16x128xi1>, vector<16x128xf32>
    %c1_i32_494 = arith.constant 1 : i32
    %1127 = vector.broadcast %c1_i32_494 : i32 to vector<16x128xi32>
    %1128 = arith.select %1125, %1127, %1119 : vector<16x128xi1>, vector<16x128xi32>
    %c2_495 = arith.constant 2 : index
    %c0_496 = arith.constant 0 : index
    %c0_497 = arith.constant 0 : index
    %1129 = vector.load %arg2[%c2_495, %c0_496, %c0_497] : memref<16x16x128xf32, #tpu.memory_space<vmem>>, vector<1x16x128xf32>
    %1130 = vector.shape_cast %1129 : vector<1x16x128xf32> to vector<16x128xf32>
    %1131 = vector.extract_strided_slice %1113 {offsets = [2, 0], sizes = [1, 128], strides = [1, 1]} : vector<16x128xf32> to vector<1x128xf32>
    %1132 = vector.broadcast %1131 : vector<1x128xf32> to vector<16x128xf32>
    %1133 = arith.addf %1130, %1132 : vector<16x128xf32>
    %1134 = arith.cmpf ogt, %1133, %1126 : vector<16x128xf32>
    %1135 = arith.select %1134, %1133, %1126 : vector<16x128xi1>, vector<16x128xf32>
    %c2_i32_498 = arith.constant 2 : i32
    %1136 = vector.broadcast %c2_i32_498 : i32 to vector<16x128xi32>
    %1137 = arith.select %1134, %1136, %1128 : vector<16x128xi1>, vector<16x128xi32>
    %c3_499 = arith.constant 3 : index
    %c0_500 = arith.constant 0 : index
    %c0_501 = arith.constant 0 : index
    %1138 = vector.load %arg2[%c3_499, %c0_500, %c0_501] : memref<16x16x128xf32, #tpu.memory_space<vmem>>, vector<1x16x128xf32>
    %1139 = vector.shape_cast %1138 : vector<1x16x128xf32> to vector<16x128xf32>
    %1140 = vector.extract_strided_slice %1113 {offsets = [3, 0], sizes = [1, 128], strides = [1, 1]} : vector<16x128xf32> to vector<1x128xf32>
    %1141 = vector.broadcast %1140 : vector<1x128xf32> to vector<16x128xf32>
    %1142 = arith.addf %1139, %1141 : vector<16x128xf32>
    %1143 = arith.cmpf ogt, %1142, %1135 : vector<16x128xf32>
    %1144 = arith.select %1143, %1142, %1135 : vector<16x128xi1>, vector<16x128xf32>
    %c3_i32_502 = arith.constant 3 : i32
    %1145 = vector.broadcast %c3_i32_502 : i32 to vector<16x128xi32>
    %1146 = arith.select %1143, %1145, %1137 : vector<16x128xi1>, vector<16x128xi32>
    %c4_503 = arith.constant 4 : index
    %c0_504 = arith.constant 0 : index
    %c0_505 = arith.constant 0 : index
    %1147 = vector.load %arg2[%c4_503, %c0_504, %c0_505] : memref<16x16x128xf32, #tpu.memory_space<vmem>>, vector<1x16x128xf32>
    %1148 = vector.shape_cast %1147 : vector<1x16x128xf32> to vector<16x128xf32>
    %1149 = vector.extract_strided_slice %1113 {offsets = [4, 0], sizes = [1, 128], strides = [1, 1]} : vector<16x128xf32> to vector<1x128xf32>
    %1150 = vector.broadcast %1149 : vector<1x128xf32> to vector<16x128xf32>
    %1151 = arith.addf %1148, %1150 : vector<16x128xf32>
    %1152 = arith.cmpf ogt, %1151, %1144 : vector<16x128xf32>
    %1153 = arith.select %1152, %1151, %1144 : vector<16x128xi1>, vector<16x128xf32>
    %c4_i32_506 = arith.constant 4 : i32
    %1154 = vector.broadcast %c4_i32_506 : i32 to vector<16x128xi32>
    %1155 = arith.select %1152, %1154, %1146 : vector<16x128xi1>, vector<16x128xi32>
    %c5_507 = arith.constant 5 : index
    %c0_508 = arith.constant 0 : index
    %c0_509 = arith.constant 0 : index
    %1156 = vector.load %arg2[%c5_507, %c0_508, %c0_509] : memref<16x16x128xf32, #tpu.memory_space<vmem>>, vector<1x16x128xf32>
    %1157 = vector.shape_cast %1156 : vector<1x16x128xf32> to vector<16x128xf32>
    %1158 = vector.extract_strided_slice %1113 {offsets = [5, 0], sizes = [1, 128], strides = [1, 1]} : vector<16x128xf32> to vector<1x128xf32>
    %1159 = vector.broadcast %1158 : vector<1x128xf32> to vector<16x128xf32>
    %1160 = arith.addf %1157, %1159 : vector<16x128xf32>
    %1161 = arith.cmpf ogt, %1160, %1153 : vector<16x128xf32>
    %1162 = arith.select %1161, %1160, %1153 : vector<16x128xi1>, vector<16x128xf32>
    %c5_i32_510 = arith.constant 5 : i32
    %1163 = vector.broadcast %c5_i32_510 : i32 to vector<16x128xi32>
    %1164 = arith.select %1161, %1163, %1155 : vector<16x128xi1>, vector<16x128xi32>
    %c6_511 = arith.constant 6 : index
    %c0_512 = arith.constant 0 : index
    %c0_513 = arith.constant 0 : index
    %1165 = vector.load %arg2[%c6_511, %c0_512, %c0_513] : memref<16x16x128xf32, #tpu.memory_space<vmem>>, vector<1x16x128xf32>
    %1166 = vector.shape_cast %1165 : vector<1x16x128xf32> to vector<16x128xf32>
    %1167 = vector.extract_strided_slice %1113 {offsets = [6, 0], sizes = [1, 128], strides = [1, 1]} : vector<16x128xf32> to vector<1x128xf32>
    %1168 = vector.broadcast %1167 : vector<1x128xf32> to vector<16x128xf32>
    %1169 = arith.addf %1166, %1168 : vector<16x128xf32>
    %1170 = arith.cmpf ogt, %1169, %1162 : vector<16x128xf32>
    %1171 = arith.select %1170, %1169, %1162 : vector<16x128xi1>, vector<16x128xf32>
    %c6_i32_514 = arith.constant 6 : i32
    %1172 = vector.broadcast %c6_i32_514 : i32 to vector<16x128xi32>
    %1173 = arith.select %1170, %1172, %1164 : vector<16x128xi1>, vector<16x128xi32>
    %c7_515 = arith.constant 7 : index
    %c0_516 = arith.constant 0 : index
    %c0_517 = arith.constant 0 : index
    %1174 = vector.load %arg2[%c7_515, %c0_516, %c0_517] : memref<16x16x128xf32, #tpu.memory_space<vmem>>, vector<1x16x128xf32>
    %1175 = vector.shape_cast %1174 : vector<1x16x128xf32> to vector<16x128xf32>
    %1176 = vector.extract_strided_slice %1113 {offsets = [7, 0], sizes = [1, 128], strides = [1, 1]} : vector<16x128xf32> to vector<1x128xf32>
    %1177 = vector.broadcast %1176 : vector<1x128xf32> to vector<16x128xf32>
    %1178 = arith.addf %1175, %1177 : vector<16x128xf32>
    %1179 = arith.cmpf ogt, %1178, %1171 : vector<16x128xf32>
    %1180 = arith.select %1179, %1178, %1171 : vector<16x128xi1>, vector<16x128xf32>
    %c7_i32_518 = arith.constant 7 : i32
    %1181 = vector.broadcast %c7_i32_518 : i32 to vector<16x128xi32>
    %1182 = arith.select %1179, %1181, %1173 : vector<16x128xi1>, vector<16x128xi32>
    %c8_519 = arith.constant 8 : index
    %c0_520 = arith.constant 0 : index
    %c0_521 = arith.constant 0 : index
    %1183 = vector.load %arg2[%c8_519, %c0_520, %c0_521] : memref<16x16x128xf32, #tpu.memory_space<vmem>>, vector<1x16x128xf32>
    %1184 = vector.shape_cast %1183 : vector<1x16x128xf32> to vector<16x128xf32>
    %1185 = vector.extract_strided_slice %1113 {offsets = [8, 0], sizes = [1, 128], strides = [1, 1]} : vector<16x128xf32> to vector<1x128xf32>
    %1186 = vector.broadcast %1185 : vector<1x128xf32> to vector<16x128xf32>
    %1187 = arith.addf %1184, %1186 : vector<16x128xf32>
    %1188 = arith.cmpf ogt, %1187, %1180 : vector<16x128xf32>
    %1189 = arith.select %1188, %1187, %1180 : vector<16x128xi1>, vector<16x128xf32>
    %c8_i32_522 = arith.constant 8 : i32
    %1190 = vector.broadcast %c8_i32_522 : i32 to vector<16x128xi32>
    %1191 = arith.select %1188, %1190, %1182 : vector<16x128xi1>, vector<16x128xi32>
    %c9_523 = arith.constant 9 : index
    %c0_524 = arith.constant 0 : index
    %c0_525 = arith.constant 0 : index
    %1192 = vector.load %arg2[%c9_523, %c0_524, %c0_525] : memref<16x16x128xf32, #tpu.memory_space<vmem>>, vector<1x16x128xf32>
    %1193 = vector.shape_cast %1192 : vector<1x16x128xf32> to vector<16x128xf32>
    %1194 = vector.extract_strided_slice %1113 {offsets = [9, 0], sizes = [1, 128], strides = [1, 1]} : vector<16x128xf32> to vector<1x128xf32>
    %1195 = vector.broadcast %1194 : vector<1x128xf32> to vector<16x128xf32>
    %1196 = arith.addf %1193, %1195 : vector<16x128xf32>
    %1197 = arith.cmpf ogt, %1196, %1189 : vector<16x128xf32>
    %1198 = arith.select %1197, %1196, %1189 : vector<16x128xi1>, vector<16x128xf32>
    %c9_i32_526 = arith.constant 9 : i32
    %1199 = vector.broadcast %c9_i32_526 : i32 to vector<16x128xi32>
    %1200 = arith.select %1197, %1199, %1191 : vector<16x128xi1>, vector<16x128xi32>
    %c10_527 = arith.constant 10 : index
    %c0_528 = arith.constant 0 : index
    %c0_529 = arith.constant 0 : index
    %1201 = vector.load %arg2[%c10_527, %c0_528, %c0_529] : memref<16x16x128xf32, #tpu.memory_space<vmem>>, vector<1x16x128xf32>
    %1202 = vector.shape_cast %1201 : vector<1x16x128xf32> to vector<16x128xf32>
    %1203 = vector.extract_strided_slice %1113 {offsets = [10, 0], sizes = [1, 128], strides = [1, 1]} : vector<16x128xf32> to vector<1x128xf32>
    %1204 = vector.broadcast %1203 : vector<1x128xf32> to vector<16x128xf32>
    %1205 = arith.addf %1202, %1204 : vector<16x128xf32>
    %1206 = arith.cmpf ogt, %1205, %1198 : vector<16x128xf32>
    %1207 = arith.select %1206, %1205, %1198 : vector<16x128xi1>, vector<16x128xf32>
    %c10_i32_530 = arith.constant 10 : i32
    %1208 = vector.broadcast %c10_i32_530 : i32 to vector<16x128xi32>
    %1209 = arith.select %1206, %1208, %1200 : vector<16x128xi1>, vector<16x128xi32>
    %c11_531 = arith.constant 11 : index
    %c0_532 = arith.constant 0 : index
    %c0_533 = arith.constant 0 : index
    %1210 = vector.load %arg2[%c11_531, %c0_532, %c0_533] : memref<16x16x128xf32, #tpu.memory_space<vmem>>, vector<1x16x128xf32>
    %1211 = vector.shape_cast %1210 : vector<1x16x128xf32> to vector<16x128xf32>
    %1212 = vector.extract_strided_slice %1113 {offsets = [11, 0], sizes = [1, 128], strides = [1, 1]} : vector<16x128xf32> to vector<1x128xf32>
    %1213 = vector.broadcast %1212 : vector<1x128xf32> to vector<16x128xf32>
    %1214 = arith.addf %1211, %1213 : vector<16x128xf32>
    %1215 = arith.cmpf ogt, %1214, %1207 : vector<16x128xf32>
    %1216 = arith.select %1215, %1214, %1207 : vector<16x128xi1>, vector<16x128xf32>
    %c11_i32_534 = arith.constant 11 : i32
    %1217 = vector.broadcast %c11_i32_534 : i32 to vector<16x128xi32>
    %1218 = arith.select %1215, %1217, %1209 : vector<16x128xi1>, vector<16x128xi32>
    %c12_535 = arith.constant 12 : index
    %c0_536 = arith.constant 0 : index
    %c0_537 = arith.constant 0 : index
    %1219 = vector.load %arg2[%c12_535, %c0_536, %c0_537] : memref<16x16x128xf32, #tpu.memory_space<vmem>>, vector<1x16x128xf32>
    %1220 = vector.shape_cast %1219 : vector<1x16x128xf32> to vector<16x128xf32>
    %1221 = vector.extract_strided_slice %1113 {offsets = [12, 0], sizes = [1, 128], strides = [1, 1]} : vector<16x128xf32> to vector<1x128xf32>
    %1222 = vector.broadcast %1221 : vector<1x128xf32> to vector<16x128xf32>
    %1223 = arith.addf %1220, %1222 : vector<16x128xf32>
    %1224 = arith.cmpf ogt, %1223, %1216 : vector<16x128xf32>
    %1225 = arith.select %1224, %1223, %1216 : vector<16x128xi1>, vector<16x128xf32>
    %c12_i32_538 = arith.constant 12 : i32
    %1226 = vector.broadcast %c12_i32_538 : i32 to vector<16x128xi32>
    %1227 = arith.select %1224, %1226, %1218 : vector<16x128xi1>, vector<16x128xi32>
    %c13_539 = arith.constant 13 : index
    %c0_540 = arith.constant 0 : index
    %c0_541 = arith.constant 0 : index
    %1228 = vector.load %arg2[%c13_539, %c0_540, %c0_541] : memref<16x16x128xf32, #tpu.memory_space<vmem>>, vector<1x16x128xf32>
    %1229 = vector.shape_cast %1228 : vector<1x16x128xf32> to vector<16x128xf32>
    %1230 = vector.extract_strided_slice %1113 {offsets = [13, 0], sizes = [1, 128], strides = [1, 1]} : vector<16x128xf32> to vector<1x128xf32>
    %1231 = vector.broadcast %1230 : vector<1x128xf32> to vector<16x128xf32>
    %1232 = arith.addf %1229, %1231 : vector<16x128xf32>
    %1233 = arith.cmpf ogt, %1232, %1225 : vector<16x128xf32>
    %1234 = arith.select %1233, %1232, %1225 : vector<16x128xi1>, vector<16x128xf32>
    %c13_i32_542 = arith.constant 13 : i32
    %1235 = vector.broadcast %c13_i32_542 : i32 to vector<16x128xi32>
    %1236 = arith.select %1233, %1235, %1227 : vector<16x128xi1>, vector<16x128xi32>
    %c14_543 = arith.constant 14 : index
    %c0_544 = arith.constant 0 : index
    %c0_545 = arith.constant 0 : index
    %1237 = vector.load %arg2[%c14_543, %c0_544, %c0_545] : memref<16x16x128xf32, #tpu.memory_space<vmem>>, vector<1x16x128xf32>
    %1238 = vector.shape_cast %1237 : vector<1x16x128xf32> to vector<16x128xf32>
    %1239 = vector.extract_strided_slice %1113 {offsets = [14, 0], sizes = [1, 128], strides = [1, 1]} : vector<16x128xf32> to vector<1x128xf32>
    %1240 = vector.broadcast %1239 : vector<1x128xf32> to vector<16x128xf32>
    %1241 = arith.addf %1238, %1240 : vector<16x128xf32>
    %1242 = arith.cmpf ogt, %1241, %1234 : vector<16x128xf32>
    %1243 = arith.select %1242, %1241, %1234 : vector<16x128xi1>, vector<16x128xf32>
    %c14_i32_546 = arith.constant 14 : i32
    %1244 = vector.broadcast %c14_i32_546 : i32 to vector<16x128xi32>
    %1245 = arith.select %1242, %1244, %1236 : vector<16x128xi1>, vector<16x128xi32>
    %c15_547 = arith.constant 15 : index
    %c0_548 = arith.constant 0 : index
    %c0_549 = arith.constant 0 : index
    %1246 = vector.load %arg2[%c15_547, %c0_548, %c0_549] : memref<16x16x128xf32, #tpu.memory_space<vmem>>, vector<1x16x128xf32>
    %1247 = vector.shape_cast %1246 : vector<1x16x128xf32> to vector<16x128xf32>
    %1248 = vector.extract_strided_slice %1113 {offsets = [15, 0], sizes = [1, 128], strides = [1, 1]} : vector<16x128xf32> to vector<1x128xf32>
    %1249 = vector.broadcast %1248 : vector<1x128xf32> to vector<16x128xf32>
    %1250 = arith.addf %1247, %1249 : vector<16x128xf32>
    %1251 = arith.cmpf ogt, %1250, %1243 : vector<16x128xf32>
    %c15_i32_550 = arith.constant 15 : i32
    %1252 = vector.broadcast %c15_i32_550 : i32 to vector<16x128xi32>
    %1253 = arith.select %1251, %1252, %1245 : vector<16x128xi1>, vector<16x128xi32>
    %1254 = vector.extract_strided_slice %1253 {offsets = [15, 0], sizes = [1, 128], strides = [1, 1]} : vector<16x128xi32> to vector<1x128xi32>
    %c7_i32_551 = arith.constant 7 : i32
    %1255 = vector.broadcast %c7_i32_551 : i32 to vector<8x128xi32>
    %1256 = arith.cmpi eq, %2, %1255 : vector<8x128xi32>
    %c0_i32_552 = arith.constant 0 : i32
    %1257 = vector.shape_cast %1254 : vector<1x128xi32> to vector<1x128xi32>
    %1258 = vector.broadcast %1257 : vector<1x128xi32> to vector<8x128xi32>
    %1259 = vector.broadcast %c0_i32_552 : i32 to vector<8x128xi32>
    %1260 = arith.select %1256, %1258, %1259 : vector<8x128xi1>, vector<8x128xi32>
    %c6_553 = arith.constant 6 : index
    %c0_554 = arith.constant 0 : index
    %c0_555 = arith.constant 0 : index
    %1261 = vector.load %arg5[%c6_553, %c0_554, %c0_555] : memref<8x16x128xi32, #tpu.memory_space<vmem>>, vector<1x16x128xi32>
    %1262 = vector.shape_cast %1261 : vector<1x16x128xi32> to vector<16x128xi32>
    %c7_i32_556 = arith.constant 7 : i32
    %1263 = vector.broadcast %c7_i32_556 : i32 to vector<1x128xi32>
    %1264 = arith.cmpi eq, %0, %1263 : vector<1x128xi32>
    %1265 = vector.shape_cast %1264 : vector<1x128xi1> to vector<1x128xi1>
    %1266 = vector.broadcast %1265 : vector<1x128xi1> to vector<16x128xi1>
    %1267 = vector.shape_cast %1254 : vector<1x128xi32> to vector<1x128xi32>
    %1268 = vector.broadcast %1267 : vector<1x128xi32> to vector<16x128xi32>
    %1269 = arith.select %1266, %1268, %1262 : vector<16x128xi1>, vector<16x128xi32>
    %1270 = vector.broadcast %1254 : vector<1x128xi32> to vector<16x128xi32>
    %1271 = arith.cmpi eq, %1, %1270 : vector<16x128xi32>
    %c0_i32_557 = arith.constant 0 : i32
    %1272 = vector.broadcast %c0_i32_557 : i32 to vector<16x128xi32>
    %1273 = arith.select %1271, %1269, %1272 : vector<16x128xi1>, vector<16x128xi32>
    %cst = arith.constant dense<-2147483648> : vector<128xi32>
    %1274 = vector.multi_reduction <maxsi>, %1273, %cst [0] : vector<16x128xi32> to vector<128xi32>
    %1275 = vector.shape_cast %1274 : vector<128xi32> to vector<1x128xi32>
    %c6_i32_558 = arith.constant 6 : i32
    %1276 = vector.broadcast %c6_i32_558 : i32 to vector<8x128xi32>
    %1277 = arith.cmpi eq, %2, %1276 : vector<8x128xi32>
    %1278 = vector.shape_cast %1275 : vector<1x128xi32> to vector<1x128xi32>
    %1279 = vector.broadcast %1278 : vector<1x128xi32> to vector<8x128xi32>
    %1280 = arith.select %1277, %1279, %1260 : vector<8x128xi1>, vector<8x128xi32>
    %c5_559 = arith.constant 5 : index
    %c0_560 = arith.constant 0 : index
    %c0_561 = arith.constant 0 : index
    %1281 = vector.load %arg5[%c5_559, %c0_560, %c0_561] : memref<8x16x128xi32, #tpu.memory_space<vmem>>, vector<1x16x128xi32>
    %1282 = vector.shape_cast %1281 : vector<1x16x128xi32> to vector<16x128xi32>
    %c6_i32_562 = arith.constant 6 : i32
    %1283 = vector.broadcast %c6_i32_562 : i32 to vector<1x128xi32>
    %1284 = arith.cmpi eq, %0, %1283 : vector<1x128xi32>
    %1285 = vector.shape_cast %1284 : vector<1x128xi1> to vector<1x128xi1>
    %1286 = vector.broadcast %1285 : vector<1x128xi1> to vector<16x128xi1>
    %1287 = vector.shape_cast %1254 : vector<1x128xi32> to vector<1x128xi32>
    %1288 = vector.broadcast %1287 : vector<1x128xi32> to vector<16x128xi32>
    %1289 = arith.select %1286, %1288, %1282 : vector<16x128xi1>, vector<16x128xi32>
    %1290 = vector.broadcast %1275 : vector<1x128xi32> to vector<16x128xi32>
    %1291 = arith.cmpi eq, %1, %1290 : vector<16x128xi32>
    %c0_i32_563 = arith.constant 0 : i32
    %1292 = vector.broadcast %c0_i32_563 : i32 to vector<16x128xi32>
    %1293 = arith.select %1291, %1289, %1292 : vector<16x128xi1>, vector<16x128xi32>
    %cst_564 = arith.constant dense<-2147483648> : vector<128xi32>
    %1294 = vector.multi_reduction <maxsi>, %1293, %cst_564 [0] : vector<16x128xi32> to vector<128xi32>
    %1295 = vector.shape_cast %1294 : vector<128xi32> to vector<1x128xi32>
    %c5_i32_565 = arith.constant 5 : i32
    %1296 = vector.broadcast %c5_i32_565 : i32 to vector<8x128xi32>
    %1297 = arith.cmpi eq, %2, %1296 : vector<8x128xi32>
    %1298 = vector.shape_cast %1295 : vector<1x128xi32> to vector<1x128xi32>
    %1299 = vector.broadcast %1298 : vector<1x128xi32> to vector<8x128xi32>
    %1300 = arith.select %1297, %1299, %1280 : vector<8x128xi1>, vector<8x128xi32>
    %c4_566 = arith.constant 4 : index
    %c0_567 = arith.constant 0 : index
    %c0_568 = arith.constant 0 : index
    %1301 = vector.load %arg5[%c4_566, %c0_567, %c0_568] : memref<8x16x128xi32, #tpu.memory_space<vmem>>, vector<1x16x128xi32>
    %1302 = vector.shape_cast %1301 : vector<1x16x128xi32> to vector<16x128xi32>
    %c5_i32_569 = arith.constant 5 : i32
    %1303 = vector.broadcast %c5_i32_569 : i32 to vector<1x128xi32>
    %1304 = arith.cmpi eq, %0, %1303 : vector<1x128xi32>
    %1305 = vector.shape_cast %1304 : vector<1x128xi1> to vector<1x128xi1>
    %1306 = vector.broadcast %1305 : vector<1x128xi1> to vector<16x128xi1>
    %1307 = vector.shape_cast %1254 : vector<1x128xi32> to vector<1x128xi32>
    %1308 = vector.broadcast %1307 : vector<1x128xi32> to vector<16x128xi32>
    %1309 = arith.select %1306, %1308, %1302 : vector<16x128xi1>, vector<16x128xi32>
    %1310 = vector.broadcast %1295 : vector<1x128xi32> to vector<16x128xi32>
    %1311 = arith.cmpi eq, %1, %1310 : vector<16x128xi32>
    %c0_i32_570 = arith.constant 0 : i32
    %1312 = vector.broadcast %c0_i32_570 : i32 to vector<16x128xi32>
    %1313 = arith.select %1311, %1309, %1312 : vector<16x128xi1>, vector<16x128xi32>
    %cst_571 = arith.constant dense<-2147483648> : vector<128xi32>
    %1314 = vector.multi_reduction <maxsi>, %1313, %cst_571 [0] : vector<16x128xi32> to vector<128xi32>
    %1315 = vector.shape_cast %1314 : vector<128xi32> to vector<1x128xi32>
    %c4_i32_572 = arith.constant 4 : i32
    %1316 = vector.broadcast %c4_i32_572 : i32 to vector<8x128xi32>
    %1317 = arith.cmpi eq, %2, %1316 : vector<8x128xi32>
    %1318 = vector.shape_cast %1315 : vector<1x128xi32> to vector<1x128xi32>
    %1319 = vector.broadcast %1318 : vector<1x128xi32> to vector<8x128xi32>
    %1320 = arith.select %1317, %1319, %1300 : vector<8x128xi1>, vector<8x128xi32>
    %c3_573 = arith.constant 3 : index
    %c0_574 = arith.constant 0 : index
    %c0_575 = arith.constant 0 : index
    %1321 = vector.load %arg5[%c3_573, %c0_574, %c0_575] : memref<8x16x128xi32, #tpu.memory_space<vmem>>, vector<1x16x128xi32>
    %1322 = vector.shape_cast %1321 : vector<1x16x128xi32> to vector<16x128xi32>
    %c4_i32_576 = arith.constant 4 : i32
    %1323 = vector.broadcast %c4_i32_576 : i32 to vector<1x128xi32>
    %1324 = arith.cmpi eq, %0, %1323 : vector<1x128xi32>
    %1325 = vector.shape_cast %1324 : vector<1x128xi1> to vector<1x128xi1>
    %1326 = vector.broadcast %1325 : vector<1x128xi1> to vector<16x128xi1>
    %1327 = vector.shape_cast %1254 : vector<1x128xi32> to vector<1x128xi32>
    %1328 = vector.broadcast %1327 : vector<1x128xi32> to vector<16x128xi32>
    %1329 = arith.select %1326, %1328, %1322 : vector<16x128xi1>, vector<16x128xi32>
    %1330 = vector.broadcast %1315 : vector<1x128xi32> to vector<16x128xi32>
    %1331 = arith.cmpi eq, %1, %1330 : vector<16x128xi32>
    %c0_i32_577 = arith.constant 0 : i32
    %1332 = vector.broadcast %c0_i32_577 : i32 to vector<16x128xi32>
    %1333 = arith.select %1331, %1329, %1332 : vector<16x128xi1>, vector<16x128xi32>
    %cst_578 = arith.constant dense<-2147483648> : vector<128xi32>
    %1334 = vector.multi_reduction <maxsi>, %1333, %cst_578 [0] : vector<16x128xi32> to vector<128xi32>
    %1335 = vector.shape_cast %1334 : vector<128xi32> to vector<1x128xi32>
    %c3_i32_579 = arith.constant 3 : i32
    %1336 = vector.broadcast %c3_i32_579 : i32 to vector<8x128xi32>
    %1337 = arith.cmpi eq, %2, %1336 : vector<8x128xi32>
    %1338 = vector.shape_cast %1335 : vector<1x128xi32> to vector<1x128xi32>
    %1339 = vector.broadcast %1338 : vector<1x128xi32> to vector<8x128xi32>
    %1340 = arith.select %1337, %1339, %1320 : vector<8x128xi1>, vector<8x128xi32>
    %c2_580 = arith.constant 2 : index
    %c0_581 = arith.constant 0 : index
    %c0_582 = arith.constant 0 : index
    %1341 = vector.load %arg5[%c2_580, %c0_581, %c0_582] : memref<8x16x128xi32, #tpu.memory_space<vmem>>, vector<1x16x128xi32>
    %1342 = vector.shape_cast %1341 : vector<1x16x128xi32> to vector<16x128xi32>
    %c3_i32_583 = arith.constant 3 : i32
    %1343 = vector.broadcast %c3_i32_583 : i32 to vector<1x128xi32>
    %1344 = arith.cmpi eq, %0, %1343 : vector<1x128xi32>
    %1345 = vector.shape_cast %1344 : vector<1x128xi1> to vector<1x128xi1>
    %1346 = vector.broadcast %1345 : vector<1x128xi1> to vector<16x128xi1>
    %1347 = vector.shape_cast %1254 : vector<1x128xi32> to vector<1x128xi32>
    %1348 = vector.broadcast %1347 : vector<1x128xi32> to vector<16x128xi32>
    %1349 = arith.select %1346, %1348, %1342 : vector<16x128xi1>, vector<16x128xi32>
    %1350 = vector.broadcast %1335 : vector<1x128xi32> to vector<16x128xi32>
    %1351 = arith.cmpi eq, %1, %1350 : vector<16x128xi32>
    %c0_i32_584 = arith.constant 0 : i32
    %1352 = vector.broadcast %c0_i32_584 : i32 to vector<16x128xi32>
    %1353 = arith.select %1351, %1349, %1352 : vector<16x128xi1>, vector<16x128xi32>
    %cst_585 = arith.constant dense<-2147483648> : vector<128xi32>
    %1354 = vector.multi_reduction <maxsi>, %1353, %cst_585 [0] : vector<16x128xi32> to vector<128xi32>
    %1355 = vector.shape_cast %1354 : vector<128xi32> to vector<1x128xi32>
    %c2_i32_586 = arith.constant 2 : i32
    %1356 = vector.broadcast %c2_i32_586 : i32 to vector<8x128xi32>
    %1357 = arith.cmpi eq, %2, %1356 : vector<8x128xi32>
    %1358 = vector.shape_cast %1355 : vector<1x128xi32> to vector<1x128xi32>
    %1359 = vector.broadcast %1358 : vector<1x128xi32> to vector<8x128xi32>
    %1360 = arith.select %1357, %1359, %1340 : vector<8x128xi1>, vector<8x128xi32>
    %c1_587 = arith.constant 1 : index
    %c0_588 = arith.constant 0 : index
    %c0_589 = arith.constant 0 : index
    %1361 = vector.load %arg5[%c1_587, %c0_588, %c0_589] : memref<8x16x128xi32, #tpu.memory_space<vmem>>, vector<1x16x128xi32>
    %1362 = vector.shape_cast %1361 : vector<1x16x128xi32> to vector<16x128xi32>
    %c2_i32_590 = arith.constant 2 : i32
    %1363 = vector.broadcast %c2_i32_590 : i32 to vector<1x128xi32>
    %1364 = arith.cmpi eq, %0, %1363 : vector<1x128xi32>
    %1365 = vector.shape_cast %1364 : vector<1x128xi1> to vector<1x128xi1>
    %1366 = vector.broadcast %1365 : vector<1x128xi1> to vector<16x128xi1>
    %1367 = vector.shape_cast %1254 : vector<1x128xi32> to vector<1x128xi32>
    %1368 = vector.broadcast %1367 : vector<1x128xi32> to vector<16x128xi32>
    %1369 = arith.select %1366, %1368, %1362 : vector<16x128xi1>, vector<16x128xi32>
    %1370 = vector.broadcast %1355 : vector<1x128xi32> to vector<16x128xi32>
    %1371 = arith.cmpi eq, %1, %1370 : vector<16x128xi32>
    %c0_i32_591 = arith.constant 0 : i32
    %1372 = vector.broadcast %c0_i32_591 : i32 to vector<16x128xi32>
    %1373 = arith.select %1371, %1369, %1372 : vector<16x128xi1>, vector<16x128xi32>
    %cst_592 = arith.constant dense<-2147483648> : vector<128xi32>
    %1374 = vector.multi_reduction <maxsi>, %1373, %cst_592 [0] : vector<16x128xi32> to vector<128xi32>
    %1375 = vector.shape_cast %1374 : vector<128xi32> to vector<1x128xi32>
    %c1_i32_593 = arith.constant 1 : i32
    %1376 = vector.broadcast %c1_i32_593 : i32 to vector<8x128xi32>
    %1377 = arith.cmpi eq, %2, %1376 : vector<8x128xi32>
    %1378 = vector.shape_cast %1375 : vector<1x128xi32> to vector<1x128xi32>
    %1379 = vector.broadcast %1378 : vector<1x128xi32> to vector<8x128xi32>
    %1380 = arith.select %1377, %1379, %1360 : vector<8x128xi1>, vector<8x128xi32>
    %c0_594 = arith.constant 0 : index
    %c0_595 = arith.constant 0 : index
    %c0_596 = arith.constant 0 : index
    %1381 = vector.load %arg5[%c0_594, %c0_595, %c0_596] : memref<8x16x128xi32, #tpu.memory_space<vmem>>, vector<1x16x128xi32>
    %1382 = vector.shape_cast %1381 : vector<1x16x128xi32> to vector<16x128xi32>
    %c1_i32_597 = arith.constant 1 : i32
    %1383 = vector.broadcast %c1_i32_597 : i32 to vector<1x128xi32>
    %1384 = arith.cmpi eq, %0, %1383 : vector<1x128xi32>
    %1385 = vector.shape_cast %1384 : vector<1x128xi1> to vector<1x128xi1>
    %1386 = vector.broadcast %1385 : vector<1x128xi1> to vector<16x128xi1>
    %1387 = vector.shape_cast %1254 : vector<1x128xi32> to vector<1x128xi32>
    %1388 = vector.broadcast %1387 : vector<1x128xi32> to vector<16x128xi32>
    %1389 = arith.select %1386, %1388, %1382 : vector<16x128xi1>, vector<16x128xi32>
    %1390 = vector.broadcast %1375 : vector<1x128xi32> to vector<16x128xi32>
    %1391 = arith.cmpi eq, %1, %1390 : vector<16x128xi32>
    %c0_i32_598 = arith.constant 0 : i32
    %1392 = vector.broadcast %c0_i32_598 : i32 to vector<16x128xi32>
    %1393 = arith.select %1391, %1389, %1392 : vector<16x128xi1>, vector<16x128xi32>
    %cst_599 = arith.constant dense<-2147483648> : vector<128xi32>
    %1394 = vector.multi_reduction <maxsi>, %1393, %cst_599 [0] : vector<16x128xi32> to vector<128xi32>
    %1395 = vector.shape_cast %1394 : vector<128xi32> to vector<1x128xi32>
    %c0_i32_600 = arith.constant 0 : i32
    %1396 = vector.broadcast %c0_i32_600 : i32 to vector<8x128xi32>
    %1397 = arith.cmpi eq, %2, %1396 : vector<8x128xi32>
    %1398 = vector.shape_cast %1395 : vector<1x128xi32> to vector<1x128xi32>
    %1399 = vector.broadcast %1398 : vector<1x128xi32> to vector<8x128xi32>
    %1400 = arith.select %1397, %1399, %1380 : vector<8x128xi1>, vector<8x128xi32>
    %c0_601 = arith.constant 0 : index
    %c0_602 = arith.constant 0 : index
    %1401 = vector.load %arg4[%c0_601, %c0_602] : memref<8x128xi32, #tpu.memory_space<vmem>>, vector<8x128xi32>
    tpu.vector_store %arg4[%c0_601, %c0_602], %1400 {strides = array<i32>} : memref<8x128xi32, #tpu.memory_space<vmem>>, vector<8x128xi32>,
    return
  }
  func.func @transform_0(%arg0: i32) -> (i32, i32, i32) {
    %c0_i32 = arith.constant 0 : i32
    %c0_i32_0 = arith.constant 0 : i32
    %c0_i32_1 = arith.constant 0 : i32
    return %c0_i32, %c0_i32_0, %arg0 : i32, i32, i32
  }
  func.func @transform_1(%arg0: i32) -> (i32, i32, i32) {
    %c0_i32 = arith.constant 0 : i32
    %c0_i32_0 = arith.constant 0 : i32
    %c0_i32_1 = arith.constant 0 : i32
    %c0_i32_2 = arith.constant 0 : i32
    return %c0_i32, %c0_i32_0, %c0_i32_1 : i32, i32, i32
  }
  func.func @transform_2(%arg0: i32) -> (i32, i32) {
    %c0_i32 = arith.constant 0 : i32
    %c0_i32_0 = arith.constant 0 : i32
    return %c0_i32, %arg0 : i32, i32
  }
  func.func @transform_3(%arg0: i32) -> (i32, i32) {
    %c0_i32 = arith.constant 0 : i32
    %c0_i32_0 = arith.constant 0 : i32
    return %c0_i32, %arg0 : i32, i32
  }
}

</mosaic_0001>

<bundles_post_ra>
// kernel: crf_viterbi_decode.1
= control target key start
LH: loop header
LB: loop body
LE: loop exit
PB: predicated region body
PF: predicated region fallthrough
CT: control target
= control target key end

     0   :  { %v15_v0 = vlaneseq  ;;  %v4145_v20 = vmov 0   ;;  %s4141_s0 = inlined_call_operand.vmem [shape: f32[8,16,128], index: 0, kind: input, shape index: {}]   ;;  %s4142_s1 = inlined_call_operand.vmem [shape: f32[16,16,128], index: 1, kind: input, shape index: {}]   ;;  %s4143_s2 = inlined_call_operand.vmem [shape: s32[1,128], index: 2, kind: input, shape index: {}]   ;;  %s4144_s3 = inlined_call_operand.vmem [shape: s32[8,128], index: 3, kind: output, shape index: {}]  }
   0x1   :  { %v2315_v1 = vld [vmem:[%s4143_s2] sm:$0x1]  ;;  %v19_v3 = vld [vmem:[%s4141_s0 + $0x8] sm:$0xff]  ;;  %v2358_v12 = vld [vmem:[%s4142_s1 + $0x10] sm:$0xff] }
   0x2   :  { %v18_v2 = vld [vmem:[%s4141_s0] sm:$0xff]  ;;  %v2323_v4 = vshrl.u32 %v15_v0, 7  ;;  %v2333_v6 = vld [vmem:[%s4142_s1 + $0xe8] sm:$0xff]  ;;  %vm271_vm0 = vcmp.eq.s32.totalorder %v2315_v1, 2  ;;  %v2369_v15 = vld [vmem:[%s4142_s1 + $0x18] sm:$0xff] }
   0x3   :  { %v2328_v5 = vld [vmem:[%s4142_s1 + $0xe0] sm:$0xff]  ;;  %v2340_v8 = vadd.f32 %v2333_v6, %v19_v3  ;;  %v2350_v10 = vld [vmem:[%s4142_s1 + $0x8] sm:$0xff]  ;;  %v2386_v21 = vsel %vm271_vm0, 1, %v4145_v20  ;;  %v2402_v26 = vld [vmem:[%s4142_s1 + $0x30] sm:$0xff] }
   0x4   :  { %4229 = vst [vmem:[#allocation3_spill] sm:$0xff] %v2323_v4  ;;  %v2337_v7 = vadd.f32 %v2328_v5, %v18_v2  ;;  %v2345_v9 = vld [vmem:[%s4142_s1] sm:$0xff]  ;;  %v2353_v11 = vsub.s32 0, %v2323_v4  ;;  %v2361_v13 = vsub.s32 1, %v2323_v4  ;;  %v2364_v14 = vsub.s32 2, %v2323_v4  ;;  %v2395_v24 = vld [vmem:[%s4142_s1 + $0x28] sm:$0xff] }
   0x5   :  { %v2374_v16 = vld [vmem:[%s4142_s1 + $0x20] sm:$0xff]  ;;  %v2377_v17 = vsub.s32 3, %v2323_v4  ;;  %v2380_v18 = vsub.s32 4, %v2323_v4  ;;  %v2383_v19 = vsub.s32 5, %v2323_v4  ;;  %4231 = vst [vmem:[#allocation5_spill] sm:$0xff] %v2395_v24  ;;  %4232 = vst [vmem:[#allocation6_spill] sm:$0xff] %v2402_v26 }
   0x6   :  { %4230 = vst [vmem:[#allocation4_spill] sm:$0xff] %v2374_v16  ;;  %v30_v22 = vrot.slane %v2337_v7, %v2353_v11  ;;  %v39_v23 = vrot.slane %v2337_v7, %v2361_v13  ;;  %v54_v25 = vrot.slane %v2337_v7, %v2364_v14  ;;  %v2407_v27 = vld [vmem:[%s4142_s1 + $0x38] sm:$0xff]  ;;  %v2410_v28 = vsub.s32 6, %v2323_v4  ;;  %v2417_v30 = vld [vmem:[%s4142_s1 + $0x40] sm:$0xff]  ;;  %v2422_v31 = vld [vmem:[%s4142_s1 + $0x48] sm:$0xff] }
   0x7   :  { %4233 = vst [vmem:[#allocation7_spill] sm:$0xff] %v2407_v27  ;;  %v69_v29 = vrot.slane %v2337_v7, %v2377_v17  ;;  %4234 = vst [vmem:[#allocation8_spill] sm:$0xff] %v2422_v31  ;;  %v84_v32 = vrot.slane %v2337_v7, %v2380_v18  ;;  %v99_v33 = vrot.slane %v2337_v7, %v2383_v19  ;;  %v2429_v34 = vsub.s32 7, %v2323_v4  ;;  %v2442_v43 = vld [vmem:[%s4142_s1 + $0x50] sm:$0xff]  ;;  %v2447_v44 = vld [vmem:[%s4142_s1 + $0x58] sm:$0xff] }
   0x8   :  { %v31_v35 = vadd.f32 %v30_v22, %v2345_v9  ;;  %v32_v36 = vadd.f32 %v30_v22, %v2350_v10  ;;  %v40_v37 = vadd.f32 %v2358_v12, %v39_v23  ;;  %v41_v38 = vadd.f32 %v2369_v15, %v39_v23  ;;  %4235 = vst [vmem:[#allocation9_spill] sm:$0xff] %v2447_v44  ;;  %v2458_v57 = vld [vmem:[%s4142_s1 + $0x60] sm:$0xff]  ;;  %v2463_v58 = vld [vmem:[%s4142_s1 + $0x68] sm:$0xff]  ;;  %v2472_v2 = vld [vmem:[%s4142_s1 + $0x70] sm:$0xff] }
   0x9   :  { %v55_v39 = vadd.f32 %v2374_v16, %v54_v25  ;;  %v56_v40 = vadd.f32 %v2395_v24, %v54_v25  ;;  %v70_v41 = vadd.f32 %v2402_v26, %v69_v29  ;;  %v71_v42 = vadd.f32 %v2407_v27, %v69_v29  ;;  %v2477_v3 = vld [vmem:[%s4142_s1 + $0x78] sm:$0xff] }
   0xa   :  { %vm42_vm1 = vcmp.gt.f32.partialorder %v40_v37, %v31_v35  ;;  %vm43_vm2 = vcmp.gt.f32.partialorder %v41_v38, %v32_v36  ;;  %v85_v45 = vadd.f32 %v2417_v30, %v84_v32  ;;  %v86_v46 = vadd.f32 %v2422_v31, %v84_v32 }
   0xb   :  { %v44_v47 = vsel %vm42_vm1, %v40_v37, %v31_v35  ;;  %v45_v48 = vsel %vm43_vm2, %v41_v38, %v32_v36  ;;  %v46_v49 = vsel %vm42_vm1, 1, %v4145_v20  ;;  %v47_v50 = vsel %vm43_vm2, 1, %v4145_v20 }
   0xc   :  { %vm57_vm3 = vcmp.gt.f32.partialorder %v55_v39, %v44_v47  ;;  %vm58_vm4 = vcmp.gt.f32.partialorder %v56_v40, %v45_v48  ;;  %v100_v51 = vadd.f32 %v2442_v43, %v99_v33  ;;  %v101_v52 = vadd.f32 %v2447_v44, %v99_v33 }
   0xd   :  { %v59_v53 = vsel %vm57_vm3, %v55_v39, %v44_v47  ;;  %v60_v54 = vsel %vm58_vm4, %v56_v40, %v45_v48  ;;  %v61_v55 = vsel %vm57_vm3, 2, %v46_v49  ;;  %v62_v56 = vsel %vm58_vm4, 2, %v47_v50 }
   0xe   :  { %vm72_vm5 = vcmp.gt.f32.partialorder %v70_v41, %v59_v53  ;;  %vm73_vm6 = vcmp.gt.f32.partialorder %v71_v42, %v60_v54  ;;  %v114_v59 = vrot.slane %v2337_v7, %v2410_v28  ;;  %v129_v60 = vrot.slane %v2337_v7, %v2429_v34 }
   0xf   :  { %v74_v61 = vsel %vm72_vm5, %v70_v41, %v59_v53  ;;  %v75_v62 = vsel %vm73_vm6, %v71_v42, %v60_v54  ;;  %v76_v63 = vsel %vm72_vm5, 3, %v61_v55  ;;  %v77_v0 = vsel %vm73_vm6, 3, %v62_v56  ;;  %v2486_v41 = vld [vmem:[%s4142_s1 + $0x80] sm:$0xff]  ;;  %v2491_v42 = vld [vmem:[%s4142_s1 + $0x88] sm:$0xff] }
  0x10   :  { %vm87_vm7 = vcmp.gt.f32.partialorder %v85_v45, %v74_v61  ;;  %vm88_vm8 = vcmp.gt.f32.partialorder %v86_v46, %v75_v62  ;;  %v115_v22 = vadd.f32 %v2458_v57, %v114_v59  ;;  %v116_v23 = vadd.f32 %v2463_v58, %v114_v59 }
  0x11   :  { %v89_v25 = vsel %vm87_vm7, %v85_v45, %v74_v61  ;;  %v90_v29 = vsel %vm88_vm8, %v86_v46, %v75_v62  ;;  %v91_v32 = vsel %vm87_vm7, 4, %v76_v63  ;;  %v92_v33 = vsel %vm88_vm8, 4, %v77_v0  ;;  %v2514_v63 = vld [vmem:[%s4142_s1 + $0xa0] sm:$0xff] }
  0x12   :  { %vm102_vm9 = vcmp.gt.f32.partialorder %v100_v51, %v89_v25  ;;  %vm103_vm10 = vcmp.gt.f32.partialorder %v101_v52, %v90_v29  ;;  %v130_v35 = vadd.f32 %v2472_v2, %v129_v60  ;;  %v131_v36 = vadd.f32 %v2477_v3, %v129_v60 }
  0x13   :  { %v104_v37 = vsel %vm102_vm9, %v100_v51, %v89_v25  ;;  %v105_v38 = vsel %vm103_vm10, %v101_v52, %v90_v29  ;;  %v106_v39 = vsel %vm102_vm9, 5, %v91_v32  ;;  %v107_v40 = vsel %vm103_vm10, 5, %v92_v33  ;;  %v2500_v51 = vld [vmem:[%s4142_s1 + $0x90] sm:$0xff]  ;;  %v2505_v52 = vld [vmem:[%s4142_s1 + $0x98] sm:$0xff]  ;;  %v2519_v29 = vld [vmem:[%s4142_s1 + $0xa8] sm:$0xff] }
  0x14   :  { %vm117_vm11 = vcmp.gt.f32.partialorder %v115_v22, %v104_v37  ;;  %vm118_vm12 = vcmp.gt.f32.partialorder %v116_v23, %v105_v38  ;;  %v144_v45 = vrot.slane %v2340_v8, %v2353_v11  ;;  %v159_v46 = vrot.slane %v2340_v8, %v2361_v13  ;;  %v2524_v32 = vld [vmem:[%s4142_s1 + $0xb0] sm:$0xff]  ;;  %v2529_v33 = vld [vmem:[%s4142_s1 + $0xb8] sm:$0xff] }
  0x15   :  { %v119_v47 = vsel %vm117_vm11, %v115_v22, %v104_v37  ;;  %v120_v48 = vsel %vm118_vm12, %v116_v23, %v105_v38  ;;  %v121_v49 = vsel %vm117_vm11, 6, %v106_v39  ;;  %v122_v50 = vsel %vm118_vm12, 6, %v107_v40  ;;  %4236 = vst [vmem:[#allocation10_spill] sm:$0xff] %v2524_v32  ;;  %4237 = vst [vmem:[#allocation11_spill] sm:$0xff] %v2529_v33 }
  0x16   :  { %vm132_vm13 = vcmp.gt.f32.partialorder %v130_v35, %v119_v47  ;;  %vm133_vm14 = vcmp.gt.f32.partialorder %v131_v36, %v120_v48  ;;  %v145_v53 = vadd.f32 %v2486_v41, %v144_v45  ;;  %v146_v54 = vadd.f32 %v2491_v42, %v144_v45 }
  0x17   :  { %v134_v55 = vsel %vm132_vm13, %v130_v35, %v119_v47  ;;  %v135_v56 = vsel %vm133_vm14, %v131_v36, %v120_v48  ;;  %v136_v59 = vsel %vm132_vm13, 7, %v121_v49  ;;  %v137_v60 = vsel %vm133_vm14, 7, %v122_v50  ;;  %v2542_v49 = vld [vmem:[%s4142_s1 + $0xc0] sm:$0xff]  ;;  %v2547_v50 = vld [vmem:[%s4142_s1 + $0xc8] sm:$0xff] }
  0x18   :  { %vm147_vm15 = vcmp.gt.f32.partialorder %v145_v53, %v134_v55  ;;  %vm148_vm0 = vcmp.gt.f32.partialorder %v146_v54, %v135_v56  ;;  %v160_v61 = vadd.f32 %v2500_v51, %v159_v46  ;;  %v161_v62 = vadd.f32 %v2505_v52, %v159_v46  ;;  %4238 = vst [vmem:[#allocation12_spill] sm:$0xff] %v2542_v49 }
  0x19   :  { %v149_v0 = vsel %vm147_vm15, %v145_v53, %v134_v55  ;;  %v150_v22 = vsel %vm148_vm0, %v146_v54, %v135_v56  ;;  %v151_v23 = vsel %vm147_vm15, 8, %v136_v59  ;;  %v152_v25 = vsel %vm148_vm0, 8, %v137_v60 }
  0x1a   :  { %vm162_vm1 = vcmp.gt.f32.partialorder %v160_v61, %v149_v0  ;;  %vm163_vm2 = vcmp.gt.f32.partialorder %v161_v62, %v150_v22  ;;  %v174_v35 = vrot.slane %v2340_v8, %v2364_v14  ;;  %v189_v36 = vrot.slane %v2340_v8, %v2377_v17 }
  0x1b   :  { %v164_v37 = vsel %vm162_vm1, %v160_v61, %v149_v0  ;;  %v165_v38 = vsel %vm163_vm2, %v161_v62, %v150_v22  ;;  %v166_v39 = vsel %vm162_vm1, 9, %v151_v23  ;;  %v167_v40 = vsel %vm163_vm2, 9, %v152_v25  ;;  %v2562_v22 = vld [vmem:[%s4142_s1 + $0xd0] sm:$0xff]  ;;  %v2567_v23 = vld [vmem:[%s4142_s1 + $0xd8] sm:$0xff] }
  0x1c   :  { %v175_v45 = vadd.f32 %v2514_v63, %v174_v35  ;;  %v176_v46 = vadd.f32 %v2519_v29, %v174_v35  ;;  %v190_v47 = vadd.f32 %v2524_v32, %v189_v36  ;;  %v191_v48 = vadd.f32 %v2529_v33, %v189_v36 }
  0x1d   :  { %v204_v53 = vrot.slane %v2340_v8, %v2380_v18  ;;  %v219_v54 = vrot.slane %v2340_v8, %v2383_v19  ;;  %v231_v55 = vrot.slane %v2340_v8, %v2410_v28  ;;  %v246_v56 = vrot.slane %v2340_v8, %v2429_v34 }
  0x1e   :  { %vm177_vm3 = vcmp.gt.f32.partialorder %v175_v45, %v164_v37  ;;  %vm178_vm4 = vcmp.gt.f32.partialorder %v176_v46, %v165_v38  ;;  %v276_v59 = vrot.slane %v2386_v21, %v2353_v11 }
  0x1f   :  { %v179_v60 = vsel %vm177_vm3, %v175_v45, %v164_v37  ;;  %v180_v61 = vsel %vm178_vm4, %v176_v46, %v165_v38  ;;  %v181_v62 = vsel %vm177_vm3, 10, %v166_v39  ;;  %v182_v0 = vsel %vm178_vm4, 10, %v167_v40 }
  0x20   :  { %vm192_vm5 = vcmp.gt.f32.partialorder %v190_v47, %v179_v60  ;;  %vm193_vm6 = vcmp.gt.f32.partialorder %v191_v48, %v180_v61  ;;  %v205_v25 = vadd.f32 %v2542_v49, %v204_v53  ;;  %v206_v21 = vadd.f32 %v2547_v50, %v204_v53  ;;  %v2576_v49 = vld [vmem:[%s4142_s1 + $0xf0] sm:$0xff] }
  0x21   :  { %v194_v35 = vsel %vm192_vm5, %v190_v47, %v179_v60  ;;  %v195_v36 = vsel %vm193_vm6, %v191_v48, %v180_v61  ;;  %v196_v37 = vsel %vm192_vm5, 11, %v181_v62  ;;  %v197_v38 = vsel %vm193_vm6, 11, %v182_v0  ;;  %v2581_v47 = vld [vmem:[%s4142_s1 + $0xf8] sm:$0xff] }
  0x22   :  { %vm207_vm7 = vcmp.gt.f32.partialorder %v205_v25, %v194_v35  ;;  %vm208_vm8 = vcmp.gt.f32.partialorder %v206_v21, %v195_v36  ;;  %v220_v39 = vadd.f32 %v2562_v22, %v219_v54  ;;  %v221_v40 = vadd.f32 %v2567_v23, %v219_v54 }
  0x23   :  { %v209_v45 = vsel %vm207_vm7, %v205_v25, %v194_v35  ;;  %v210_v46 = vsel %vm208_vm8, %v206_v21, %v195_v36  ;;  %v211_v20 = vsel %vm207_vm7, 12, %v196_v37  ;;  %v212_v4 = vsel %vm208_vm8, 12, %v197_v38  ;;  %v2079_v38 = vld [vmem:[%s4141_s0 + $0x10] sm:$0xff] }
  0x24   :  { %vm222_vm9 = vcmp.gt.f32.partialorder %v220_v39, %v209_v45  ;;  %vm223_vm10 = vcmp.gt.f32.partialorder %v221_v40, %v210_v46  ;;  %v232_v48 = vadd.f32 %v2328_v5, %v231_v55  ;;  %v233_v53 = vadd.f32 %v2333_v6, %v231_v55  ;;  %v2080_v55 = vld [vmem:[%s4141_s0 + $0x18] sm:$0xff] }
  0x25   :  { %v224_v54 = vsel %vm222_vm9, %v220_v39, %v209_v45  ;;  %v225_v60 = vsel %vm223_vm10, %v221_v40, %v210_v46  ;;  %v226_v61 = vsel %vm222_vm9, 13, %v211_v20  ;;  %v227_v62 = vsel %vm223_vm10, 13, %v212_v4 }
  0x26   :  { %vm234_vm11 = vcmp.gt.f32.partialorder %v232_v48, %v224_v54  ;;  %vm235_vm12 = vcmp.gt.f32.partialorder %v233_v53, %v225_v60  ;;  %v247_v0 = vadd.f32 %v2576_v49, %v246_v56  ;;  %v248_v25 = vadd.f32 %v2581_v47, %v246_v56 }
  0x27   :  { %v236_v21 = vsel %vm234_vm11, %v232_v48, %v224_v54  ;;  %v237_v35 = vsel %vm235_vm12, %v233_v53, %v225_v60  ;;  %v238_v36 = vsel %vm234_vm11, 14, %v226_v61  ;;  %v239_v37 = vsel %vm235_vm12, 14, %v227_v62 }
  0x28   :  { %vm249_vm13 = vcmp.gt.f32.partialorder %v247_v0, %v236_v21  ;;  %vm250_vm14 = vcmp.gt.f32.partialorder %v248_v25, %v237_v35  ;;  %vm2593_vm15 = vcmp.eq.s32.totalorder %v276_v59, 1  ;;  %v4239_v4 = vmov 0 }
  0x29   :  { %v4240_v4 = vsel %vm2593_vm15, 4294967295, %v4239_v4  ;;  %v251_v20 = vsel %vm249_vm13, %v247_v0, %v236_v21  ;;  %v252_v56 = vsel %vm250_vm14, %v248_v25, %v237_v35  ;;  %v2597_v39 = vsel %vm249_vm13, 15, %v238_v36 }
  0x2a   :  { %4241 = vst [vmem:[#allocation13_spill] sm:$0xff] %v4240_v4  ;;  %4242 = vst [vmem:[#allocation14_spill] sm:$0xff] %v2597_v39  ;;  %v2599_v40 = vsel %vm250_vm14, 15, %v239_v37  ;;  %v2601_v45 = vadd.f32 %v2079_v38, %v251_v20  ;;  %v2603_v46 = vadd.f32 %v2080_v55, %v252_v56  ;;  %vm515_vm10 = vcmp.eq.s32.totalorder %v2315_v1, 3 }
  0x2b   :  { %4243 = vst [vmem:[#allocation15_spill] sm:$0xff] %v2599_v40  ;;  %v4244_v40 = vmov 0  }
  0x2c   :  { %v285_v53 = vrot.slane %v2601_v45, %v2353_v11  ;;  %v293_v54 = vrot.slane %v2601_v45, %v2361_v13  ;;  %v307_v60 = vrot.slane %v2601_v45, %v2364_v14  ;;  %v321_v61 = vrot.slane %v2601_v45, %v2377_v17 }
  0x2d   :  { %v335_v62 = vrot.slane %v2601_v45, %v2380_v18  ;;  %v349_v0 = vrot.slane %v2601_v45, %v2383_v19 }
  0x2e   :  { %v286_v25 = vadd.f32 %v285_v53, %v2345_v9  ;;  %v287_v21 = vadd.f32 %v285_v53, %v2350_v10  ;;  %v294_v35 = vadd.f32 %v2358_v12, %v293_v54  ;;  %v295_v36 = vadd.f32 %v2369_v15, %v293_v54 }
  0x2f   :  { %v308_v37 = vadd.f32 %v2374_v16, %v307_v60  ;;  %v309_v38 = vadd.f32 %v2395_v24, %v307_v60  ;;  %v322_v55 = vadd.f32 %v2402_v26, %v321_v61  ;;  %v323_v20 = vadd.f32 %v2407_v27, %v321_v61 }
  0x30   :  { %vm296_vm0 = vcmp.gt.f32.partialorder %v294_v35, %v286_v25  ;;  %vm297_vm1 = vcmp.gt.f32.partialorder %v295_v36, %v287_v21  ;;  %v336_v56 = vadd.f32 %v2417_v30, %v335_v62  ;;  %v337_v59 = vadd.f32 %v2422_v31, %v335_v62 }
  0x31   :  { %v298_v48 = vsel %vm296_vm0, %v294_v35, %v286_v25  ;;  %v299_v53 = vsel %vm297_vm1, %v295_v36, %v287_v21  ;;  %v300_v39 = vsel %vm296_vm0, 1, %v4244_v40  ;;  %v301_v54 = vsel %vm297_vm1, 1, %v4244_v40 }
  0x32   :  { %vm310_vm2 = vcmp.gt.f32.partialorder %v308_v37, %v298_v48  ;;  %vm311_vm3 = vcmp.gt.f32.partialorder %v309_v38, %v299_v53  ;;  %v350_v60 = vadd.f32 %v2442_v43, %v349_v0  ;;  %v351_v26 = vadd.f32 %v2447_v44, %v349_v0 }
  0x33   :  { %v312_v24 = vsel %vm310_vm2, %v308_v37, %v298_v48  ;;  %v313_v61 = vsel %vm311_vm3, %v309_v38, %v299_v53  ;;  %v314_v27 = vsel %vm310_vm2, 2, %v300_v39  ;;  %v315_v16 = vsel %vm311_vm3, 2, %v301_v54 }
  0x34   :  { %vm324_vm4 = vcmp.gt.f32.partialorder %v322_v55, %v312_v24  ;;  %vm325_vm5 = vcmp.gt.f32.partialorder %v323_v20, %v313_v61  ;;  %v363_v62 = vrot.slane %v2601_v45, %v2410_v28  ;;  %v377_v25 = vrot.slane %v2601_v45, %v2429_v34 }
  0x35   :  { %v326_v21 = vsel %vm324_vm4, %v322_v55, %v312_v24  ;;  %v327_v35 = vsel %vm325_vm5, %v323_v20, %v313_v61  ;;  %v328_v36 = vsel %vm324_vm4, 3, %v314_v27  ;;  %v329_v31 = vsel %vm325_vm5, 3, %v315_v16 }
  0x36   :  { %vm338_vm6 = vcmp.gt.f32.partialorder %v336_v56, %v326_v21  ;;  %vm339_vm7 = vcmp.gt.f32.partialorder %v337_v59, %v327_v35  ;;  %v364_v0 = vadd.f32 %v2458_v57, %v363_v62  ;;  %v365_v48 = vadd.f32 %v2463_v58, %v363_v62 }
  0x37   :  { %v340_v39 = vsel %vm338_vm6, %v336_v56, %v326_v21  ;;  %v341_v37 = vsel %vm339_vm7, %v337_v59, %v327_v35  ;;  %v342_v38 = vsel %vm338_vm6, 4, %v328_v36  ;;  %v343_v53 = vsel %vm339_vm7, 4, %v329_v31 }
  0x38   :  { %vm352_vm8 = vcmp.gt.f32.partialorder %v350_v60, %v340_v39  ;;  %vm353_vm9 = vcmp.gt.f32.partialorder %v351_v26, %v341_v37  ;;  %v378_v54 = vadd.f32 %v2472_v2, %v377_v25  ;;  %v379_v44 = vadd.f32 %v2477_v3, %v377_v25 }
  0x39   :  { %v354_v24 = vsel %vm352_vm8, %v350_v60, %v340_v39  ;;  %v355_v55 = vsel %vm353_vm9, %v351_v26, %v341_v37  ;;  %v356_v27 = vsel %vm352_vm8, 5, %v342_v38  ;;  %v357_v16 = vsel %vm353_vm9, 5, %v343_v53 }
  0x3a   :  { %vm366_vm11 = vcmp.gt.f32.partialorder %v364_v0, %v354_v24  ;;  %vm367_vm12 = vcmp.gt.f32.partialorder %v365_v48, %v355_v55  ;;  %v391_v20 = vrot.slane %v2603_v46, %v2353_v11  ;;  %v405_v31 = vrot.slane %v2603_v46, %v2361_v13 }
  0x3b   :  { %v368_v59 = vsel %vm366_vm11, %v364_v0, %v354_v24  ;;  %v369_v56 = vsel %vm367_vm12, %v365_v48, %v355_v55  ;;  %v370_v61 = vsel %vm366_vm11, 6, %v356_v27  ;;  %v371_v62 = vsel %vm367_vm12, 6, %v357_v16 }
  0x3c   :  { %vm380_vm13 = vcmp.gt.f32.partialorder %v378_v54, %v368_v59  ;;  %vm381_vm14 = vcmp.gt.f32.partialorder %v379_v44, %v369_v56  ;;  %v392_v26 = vadd.f32 %v2486_v41, %v391_v20  ;;  %v393_v60 = vadd.f32 %v2491_v42, %v391_v20 }
  0x3d   :  { %v382_v25 = vsel %vm380_vm13, %v378_v54, %v368_v59  ;;  %v383_v21 = vsel %vm381_vm14, %v379_v44, %v369_v56  ;;  %v384_v35 = vsel %vm380_vm13, 7, %v370_v61  ;;  %v385_v36 = vsel %vm381_vm14, 7, %v371_v62 }
  0x3e   :  { %vm394_vm0 = vcmp.gt.f32.partialorder %v392_v26, %v382_v25  ;;  %vm395_vm1 = vcmp.gt.f32.partialorder %v393_v60, %v383_v21  ;;  %v406_v39 = vadd.f32 %v2500_v51, %v405_v31  ;;  %v407_v37 = vadd.f32 %v2505_v52, %v405_v31 }
  0x3f   :  { %v396_v0 = vsel %vm394_vm0, %v392_v26, %v382_v25  ;;  %v397_v48 = vsel %vm395_vm1, %v393_v60, %v383_v21  ;;  %v398_v38 = vsel %vm394_vm0, 8, %v384_v35  ;;  %v399_v53 = vsel %vm395_vm1, 8, %v385_v36 }
  0x40   :  { %vm408_vm2 = vcmp.gt.f32.partialorder %v406_v39, %v396_v0  ;;  %vm409_vm3 = vcmp.gt.f32.partialorder %v407_v37, %v397_v48  ;;  %v419_v24 = vrot.slane %v2603_v46, %v2364_v14  ;;  %v433_v44 = vrot.slane %v2603_v46, %v2377_v17 }
  0x41   :  { %v410_v54 = vsel %vm408_vm2, %v406_v39, %v396_v0  ;;  %v411_v55 = vsel %vm409_vm3, %v407_v37, %v397_v48  ;;  %v412_v27 = vsel %vm408_vm2, 9, %v398_v38  ;;  %v413_v16 = vsel %vm409_vm3, 9, %v399_v53  ;;  %v4245_v37 = vld [vmem:[#allocation12_spill] sm:$0xff] }
  0x42   :  { %v420_v20 = vadd.f32 %v2514_v63, %v419_v24  ;;  %v421_v31 = vadd.f32 %v2519_v29, %v419_v24  ;;  %v434_v59 = vadd.f32 %v2524_v32, %v433_v44  ;;  %v435_v56 = vadd.f32 %v2529_v33, %v433_v44 }
  0x43   :  { %v447_v61 = vrot.slane %v2603_v46, %v2380_v18  ;;  %v461_v62 = vrot.slane %v2603_v46, %v2383_v19  ;;  %v475_v26 = vrot.slane %v2603_v46, %v2410_v28  ;;  %v489_v60 = vrot.slane %v2603_v46, %v2429_v34 }
  0x44   :  { %vm422_vm4 = vcmp.gt.f32.partialorder %v420_v20, %v410_v54  ;;  %vm423_vm5 = vcmp.gt.f32.partialorder %v421_v31, %v411_v55  ;;  %v516_v25 = vsel %vm515_vm10, 1, %v4244_v40  ;;  %vm759_vm1 = vcmp.eq.s32.totalorder %v2315_v1, 4 }
  0x45   :  { %v424_v21 = vsel %vm422_vm4, %v420_v20, %v410_v54  ;;  %v425_v35 = vsel %vm423_vm5, %v421_v31, %v411_v55  ;;  %v426_v36 = vsel %vm422_vm4, 10, %v412_v27  ;;  %v427_v39 = vsel %vm423_vm5, 10, %v413_v16 }
  0x46   :  { %vm436_vm6 = vcmp.gt.f32.partialorder %v434_v59, %v424_v21  ;;  %vm437_vm7 = vcmp.gt.f32.partialorder %v435_v56, %v425_v35  ;;  %v448_v0 = vadd.f32 %v4245_v37, %v447_v61  ;;  %v449_v48 = vadd.f32 %v2547_v50, %v447_v61 }
  0x47   :  { %v438_v38 = vsel %vm436_vm6, %v434_v59, %v424_v21  ;;  %v439_v53 = vsel %vm437_vm7, %v435_v56, %v425_v35  ;;  %v440_v24 = vsel %vm436_vm6, 11, %v426_v36  ;;  %v441_v44 = vsel %vm437_vm7, 11, %v427_v39 }
  0x48   :  { %vm450_vm8 = vcmp.gt.f32.partialorder %v448_v0, %v438_v38  ;;  %vm451_vm9 = vcmp.gt.f32.partialorder %v449_v48, %v439_v53  ;;  %v462_v33 = vadd.f32 %v2562_v22, %v461_v62  ;;  %v463_v32 = vadd.f32 %v2567_v23, %v461_v62 }
  0x49   :  { %v452_v54 = vsel %vm450_vm8, %v448_v0, %v438_v38  ;;  %v453_v55 = vsel %vm451_vm9, %v449_v48, %v439_v53  ;;  %v454_v27 = vsel %vm450_vm8, 12, %v440_v24  ;;  %v455_v16 = vsel %vm451_vm9, 12, %v441_v44 }
  0x4a   :  { %vm464_vm10 = vcmp.gt.f32.partialorder %v462_v33, %v452_v54  ;;  %vm465_vm11 = vcmp.gt.f32.partialorder %v463_v32, %v453_v55  ;;  %v476_v20 = vadd.f32 %v2328_v5, %v475_v26  ;;  %v477_v31 = vadd.f32 %v2333_v6, %v475_v26  ;;  %v2111_v5 = vld [vmem:[%s4141_s0 + $0x20] sm:$0xff]  ;;  %v2112_v6 = vld [vmem:[%s4141_s0 + $0x28] sm:$0xff] }
  0x4b   :  { %v466_v59 = vsel %vm464_vm10, %v462_v33, %v452_v54  ;;  %v467_v56 = vsel %vm465_vm11, %v463_v32, %v453_v55  ;;  %v468_v61 = vsel %vm464_vm10, 13, %v454_v27  ;;  %v469_v21 = vsel %vm465_vm11, 13, %v455_v16 }
  0x4c   :  { %vm478_vm12 = vcmp.gt.f32.partialorder %v476_v20, %v466_v59  ;;  %vm479_vm13 = vcmp.gt.f32.partialorder %v477_v31, %v467_v56  ;;  %v490_v35 = vadd.f32 %v2576_v49, %v489_v60  ;;  %v491_v62 = vadd.f32 %v2581_v47, %v489_v60 }
  0x4d   :  { %v480_v36 = vsel %vm478_vm12, %v476_v20, %v466_v59  ;;  %v481_v39 = vsel %vm479_vm13, %v477_v31, %v467_v56  ;;  %v482_v0 = vsel %vm478_vm12, 14, %v468_v61  ;;  %v483_v48 = vsel %vm479_vm13, 14, %v469_v21  ;;  %v4253_v21 = vld [vmem:[#allocation4_spill] sm:$0xff] }
  0x4e   :  { %vm492_vm14 = vcmp.gt.f32.partialorder %v490_v35, %v480_v36  ;;  %vm493_vm0 = vcmp.gt.f32.partialorder %v491_v62, %v481_v39  ;;  %v520_v32 = vrot.slane %v516_v25, %v2353_v11  ;;  %v4248_v44 = vmov 0 }
  0x4f   :  { %v494_v33 = vsel %vm492_vm14, %v490_v35, %v480_v36  ;;  %v495_v26 = vsel %vm493_vm0, %v491_v62, %v481_v39  ;;  %v2691_v60 = vsel %vm492_vm14, 15, %v482_v0  ;;  %v2693_v38 = vsel %vm493_vm0, 15, %v483_v48  ;;  %v4254_v62 = vld [vmem:[#allocation5_spill] sm:$0xff]  ;;  %v4255_v39 = vld [vmem:[#allocation6_spill] sm:$0xff]  ;;  %v4256_v48 = vld [vmem:[#allocation7_spill] sm:$0xff] }
  0x50   :  { %4246 = vst [vmem:[#allocation12_spill] sm:$0xff] %v2691_v60  ;;  %4247 = vst [vmem:[#allocation16_spill] sm:$0xff] %v2693_v38  ;;  %v513_v53 = vadd.f32 %v2111_v5, %v494_v33  ;;  %v2695_v24 = vadd.f32 %v2112_v6, %v495_v26  ;;  %vm2697_vm2 = vcmp.eq.s32.totalorder %v520_v32, 1  ;;  %v2702_v54 = vsel %vm759_vm1, 1, %v4244_v40  ;;  %v4257_v32 = vld [vmem:[#allocation8_spill] sm:$0xff] }
  0x51   :  { %v4249_v44 = vsel %vm2697_vm2, 4294967295, %v4248_v44  ;;  %v4251_v1 = vsel %vm2593_vm15, %v2601_v45, %v2337_v7  ;;  %v4252_v55 = vsel %vm2593_vm15, %v2603_v46, %v2340_v8 }
  0x52   :  { %4250 = vst [vmem:[#allocation17_spill] sm:$0xff] %v4249_v44  ;;  %v2711_v25 = vsel %vm2697_vm2, %v513_v53, %v4251_v1  ;;  %v2721_v27 = vsel %vm2697_vm2, %v2695_v24, %v4252_v55  ;;  %v529_v16 = vrot.slane %v513_v53, %v2353_v11  ;;  %v537_v20 = vrot.slane %v513_v53, %v2361_v13  ;;  %v4258_v1 = vld [vmem:[#allocation9_spill] sm:$0xff] }
  0x53   :  { %v551_v7 = vrot.slane %v513_v53, %v2364_v14  ;;  %v565_v45 = vrot.slane %v513_v53, %v2377_v17  ;;  %v579_v31 = vrot.slane %v513_v53, %v2380_v18  ;;  %v593_v59 = vrot.slane %v513_v53, %v2383_v19 }
  0x54   :  { %v530_v56 = vadd.f32 %v529_v16, %v2345_v9  ;;  %v531_v8 = vadd.f32 %v529_v16, %v2350_v10  ;;  %v538_v46 = vadd.f32 %v2358_v12, %v537_v20  ;;  %v539_v61 = vadd.f32 %v2369_v15, %v537_v20 }
  0x55   :  { %v552_v35 = vadd.f32 %v4253_v21, %v551_v7  ;;  %v553_v36 = vadd.f32 %v4254_v62, %v551_v7  ;;  %v566_v0 = vadd.f32 %v4255_v39, %v565_v45  ;;  %v567_v5 = vadd.f32 %v4256_v48, %v565_v45 }
  0x56   :  { %vm540_vm3 = vcmp.gt.f32.partialorder %v538_v46, %v530_v56  ;;  %vm541_vm4 = vcmp.gt.f32.partialorder %v539_v61, %v531_v8  ;;  %v580_v6 = vadd.f32 %v2417_v30, %v579_v31  ;;  %v581_v9 = vadd.f32 %v4257_v32, %v579_v31 }
  0x57   :  { %v542_v33 = vsel %vm540_vm3, %v538_v46, %v530_v56  ;;  %v543_v10 = vsel %vm541_vm4, %v539_v61, %v531_v8  ;;  %v544_v12 = vsel %vm540_vm3, 1, %v4244_v40  ;;  %v545_v15 = vsel %vm541_vm4, 1, %v4244_v40 }
  0x58   :  { %vm554_vm5 = vcmp.gt.f32.partialorder %v552_v35, %v542_v33  ;;  %vm555_vm6 = vcmp.gt.f32.partialorder %v553_v36, %v543_v10  ;;  %v594_v26 = vadd.f32 %v2442_v43, %v593_v59  ;;  %v595_v55 = vadd.f32 %v4258_v1, %v593_v59 }
  0x59   :  { %v556_v16 = vsel %vm554_vm5, %v552_v35, %v542_v33  ;;  %v557_v20 = vsel %vm555_vm6, %v553_v36, %v543_v10  ;;  %v558_v7 = vsel %vm554_vm5, 2, %v544_v12  ;;  %v559_v45 = vsel %vm555_vm6, 2, %v545_v15 }
  0x5a   :  { %vm568_vm7 = vcmp.gt.f32.partialorder %v566_v0, %v556_v16  ;;  %vm569_vm8 = vcmp.gt.f32.partialorder %v567_v5, %v557_v20  ;;  %v607_v30 = vrot.slane %v513_v53, %v2410_v28  ;;  %v621_v31 = vrot.slane %v513_v53, %v2429_v34 }
  0x5b   :  { %v570_v56 = vsel %vm568_vm7, %v566_v0, %v556_v16  ;;  %v571_v8 = vsel %vm569_vm8, %v567_v5, %v557_v20  ;;  %v572_v46 = vsel %vm568_vm7, 3, %v558_v7  ;;  %v573_v61 = vsel %vm569_vm8, 3, %v559_v45 }
  0x5c   :  { %vm582_vm9 = vcmp.gt.f32.partialorder %v580_v6, %v570_v56  ;;  %vm583_vm10 = vcmp.gt.f32.partialorder %v581_v9, %v571_v8  ;;  %v608_v43 = vadd.f32 %v2458_v57, %v607_v30  ;;  %v609_v59 = vadd.f32 %v2463_v58, %v607_v30 }
  0x5d   :  { %v584_v21 = vsel %vm582_vm9, %v580_v6, %v570_v56  ;;  %v585_v35 = vsel %vm583_vm10, %v581_v9, %v571_v8  ;;  %v586_v62 = vsel %vm582_vm9, 4, %v572_v46  ;;  %v587_v36 = vsel %vm583_vm10, 4, %v573_v61  ;;  %v4259_v61 = vld [vmem:[#allocation10_spill] sm:$0xff] }
  0x5e   :  { %vm596_vm11 = vcmp.gt.f32.partialorder %v594_v26, %v584_v21  ;;  %vm597_vm12 = vcmp.gt.f32.partialorder %v595_v55, %v585_v35  ;;  %v622_v39 = vadd.f32 %v2472_v2, %v621_v31  ;;  %v623_v53 = vadd.f32 %v2477_v3, %v621_v31 }
  0x5f   :  { %v598_v0 = vsel %vm596_vm11, %v594_v26, %v584_v21  ;;  %v599_v48 = vsel %vm597_vm12, %v595_v55, %v585_v35  ;;  %v600_v5 = vsel %vm596_vm11, 5, %v586_v62  ;;  %v601_v32 = vsel %vm597_vm12, 5, %v587_v36 }
  0x60   :  { %vm610_vm13 = vcmp.gt.f32.partialorder %v608_v43, %v598_v0  ;;  %vm611_vm14 = vcmp.gt.f32.partialorder %v609_v59, %v599_v48  ;;  %v635_v57 = vrot.slane %v2695_v24, %v2353_v11  ;;  %v649_v58 = vrot.slane %v2695_v24, %v2361_v13 }
  0x61   :  { %v612_v6 = vsel %vm610_vm13, %v608_v43, %v598_v0  ;;  %v613_v9 = vsel %vm611_vm14, %v609_v59, %v599_v48  ;;  %v614_v33 = vsel %vm610_vm13, 6, %v600_v5  ;;  %v615_v10 = vsel %vm611_vm14, 6, %v601_v32  ;;  %v4260_v59 = vld [vmem:[#allocation11_spill] sm:$0xff] }
  0x62   :  { %vm624_vm0 = vcmp.gt.f32.partialorder %v622_v39, %v612_v6  ;;  %vm625_vm1 = vcmp.gt.f32.partialorder %v623_v53, %v613_v9  ;;  %v636_v2 = vadd.f32 %v2486_v41, %v635_v57  ;;  %v637_v3 = vadd.f32 %v2491_v42, %v635_v57 }
  0x63   :  { %v626_v12 = vsel %vm624_vm0, %v622_v39, %v612_v6  ;;  %v627_v15 = vsel %vm625_vm1, %v623_v53, %v613_v9  ;;  %v628_v26 = vsel %vm624_vm0, 7, %v614_v33  ;;  %v629_v1 = vsel %vm625_vm1, 7, %v615_v10 }
  0x64   :  { %vm638_vm3 = vcmp.gt.f32.partialorder %v636_v2, %v626_v12  ;;  %vm639_vm4 = vcmp.gt.f32.partialorder %v637_v3, %v627_v15  ;;  %v650_v55 = vadd.f32 %v2500_v51, %v649_v58  ;;  %v651_v16 = vadd.f32 %v2505_v52, %v649_v58 }
  0x65   :  { %v640_v20 = vsel %vm638_vm3, %v636_v2, %v626_v12  ;;  %v641_v7 = vsel %vm639_vm4, %v637_v3, %v627_v15  ;;  %v642_v45 = vsel %vm638_vm3, 8, %v628_v26  ;;  %v643_v30 = vsel %vm639_vm4, 8, %v629_v1 }
  0x66   :  { %vm652_vm5 = vcmp.gt.f32.partialorder %v650_v55, %v640_v20  ;;  %vm653_vm6 = vcmp.gt.f32.partialorder %v651_v16, %v641_v7  ;;  %v663_v41 = vrot.slane %v2695_v24, %v2364_v14  ;;  %v677_v42 = vrot.slane %v2695_v24, %v2377_v17 }
  0x67   :  { %v654_v31 = vsel %vm652_vm5, %v650_v55, %v640_v20  ;;  %v655_v56 = vsel %vm653_vm6, %v651_v16, %v641_v7  ;;  %v656_v8 = vsel %vm652_vm5, 9, %v642_v45  ;;  %v657_v46 = vsel %vm653_vm6, 9, %v643_v30 }
  0x68   :  { %v664_v51 = vadd.f32 %v2514_v63, %v663_v41  ;;  %v665_v52 = vadd.f32 %v2519_v29, %v663_v41  ;;  %v678_v43 = vadd.f32 %v4259_v61, %v677_v42  ;;  %v679_v21 = vadd.f32 %v4260_v59, %v677_v42  ;;  %v2143_v41 = vld [vmem:[%s4141_s0 + $0x30] sm:$0xff]  ;;  %v2144_v42 = vld [vmem:[%s4141_s0 + $0x38] sm:$0xff]  ;;  %v2819_v61 = vld [vmem:[%s4142_s1 + $0x8] sm:$0xff] }
  0x69   :  { %v691_v35 = vrot.slane %v2695_v24, %v2380_v18  ;;  %v705_v62 = vrot.slane %v2695_v24, %v2383_v19  ;;  %v719_v36 = vrot.slane %v2695_v24, %v2410_v28  ;;  %v733_v63 = vrot.slane %v2695_v24, %v2429_v34  ;;  %v2780_v24 = vld [vmem:[%s4142_s1 + $0xe0] sm:$0xff]  ;;  %v2829_v59 = vld [vmem:[%s4142_s1 + $0x18] sm:$0xff] }
  0x6a   :  { %vm666_vm7 = vcmp.gt.f32.partialorder %v664_v51, %v654_v31  ;;  %vm667_vm8 = vcmp.gt.f32.partialorder %v665_v52, %v655_v56  ;;  %v764_v29 = vrot.slane %v2702_v54, %v2353_v11  ;;  %v2785_v54 = vld [vmem:[%s4142_s1 + $0xe8] sm:$0xff] }
  0x6b   :  { %v668_v39 = vsel %vm666_vm7, %v664_v51, %v654_v31  ;;  %v669_v53 = vsel %vm667_vm8, %v665_v52, %v655_v56  ;;  %v670_v0 = vsel %vm666_vm7, 10, %v656_v8  ;;  %v671_v48 = vsel %vm667_vm8, 10, %v657_v46  ;;  %v2814_v52 = vld [vmem:[%s4142_s1] sm:$0xff] }
  0x6c   :  { %vm680_vm9 = vcmp.gt.f32.partialorder %v678_v43, %v668_v39  ;;  %vm681_vm10 = vcmp.gt.f32.partialorder %v679_v21, %v669_v53  ;;  %v692_v5 = vadd.f32 %v4245_v37, %v691_v35  ;;  %v693_v32 = vadd.f32 %v2547_v50, %v691_v35 }
  0x6d   :  { %v682_v57 = vsel %vm680_vm9, %v678_v43, %v668_v39  ;;  %v683_v58 = vsel %vm681_vm10, %v679_v21, %v669_v53  ;;  %v684_v6 = vsel %vm680_vm9, 11, %v670_v0  ;;  %v685_v9 = vsel %vm681_vm10, 11, %v671_v48  ;;  %v2824_v43 = vld [vmem:[%s4142_s1 + $0x10] sm:$0xff]  ;;  %v2834_v21 = vld [vmem:[%s4142_s1 + $0x20] sm:$0xff]  ;;  %v2861_v53 = vld [vmem:[%s4142_s1 + $0x38] sm:$0xff] }
  0x6e   :  { %vm694_vm11 = vcmp.gt.f32.partialorder %v692_v5, %v682_v57  ;;  %vm695_vm12 = vcmp.gt.f32.partialorder %v693_v32, %v683_v58  ;;  %v706_v37 = vadd.f32 %v2562_v22, %v705_v62  ;;  %v707_v50 = vadd.f32 %v2567_v23, %v705_v62  ;;  %v2856_v39 = vld [vmem:[%s4142_s1 + $0x30] sm:$0xff] }
  0x6f   :  { %v696_v33 = vsel %vm694_vm11, %v692_v5, %v682_v57  ;;  %v697_v10 = vsel %vm695_vm12, %v693_v32, %v683_v58  ;;  %v698_v2 = vsel %vm694_vm11, 12, %v684_v6  ;;  %v699_v3 = vsel %vm695_vm12, 12, %v685_v9  ;;  %v2870_v5 = vld [vmem:[%s4142_s1 + $0x40] sm:$0xff]  ;;  %v2875_v32 = vld [vmem:[%s4142_s1 + $0x48] sm:$0xff] }
  0x70   :  { %vm708_vm13 = vcmp.gt.f32.partialorder %v706_v37, %v696_v33  ;;  %vm709_vm14 = vcmp.gt.f32.partialorder %v707_v50, %v697_v10  ;;  %v720_v12 = vadd.f32 %v2780_v24, %v719_v36  ;;  %v721_v15 = vadd.f32 %v2785_v54, %v719_v36 }
  0x71   :  { %v710_v26 = vsel %vm708_vm13, %v706_v37, %v696_v33  ;;  %v711_v1 = vsel %vm709_vm14, %v707_v50, %v697_v10  ;;  %v712_v55 = vsel %vm708_vm13, 13, %v698_v2  ;;  %v713_v16 = vsel %vm709_vm14, 13, %v699_v3 }
  0x72   :  { %vm722_vm0 = vcmp.gt.f32.partialorder %v720_v12, %v710_v26  ;;  %vm723_vm1 = vcmp.gt.f32.partialorder %v721_v15, %v711_v1  ;;  %v734_v22 = vadd.f32 %v2576_v49, %v733_v63  ;;  %v735_v23 = vadd.f32 %v2581_v47, %v733_v63 }
  0x73   :  { %v724_v20 = vsel %vm722_vm0, %v720_v12, %v710_v26  ;;  %v725_v7 = vsel %vm723_vm1, %v721_v15, %v711_v1  ;;  %v726_v45 = vsel %vm722_vm0, 14, %v712_v55  ;;  %v727_v30 = vsel %vm723_vm1, 14, %v713_v16  ;;  %v2892_v12 = vld [vmem:[%s4142_s1 + $0x50] sm:$0xff]  ;;  %v2897_v15 = vld [vmem:[%s4142_s1 + $0x58] sm:$0xff] }
  0x74   :  { %vm736_vm3 = vcmp.gt.f32.partialorder %v734_v22, %v724_v20  ;;  %vm737_vm4 = vcmp.gt.f32.partialorder %v735_v23, %v725_v7  ;;  %vm2799_vm5 = vcmp.eq.s32.totalorder %v764_v29, 1  ;;  %v4261_v31 = vmov 0  ;;  %v2851_v29 = vld [vmem:[%s4142_s1 + $0x28] sm:$0xff]  ;;  %4266 = vst [vmem:[#allocation7_spill] sm:$0xff] %v2892_v12 }
  0x75   :  { %v4262_v31 = vsel %vm2799_vm5, 4294967295, %v4261_v31  ;;  %v738_v49 = vsel %vm736_vm3, %v734_v22, %v724_v20  ;;  %v739_v47 = vsel %vm737_vm4, %v735_v23, %v725_v7  ;;  %v2803_v56 = vsel %vm736_vm3, 15, %v726_v45 }
  0x76   :  { %4263 = vst [vmem:[#allocation4_spill] sm:$0xff] %v4262_v31  ;;  %4264 = vst [vmem:[#allocation5_spill] sm:$0xff] %v2803_v56  ;;  %v2805_v8 = vsel %vm737_vm4, 15, %v727_v30  ;;  %v2807_v46 = vadd.f32 %v2143_v41, %v738_v49  ;;  %v2809_v51 = vadd.f32 %v2144_v42, %v739_v47  ;;  %v2908_v49 = vld [vmem:[%s4142_s1 + $0x60] sm:$0xff]  ;;  %v2913_v47 = vld [vmem:[%s4142_s1 + $0x68] sm:$0xff] }
  0x77   :  { %4265 = vst [vmem:[#allocation6_spill] sm:$0xff] %v2805_v8  ;;  %v3019_v8 = vld [vmem:[%s4142_s1 + $0xd0] sm:$0xff]  ;;  %v3024_v56 = vld [vmem:[%s4142_s1 + $0xd8] sm:$0xff] }
  0x78   :  { %v773_v36 = vrot.slane %v2807_v46, %v2353_v11  ;;  %v781_v63 = vrot.slane %v2807_v46, %v2361_v13  ;;  %v795_v0 = vrot.slane %v2807_v46, %v2364_v14  ;;  %v809_v48 = vrot.slane %v2807_v46, %v2377_v17 }
  0x79   :  { %v823_v57 = vrot.slane %v2807_v46, %v2380_v18  ;;  %v837_v58 = vrot.slane %v2807_v46, %v2383_v19 }
  0x7a   :  { %v774_v6 = vadd.f32 %v773_v36, %v2814_v52  ;;  %v775_v9 = vadd.f32 %v773_v36, %v2819_v61  ;;  %v782_v37 = vadd.f32 %v2824_v43, %v781_v63  ;;  %v783_v50 = vadd.f32 %v2829_v59, %v781_v63 }
  0x7b   :  { %v796_v33 = vadd.f32 %v2834_v21, %v795_v0  ;;  %v797_v10 = vadd.f32 %v2851_v29, %v795_v0  ;;  %v810_v2 = vadd.f32 %v2856_v39, %v809_v48  ;;  %v811_v3 = vadd.f32 %v2861_v53, %v809_v48 }
  0x7c   :  { %vm784_vm6 = vcmp.gt.f32.partialorder %v782_v37, %v774_v6  ;;  %vm785_vm7 = vcmp.gt.f32.partialorder %v783_v50, %v775_v9  ;;  %v824_v26 = vadd.f32 %v2870_v5, %v823_v57  ;;  %v825_v1 = vadd.f32 %v2875_v32, %v823_v57 }
  0x7d   :  { %v786_v55 = vsel %vm784_vm6, %v782_v37, %v774_v6  ;;  %v787_v16 = vsel %vm785_vm7, %v783_v50, %v775_v9  ;;  %v788_v22 = vsel %vm784_vm6, 1, %v4244_v40  ;;  %v789_v23 = vsel %vm785_vm7, 1, %v4244_v40  ;;  %v2922_v6 = vld [vmem:[%s4142_s1 + $0x70] sm:$0xff]  ;;  %v2927_v9 = vld [vmem:[%s4142_s1 + $0x78] sm:$0xff] }
  0x7e   :  { %vm798_vm8 = vcmp.gt.f32.partialorder %v796_v33, %v786_v55  ;;  %vm799_vm9 = vcmp.gt.f32.partialorder %v797_v10, %v787_v16  ;;  %v838_v20 = vadd.f32 %v2892_v12, %v837_v58  ;;  %v839_v7 = vadd.f32 %v2897_v15, %v837_v58 }
  0x7f   :  { %v800_v45 = vsel %vm798_vm8, %v796_v33, %v786_v55  ;;  %v801_v30 = vsel %vm799_vm9, %v797_v10, %v787_v16  ;;  %v802_v41 = vsel %vm798_vm8, 2, %v788_v22  ;;  %v803_v42 = vsel %vm799_vm9, 2, %v789_v23 }
  0x80   :  { %vm812_vm10 = vcmp.gt.f32.partialorder %v810_v2, %v800_v45  ;;  %vm813_vm11 = vcmp.gt.f32.partialorder %v811_v3, %v801_v30  ;;  %v851_v36 = vrot.slane %v2807_v46, %v2410_v28  ;;  %v865_v63 = vrot.slane %v2807_v46, %v2429_v34 }
  0x81   :  { %v814_v0 = vsel %vm812_vm10, %v810_v2, %v800_v45  ;;  %v815_v48 = vsel %vm813_vm11, %v811_v3, %v801_v30  ;;  %v816_v57 = vsel %vm812_vm10, 3, %v802_v41  ;;  %v817_v58 = vsel %vm813_vm11, 3, %v803_v42  ;;  %v2936_v41 = vld [vmem:[%s4142_s1 + $0x80] sm:$0xff] }
  0x82   :  { %vm826_vm12 = vcmp.gt.f32.partialorder %v824_v26, %v814_v0  ;;  %vm827_vm13 = vcmp.gt.f32.partialorder %v825_v1, %v815_v48  ;;  %v852_v37 = vadd.f32 %v2908_v49, %v851_v36  ;;  %v853_v50 = vadd.f32 %v2913_v47, %v851_v36 }
  0x83   :  { %v828_v33 = vsel %vm826_vm12, %v824_v26, %v814_v0  ;;  %v829_v10 = vsel %vm827_vm13, %v825_v1, %v815_v48  ;;  %v830_v2 = vsel %vm826_vm12, 4, %v816_v57  ;;  %v831_v3 = vsel %vm827_vm13, 4, %v817_v58  ;;  %v2941_v26 = vld [vmem:[%s4142_s1 + $0x88] sm:$0xff]  ;;  %v2946_v1 = vld [vmem:[%s4143_s2] sm:$0x1]  ;;  %v2956_v48 = vld [vmem:[%s4142_s1 + $0x90] sm:$0xff] }
  0x84   :  { %vm840_vm14 = vcmp.gt.f32.partialorder %v838_v20, %v828_v33  ;;  %vm841_vm0 = vcmp.gt.f32.partialorder %v839_v7, %v829_v10  ;;  %v866_v55 = vadd.f32 %v2922_v6, %v865_v63  ;;  %v867_v16 = vadd.f32 %v2927_v9, %v865_v63  ;;  %4267 = vst [vmem:[#allocation8_spill] sm:$0xff] %v2946_v1  ;;  %v2961_v57 = vld [vmem:[%s4142_s1 + $0x98] sm:$0xff] }
  0x85   :  { %v842_v22 = vsel %vm840_vm14, %v838_v20, %v828_v33  ;;  %v843_v23 = vsel %vm841_vm0, %v839_v7, %v829_v10  ;;  %v844_v45 = vsel %vm840_vm14, 5, %v830_v2  ;;  %v845_v30 = vsel %vm841_vm0, 5, %v831_v3 }
  0x86   :  { %vm1003_vm1 = vcmp.eq.s32.totalorder %v2946_v1, 5  ;;  %vm854_vm3 = vcmp.gt.f32.partialorder %v852_v37, %v842_v22  ;;  %vm855_vm4 = vcmp.gt.f32.partialorder %v853_v50, %v843_v23  ;;  %v879_v20 = vrot.slane %v2809_v51, %v2353_v11 }
  0x87   :  { %v893_v7 = vrot.slane %v2809_v51, %v2361_v13  ;;  %v856_v42 = vsel %vm854_vm3, %v852_v37, %v842_v22  ;;  %v857_v36 = vsel %vm855_vm4, %v853_v50, %v843_v23  ;;  %v858_v63 = vsel %vm854_vm3, 6, %v844_v45  ;;  %v2970_v23 = vld [vmem:[%s4142_s1 + $0xa0] sm:$0xff] }
  0x88   :  { %v859_v0 = vsel %vm855_vm4, 6, %v845_v30  ;;  %vm868_vm6 = vcmp.gt.f32.partialorder %v866_v55, %v856_v42  ;;  %vm869_vm7 = vcmp.gt.f32.partialorder %v867_v16, %v857_v36  ;;  %v880_v58 = vadd.f32 %v2936_v41, %v879_v20  ;;  %4268 = vst [vmem:[#allocation9_spill] sm:$0xff] %v2970_v23 }
  0x89   :  { %v881_v33 = vadd.f32 %v2941_v26, %v879_v20  ;;  %v870_v37 = vsel %vm868_vm6, %v866_v55, %v856_v42  ;;  %v871_v50 = vsel %vm869_vm7, %v867_v16, %v857_v36  ;;  %v872_v10 = vsel %vm868_vm6, 7, %v858_v63  ;;  %v2975_v55 = vld [vmem:[%s4142_s1 + $0xa8] sm:$0xff]  ;;  %v2980_v16 = vld [vmem:[%s4142_s1 + $0xb0] sm:$0xff]  ;;  %v2985_v20 = vld [vmem:[%s4142_s1 + $0xb8] sm:$0xff] }
  0x8a   :  { %v873_v2 = vsel %vm869_vm7, 7, %v859_v0  ;;  %vm882_vm8 = vcmp.gt.f32.partialorder %v880_v58, %v870_v37  ;;  %v894_v3 = vadd.f32 %v2956_v48, %v893_v7  ;;  %v895_v22 = vadd.f32 %v2961_v57, %v893_v7  ;;  %4269 = vst [vmem:[#allocation10_spill] sm:$0xff] %v2975_v55  ;;  %4270 = vst [vmem:[#allocation11_spill] sm:$0xff] %v2980_v16 }
  0x8b   :  { %vm883_vm9 = vcmp.gt.f32.partialorder %v881_v33, %v871_v50  ;;  %v884_v45 = vsel %vm882_vm8, %v880_v58, %v870_v37  ;;  %v886_v62 = vsel %vm882_vm8, 8, %v872_v10  ;;  %4271 = vst [vmem:[#allocation18_spill] sm:$0xff] %v2985_v20  ;;  %v907_v7 = vrot.slane %v2809_v51, %v2364_v14 }
  0x8c   :  { %v885_v30 = vsel %vm883_vm9, %v881_v33, %v871_v50  ;;  %v887_v35 = vsel %vm883_vm9, 8, %v873_v2  ;;  %vm896_vm10 = vcmp.gt.f32.partialorder %v894_v3, %v884_v45  ;;  %v921_v42 = vrot.slane %v2809_v51, %v2377_v17  ;;  %v2998_v2 = vld [vmem:[%s4142_s1 + $0xc0] sm:$0xff] }
  0x8d   :  { %vm897_vm11 = vcmp.gt.f32.partialorder %v895_v22, %v885_v30  ;;  %v898_v36 = vsel %vm896_vm10, %v894_v3, %v884_v45  ;;  %v900_v0 = vsel %vm896_vm10, 9, %v886_v62  ;;  %v908_v33 = vadd.f32 %v2970_v23, %v907_v7  ;;  %4272 = vst [vmem:[#allocation19_spill] sm:$0xff] %v2998_v2  ;;  %v3003_v3 = vld [vmem:[%s4142_s1 + $0xc8] sm:$0xff] }
  0x8e   :  { %v899_v63 = vsel %vm897_vm11, %v895_v22, %v885_v30  ;;  %v901_v58 = vsel %vm897_vm11, 9, %v887_v35  ;;  %v909_v37 = vadd.f32 %v2975_v55, %v907_v7  ;;  %v922_v50 = vadd.f32 %v2980_v16, %v921_v42 }
  0x8f   :  { %v923_v10 = vadd.f32 %v2985_v20, %v921_v42  ;;  %v935_v35 = vrot.slane %v2809_v51, %v2380_v18  ;;  %v949_v62 = vrot.slane %v2809_v51, %v2383_v19  ;;  %v963_v22 = vrot.slane %v2809_v51, %v2410_v28 }
  0x90   :  { %vm910_vm12 = vcmp.gt.f32.partialorder %v908_v33, %v898_v36  ;;  %vm911_vm13 = vcmp.gt.f32.partialorder %v909_v37, %v899_v63  ;;  %v977_v45 = vrot.slane %v2809_v51, %v2429_v34  ;;  %v1004_v30 = vsel %vm1003_vm1, 1, %v4244_v40 }
  0x91   :  { %v912_v7 = vsel %vm910_vm12, %v908_v33, %v898_v36  ;;  %v913_v42 = vsel %vm911_vm13, %v909_v37, %v899_v63  ;;  %v914_v4 = vsel %vm910_vm12, 10, %v900_v0  ;;  %v915_v44 = vsel %vm911_vm13, 10, %v901_v58 }
  0x92   :  { %vm924_vm14 = vcmp.gt.f32.partialorder %v922_v50, %v912_v7  ;;  %vm925_vm0 = vcmp.gt.f32.partialorder %v923_v10, %v913_v42  ;;  %v936_v38 = vadd.f32 %v2998_v2, %v935_v35  ;;  %v937_v60 = vadd.f32 %v3003_v3, %v935_v35  ;;  %v3033_v2 = vld [vmem:[%s4142_s1 + $0xf0] sm:$0xff] }
  0x93   :  { %v926_v36 = vsel %vm924_vm14, %v922_v50, %v912_v7  ;;  %v927_v63 = vsel %vm925_vm0, %v923_v10, %v913_v42  ;;  %v928_v0 = vsel %vm924_vm14, 11, %v914_v4  ;;  %v929_v58 = vsel %vm925_vm0, 11, %v915_v44  ;;  %v3038_v4 = vld [vmem:[%s4142_s1 + $0xf8] sm:$0xff] }
  0x94   :  { %vm938_vm1 = vcmp.gt.f32.partialorder %v936_v38, %v926_v36  ;;  %vm939_vm3 = vcmp.gt.f32.partialorder %v937_v60, %v927_v63  ;;  %v950_v33 = vadd.f32 %v3019_v8, %v949_v62  ;;  %v951_v37 = vadd.f32 %v3024_v56, %v949_v62 }
  0x95   :  { %v940_v20 = vsel %vm938_vm1, %v936_v38, %v926_v36  ;;  %v941_v16 = vsel %vm939_vm3, %v937_v60, %v927_v63  ;;  %v942_v55 = vsel %vm938_vm1, 12, %v928_v0  ;;  %v943_v23 = vsel %vm939_vm3, 12, %v929_v58  ;;  %v2175_v58 = vld [vmem:[%s4141_s0 + $0x40] sm:$0xff] }
  0x96   :  { %vm952_vm4 = vcmp.gt.f32.partialorder %v950_v33, %v940_v20  ;;  %vm953_vm6 = vcmp.gt.f32.partialorder %v951_v37, %v941_v16  ;;  %v964_v44 = vadd.f32 %v2780_v24, %v963_v22  ;;  %v965_v50 = vadd.f32 %v2785_v54, %v963_v22 }
  0x97   :  { %v954_v38 = vsel %vm952_vm4, %v950_v33, %v940_v20  ;;  %v955_v60 = vsel %vm953_vm6, %v951_v37, %v941_v16  ;;  %v956_v10 = vsel %vm952_vm4, 13, %v942_v55  ;;  %v957_v35 = vsel %vm953_vm6, 13, %v943_v23  ;;  %v2176_v16 = vld [vmem:[%s4141_s0 + $0x48] sm:$0xff] }
  0x98   :  { %vm966_vm7 = vcmp.gt.f32.partialorder %v964_v44, %v954_v38  ;;  %vm967_vm8 = vcmp.gt.f32.partialorder %v965_v50, %v955_v60  ;;  %v978_v62 = vadd.f32 %v3033_v2, %v977_v45  ;;  %v979_v7 = vadd.f32 %v3038_v4, %v977_v45 }
  0x99   :  { %v968_v42 = vsel %vm966_vm7, %v964_v44, %v954_v38  ;;  %v969_v36 = vsel %vm967_vm8, %v965_v50, %v955_v60  ;;  %v970_v63 = vsel %vm966_vm7, 14, %v956_v10  ;;  %v971_v0 = vsel %vm967_vm8, 14, %v957_v35 }
  0x9a   :  { %vm980_vm9 = vcmp.gt.f32.partialorder %v978_v62, %v968_v42  ;;  %vm981_vm10 = vcmp.gt.f32.partialorder %v979_v7, %v969_v36  ;;  %v1008_v23 = vrot.slane %v1004_v30, %v2353_v11  ;;  %vm1247_vm11 = vcmp.eq.s32.totalorder %v2946_v1, 6 }
  0x9b   :  { %v982_v55 = vsel %vm980_vm9, %v978_v62, %v968_v42  ;;  %v983_v20 = vsel %vm981_vm10, %v979_v7, %v969_v36  ;;  %v3052_v22 = vsel %vm980_vm9, 15, %v970_v63  ;;  %v3054_v45 = vsel %vm981_vm10, 15, %v971_v0 }
  0x9c   :  { %4273 = vst [vmem:[#allocation20_spill] sm:$0xff] %v3052_v22  ;;  %4274 = vst [vmem:[#allocation21_spill] sm:$0xff] %v3054_v45  ;;  %v1001_v33 = vadd.f32 %v2175_v58, %v982_v55  ;;  %v3056_v37 = vadd.f32 %v2176_v16, %v983_v20  ;;  %vm3058_vm12 = vcmp.eq.s32.totalorder %v1008_v23, 1  ;;  %v4275_v44 = vmov 0 }
  0x9d   :  { %v4276_v44 = vsel %vm3058_vm12, 4294967295, %v4275_v44  ;;  %v3063_v50 = vsel %vm1247_vm11, 1, %v4244_v40  ;;  %v4278_v30 = vsel %vm2799_vm5, %v2807_v46, %v2711_v25  ;;  %v4279_v60 = vsel %vm2799_vm5, %v2809_v51, %v2721_v27 }
  0x9e   :  { %4277 = vst [vmem:[#allocation22_spill] sm:$0xff] %v4276_v44  ;;  %v3072_v38 = vsel %vm3058_vm12, %v1001_v33, %v4278_v30  ;;  %v3082_v10 = vsel %vm3058_vm12, %v3056_v37, %v4279_v60  ;;  %v1017_v35 = vrot.slane %v1001_v33, %v2353_v11  ;;  %v1025_v62 = vrot.slane %v1001_v33, %v2361_v13 }
  0x9f   :  { %v1039_v25 = vrot.slane %v1001_v33, %v2364_v14  ;;  %v1053_v46 = vrot.slane %v1001_v33, %v2377_v17  ;;  %v1067_v7 = vrot.slane %v1001_v33, %v2380_v18  ;;  %v1081_v42 = vrot.slane %v1001_v33, %v2383_v19 }
  0xa0   :  { %v1018_v36 = vadd.f32 %v1017_v35, %v2814_v52  ;;  %v1019_v27 = vadd.f32 %v1017_v35, %v2819_v61  ;;  %v1026_v51 = vadd.f32 %v2824_v43, %v1025_v62  ;;  %v1027_v63 = vadd.f32 %v2829_v59, %v1025_v62 }
  0xa1   :  { %v1040_v0 = vadd.f32 %v2834_v21, %v1039_v25  ;;  %v1041_v58 = vadd.f32 %v2851_v29, %v1039_v25  ;;  %v1054_v16 = vadd.f32 %v2856_v39, %v1053_v46  ;;  %v1055_v23 = vadd.f32 %v2861_v53, %v1053_v46 }
  0xa2   :  { %vm1028_vm13 = vcmp.gt.f32.partialorder %v1026_v51, %v1018_v36  ;;  %vm1029_vm14 = vcmp.gt.f32.partialorder %v1027_v63, %v1019_v27  ;;  %v1068_v55 = vadd.f32 %v2870_v5, %v1067_v7  ;;  %v1069_v20 = vadd.f32 %v2875_v32, %v1067_v7 }
  0xa3   :  { %v1030_v30 = vsel %vm1028_vm13, %v1026_v51, %v1018_v36  ;;  %v1031_v60 = vsel %vm1029_vm14, %v1027_v63, %v1019_v27  ;;  %v1032_v35 = vsel %vm1028_vm13, 1, %v4244_v40  ;;  %v1033_v62 = vsel %vm1029_vm14, 1, %v4244_v40 }
  0xa4   :  { %vm1042_vm0 = vcmp.gt.f32.partialorder %v1040_v0, %v1030_v30  ;;  %vm1043_vm1 = vcmp.gt.f32.partialorder %v1041_v58, %v1031_v60  ;;  %v1082_v25 = vadd.f32 %v2892_v12, %v1081_v42  ;;  %v1083_v31 = vadd.f32 %v2897_v15, %v1081_v42 }
  0xa5   :  { %v1044_v44 = vsel %vm1042_vm0, %v1040_v0, %v1030_v30  ;;  %v1045_v46 = vsel %vm1043_vm1, %v1041_v58, %v1031_v60  ;;  %v1046_v45 = vsel %vm1042_vm0, 2, %v1032_v35  ;;  %v1047_v22 = vsel %vm1043_vm1, 2, %v1033_v62 }
  0xa6   :  { %vm1056_vm3 = vcmp.gt.f32.partialorder %v1054_v16, %v1044_v44  ;;  %vm1057_vm4 = vcmp.gt.f32.partialorder %v1055_v23, %v1045_v46  ;;  %v1095_v7 = vrot.slane %v1001_v33, %v2410_v28  ;;  %v1109_v36 = vrot.slane %v1001_v33, %v2429_v34 }
  0xa7   :  { %v1058_v27 = vsel %vm1056_vm3, %v1054_v16, %v1044_v44  ;;  %v1059_v51 = vsel %vm1057_vm4, %v1055_v23, %v1045_v46  ;;  %v1060_v63 = vsel %vm1056_vm3, 3, %v1046_v45  ;;  %v1061_v1 = vsel %vm1057_vm4, 3, %v1047_v22 }
  0xa8   :  { %vm1070_vm6 = vcmp.gt.f32.partialorder %v1068_v55, %v1058_v27  ;;  %vm1071_vm7 = vcmp.gt.f32.partialorder %v1069_v20, %v1059_v51  ;;  %v1096_v12 = vadd.f32 %v2908_v49, %v1095_v7  ;;  %v1097_v42 = vadd.f32 %v2913_v47, %v1095_v7 }
  0xa9   :  { %v1072_v0 = vsel %vm1070_vm6, %v1068_v55, %v1058_v27  ;;  %v1073_v58 = vsel %vm1071_vm7, %v1069_v20, %v1059_v51  ;;  %v1074_v30 = vsel %vm1070_vm6, 4, %v1060_v63  ;;  %v1075_v60 = vsel %vm1071_vm7, 4, %v1061_v1 }
  0xaa   :  { %vm1084_vm8 = vcmp.gt.f32.partialorder %v1082_v25, %v1072_v0  ;;  %vm1085_vm9 = vcmp.gt.f32.partialorder %v1083_v31, %v1073_v58  ;;  %v1110_v35 = vadd.f32 %v2922_v6, %v1109_v36  ;;  %v1111_v33 = vadd.f32 %v2927_v9, %v1109_v36 }
  0xab   :  { %v1086_v44 = vsel %vm1084_vm8, %v1082_v25, %v1072_v0  ;;  %v1087_v16 = vsel %vm1085_vm9, %v1083_v31, %v1073_v58  ;;  %v1088_v45 = vsel %vm1084_vm8, 5, %v1074_v30  ;;  %v1089_v22 = vsel %vm1085_vm9, 5, %v1075_v60 }
  0xac   :  { %vm1098_vm10 = vcmp.gt.f32.partialorder %v1096_v12, %v1086_v44  ;;  %vm1099_vm11 = vcmp.gt.f32.partialorder %v1097_v42, %v1087_v16  ;;  %v1123_v23 = vrot.slane %v3056_v37, %v2353_v11  ;;  %v1137_v55 = vrot.slane %v3056_v37, %v2361_v13 }
  0xad   :  { %v1100_v20 = vsel %vm1098_vm10, %v1096_v12, %v1086_v44  ;;  %v1101_v1 = vsel %vm1099_vm11, %v1097_v42, %v1087_v16  ;;  %v1102_v62 = vsel %vm1098_vm10, 6, %v1088_v45  ;;  %v1103_v46 = vsel %vm1099_vm11, 6, %v1089_v22  ;;  %v4280_v22 = vld [vmem:[#allocation9_spill] sm:$0xff] }
  0xae   :  { %vm1112_vm13 = vcmp.gt.f32.partialorder %v1110_v35, %v1100_v20  ;;  %vm1113_vm14 = vcmp.gt.f32.partialorder %v1111_v33, %v1101_v1  ;;  %v1124_v7 = vadd.f32 %v2936_v41, %v1123_v23  ;;  %v1125_v31 = vadd.f32 %v2941_v26, %v1123_v23 }
  0xaf   :  { %v1114_v25 = vsel %vm1112_vm13, %v1110_v35, %v1100_v20  ;;  %v1115_v36 = vsel %vm1113_vm14, %v1111_v33, %v1101_v1  ;;  %v1116_v27 = vsel %vm1112_vm13, 7, %v1102_v62  ;;  %v1117_v51 = vsel %vm1113_vm14, 7, %v1103_v46  ;;  %v4281_v20 = vld [vmem:[#allocation10_spill] sm:$0xff]  ;;  %v4282_v1 = vld [vmem:[#allocation11_spill] sm:$0xff] }
  0xb0   :  { %vm1126_vm0 = vcmp.gt.f32.partialorder %v1124_v7, %v1114_v25  ;;  %vm1127_vm1 = vcmp.gt.f32.partialorder %v1125_v31, %v1115_v36  ;;  %v1138_v63 = vadd.f32 %v2956_v48, %v1137_v55  ;;  %v1139_v0 = vadd.f32 %v2961_v57, %v1137_v55  ;;  %v4283_v46 = vld [vmem:[#allocation18_spill] sm:$0xff] }
  0xb1   :  { %v1128_v12 = vsel %vm1126_vm0, %v1124_v7, %v1114_v25  ;;  %v1129_v42 = vsel %vm1127_vm1, %v1125_v31, %v1115_v36  ;;  %v1130_v58 = vsel %vm1126_vm0, 8, %v1116_v27  ;;  %v1131_v30 = vsel %vm1127_vm1, 8, %v1117_v51 }
  0xb2   :  { %vm1140_vm3 = vcmp.gt.f32.partialorder %v1138_v63, %v1128_v12  ;;  %vm1141_vm4 = vcmp.gt.f32.partialorder %v1139_v0, %v1129_v42  ;;  %v1151_v60 = vrot.slane %v3056_v37, %v2364_v14  ;;  %v1165_v35 = vrot.slane %v3056_v37, %v2377_v17 }
  0xb3   :  { %v1142_v33 = vsel %vm1140_vm3, %v1138_v63, %v1128_v12  ;;  %v1143_v44 = vsel %vm1141_vm4, %v1139_v0, %v1129_v42  ;;  %v1144_v16 = vsel %vm1140_vm3, 9, %v1130_v58  ;;  %v1145_v45 = vsel %vm1141_vm4, 9, %v1131_v30  ;;  %v4284_v58 = vld [vmem:[#allocation19_spill] sm:$0xff] }
  0xb4   :  { %v1152_v23 = vadd.f32 %v4280_v22, %v1151_v60  ;;  %v1153_v55 = vadd.f32 %v4281_v20, %v1151_v60  ;;  %v1166_v62 = vadd.f32 %v4282_v1, %v1165_v35  ;;  %v1167_v7 = vadd.f32 %v4283_v46, %v1165_v35 }
  0xb5   :  { %v1179_v31 = vrot.slane %v3056_v37, %v2380_v18  ;;  %v1193_v25 = vrot.slane %v3056_v37, %v2383_v19  ;;  %v1207_v36 = vrot.slane %v3056_v37, %v2410_v28  ;;  %v1221_v27 = vrot.slane %v3056_v37, %v2429_v34 }
  0xb6   :  { %vm1154_vm6 = vcmp.gt.f32.partialorder %v1152_v23, %v1142_v33  ;;  %vm1155_vm7 = vcmp.gt.f32.partialorder %v1153_v55, %v1143_v44  ;;  %v1252_v51 = vrot.slane %v3063_v50, %v2353_v11 }
  0xb7   :  { %v1156_v63 = vsel %vm1154_vm6, %v1152_v23, %v1142_v33  ;;  %v1157_v0 = vsel %vm1155_vm7, %v1153_v55, %v1143_v44  ;;  %v1158_v12 = vsel %vm1154_vm6, 10, %v1144_v16  ;;  %v1159_v42 = vsel %vm1155_vm7, 10, %v1145_v45 }
  0xb8   :  { %vm1168_vm8 = vcmp.gt.f32.partialorder %v1166_v62, %v1156_v63  ;;  %vm1169_vm9 = vcmp.gt.f32.partialorder %v1167_v7, %v1157_v0  ;;  %v1180_v30 = vadd.f32 %v4284_v58, %v1179_v31  ;;  %v1181_v60 = vadd.f32 %v3003_v3, %v1179_v31 }
  0xb9   :  { %v1170_v35 = vsel %vm1168_vm8, %v1166_v62, %v1156_v63  ;;  %v1171_v46 = vsel %vm1169_vm9, %v1167_v7, %v1157_v0  ;;  %v1172_v1 = vsel %vm1168_vm8, 11, %v1158_v12  ;;  %v1173_v20 = vsel %vm1169_vm9, 11, %v1159_v42 }
  0xba   :  { %vm1182_vm10 = vcmp.gt.f32.partialorder %v1180_v30, %v1170_v35  ;;  %vm1183_vm11 = vcmp.gt.f32.partialorder %v1181_v60, %v1171_v46  ;;  %v1194_v37 = vadd.f32 %v3019_v8, %v1193_v25  ;;  %v1195_v50 = vadd.f32 %v3024_v56, %v1193_v25 }
  0xbb   :  { %v1184_v33 = vsel %vm1182_vm10, %v1180_v30, %v1170_v35  ;;  %v1185_v44 = vsel %vm1183_vm11, %v1181_v60, %v1171_v46  ;;  %v1186_v16 = vsel %vm1182_vm10, 12, %v1172_v1  ;;  %v1187_v45 = vsel %vm1183_vm11, 12, %v1173_v20 }
  0xbc   :  { %vm1196_vm13 = vcmp.gt.f32.partialorder %v1194_v37, %v1184_v33  ;;  %vm1197_vm14 = vcmp.gt.f32.partialorder %v1195_v50, %v1185_v44  ;;  %v1208_v23 = vadd.f32 %v2780_v24, %v1207_v36  ;;  %v1209_v55 = vadd.f32 %v2785_v54, %v1207_v36  ;;  %v2207_v24 = vld [vmem:[%s4141_s0 + $0x50] sm:$0xff]  ;;  %v2208_v54 = vld [vmem:[%s4141_s0 + $0x58] sm:$0xff] }
  0xbd   :  { %v1198_v62 = vsel %vm1196_vm13, %v1194_v37, %v1184_v33  ;;  %v1199_v7 = vsel %vm1197_vm14, %v1195_v50, %v1185_v44  ;;  %v1200_v31 = vsel %vm1196_vm13, 13, %v1186_v16  ;;  %v1201_v63 = vsel %vm1197_vm14, 13, %v1187_v45  ;;  %v2257_v50 = vld [vmem:[%s4142_s1 + $0x90] sm:$0xff] }
  0xbe   :  { %vm1210_vm0 = vcmp.gt.f32.partialorder %v1208_v23, %v1198_v62  ;;  %vm1211_vm1 = vcmp.gt.f32.partialorder %v1209_v55, %v1199_v7  ;;  %v1222_v0 = vadd.f32 %v3033_v2, %v1221_v27  ;;  %v1223_v25 = vadd.f32 %v3038_v4, %v1221_v27 }
  0xbf   :  { %v1212_v12 = vsel %vm1210_vm0, %v1208_v23, %v1198_v62  ;;  %v1213_v46 = vsel %vm1211_vm1, %v1209_v55, %v1199_v7  ;;  %v1214_v1 = vsel %vm1210_vm0, 14, %v1200_v31  ;;  %v1215_v20 = vsel %vm1211_vm1, 14, %v1201_v63 }
  0xc0   :  { %vm1224_vm3 = vcmp.gt.f32.partialorder %v1222_v0, %v1212_v12  ;;  %vm1225_vm4 = vcmp.gt.f32.partialorder %v1223_v25, %v1213_v46  ;;  %vm3150_vm6 = vcmp.eq.s32.totalorder %v1252_v51, 1 }
  0xc1   :  { %v1226_v42 = vsel %vm1224_vm3, %v1222_v0, %v1212_v12  ;;  %v1227_v27 = vsel %vm1225_vm4, %v1223_v25, %v1213_v46  ;;  %v3154_v30 = vsel %vm1224_vm3, 15, %v1214_v1  ;;  %v3156_v60 = vsel %vm1225_vm4, 15, %v1215_v20 }
  0xc2   :  { %4287 = vst [vmem:[#allocation9_spill] sm:$0xff] %v3154_v30  ;;  %4288 = vst [vmem:[#allocation19_spill] sm:$0xff] %v3156_v60  ;;  %v3158_v35 = vadd.f32 %v2207_v24, %v1226_v42  ;;  %v3160_v37 = vadd.f32 %v2208_v54, %v1227_v27  ;;  %v3509_v60 = vld [vmem:[%s4142_s1 + $0x98] sm:$0xff] }
  0xc3   :  { %4304 = vst [vmem:[#allocation28_spill] sm:$0xff] %v3509_v60 }
  0xc4   :  { %v1261_v33 = vrot.slane %v3158_v35, %v2353_v11  ;;  %v1269_v44 = vrot.slane %v3158_v35, %v2361_v13  ;;  %v1283_v16 = vrot.slane %v3158_v35, %v2364_v14  ;;  %v1297_v45 = vrot.slane %v3158_v35, %v2377_v17 }
  0xc5   :  { %v1311_v23 = vrot.slane %v3158_v35, %v2380_v18  ;;  %v1325_v55 = vrot.slane %v3158_v35, %v2383_v19 }
  0xc6   :  { %v1262_v62 = vadd.f32 %v1261_v33, %v2814_v52  ;;  %v1263_v7 = vadd.f32 %v1261_v33, %v2819_v61  ;;  %v1270_v31 = vadd.f32 %v2824_v43, %v1269_v44  ;;  %v1271_v63 = vadd.f32 %v2829_v59, %v1269_v44 }
  0xc7   :  { %v1284_v0 = vadd.f32 %v2834_v21, %v1283_v16  ;;  %v1285_v25 = vadd.f32 %v2851_v29, %v1283_v16  ;;  %v1298_v12 = vadd.f32 %v2856_v39, %v1297_v45  ;;  %v1299_v46 = vadd.f32 %v2861_v53, %v1297_v45  ;;  %v4289_v21 = vld [vmem:[#allocation7_spill] sm:$0xff] }
  0xc8   :  { %vm1272_vm7 = vcmp.gt.f32.partialorder %v1270_v31, %v1262_v62  ;;  %vm1273_vm8 = vcmp.gt.f32.partialorder %v1271_v63, %v1263_v7  ;;  %v1312_v1 = vadd.f32 %v2870_v5, %v1311_v23  ;;  %v1313_v52 = vadd.f32 %v2875_v32, %v1311_v23 }
  0xc9   :  { %v1274_v20 = vsel %vm1272_vm7, %v1270_v31, %v1262_v62  ;;  %v1275_v61 = vsel %vm1273_vm8, %v1271_v63, %v1263_v7  ;;  %v1276_v43 = vsel %vm1272_vm7, 1, %v4244_v40  ;;  %v1277_v59 = vsel %vm1273_vm8, 1, %v4244_v40 }
  0xca   :  { %vm1286_vm9 = vcmp.gt.f32.partialorder %v1284_v0, %v1274_v20  ;;  %vm1287_vm10 = vcmp.gt.f32.partialorder %v1285_v25, %v1275_v61  ;;  %v1326_v29 = vadd.f32 %v4289_v21, %v1325_v55  ;;  %v1327_v39 = vadd.f32 %v2897_v15, %v1325_v55 }
  0xcb   :  { %v1288_v24 = vsel %vm1286_vm9, %v1284_v0, %v1274_v20  ;;  %v1289_v53 = vsel %vm1287_vm10, %v1285_v25, %v1275_v61  ;;  %v1290_v54 = vsel %vm1286_vm9, 2, %v1276_v43  ;;  %v1291_v42 = vsel %vm1287_vm10, 2, %v1277_v59 }
  0xcc   :  { %vm1300_vm11 = vcmp.gt.f32.partialorder %v1298_v12, %v1288_v24  ;;  %vm1301_vm13 = vcmp.gt.f32.partialorder %v1299_v46, %v1289_v53  ;;  %v1339_v5 = vrot.slane %v3158_v35, %v2410_v28  ;;  %v1353_v32 = vrot.slane %v3158_v35, %v2429_v34 }
  0xcd   :  { %v1302_v27 = vsel %vm1300_vm11, %v1298_v12, %v1288_v24  ;;  %v1303_v33 = vsel %vm1301_vm13, %v1299_v46, %v1289_v53  ;;  %v1304_v44 = vsel %vm1300_vm11, 3, %v1290_v54  ;;  %v1305_v16 = vsel %vm1301_vm13, 3, %v1291_v42 }
  0xce   :  { %vm1314_vm14 = vcmp.gt.f32.partialorder %v1312_v1, %v1302_v27  ;;  %vm1315_vm0 = vcmp.gt.f32.partialorder %v1313_v52, %v1303_v33  ;;  %v1340_v15 = vadd.f32 %v2908_v49, %v1339_v5  ;;  %v1341_v45 = vadd.f32 %v2913_v47, %v1339_v5 }
  0xcf   :  { %v1316_v23 = vsel %vm1314_vm14, %v1312_v1, %v1302_v27  ;;  %v1317_v55 = vsel %vm1315_vm0, %v1313_v52, %v1303_v33  ;;  %v1318_v62 = vsel %vm1314_vm14, 4, %v1304_v44  ;;  %v1319_v7 = vsel %vm1315_vm0, 4, %v1305_v16  ;;  %v4290_v16 = vld [vmem:[#allocation10_spill] sm:$0xff] }
  0xd0   :  { %vm1328_vm1 = vcmp.gt.f32.partialorder %v1326_v29, %v1316_v23  ;;  %vm1329_vm3 = vcmp.gt.f32.partialorder %v1327_v39, %v1317_v55  ;;  %v1354_v31 = vadd.f32 %v2922_v6, %v1353_v32  ;;  %v1355_v63 = vadd.f32 %v2927_v9, %v1353_v32 }
  0xd1   :  { %v1330_v0 = vsel %vm1328_vm1, %v1326_v29, %v1316_v23  ;;  %v1331_v25 = vsel %vm1329_vm3, %v1327_v39, %v1317_v55  ;;  %v1332_v12 = vsel %vm1328_vm1, 5, %v1318_v62  ;;  %v1333_v46 = vsel %vm1329_vm3, 5, %v1319_v7  ;;  %v4292_v23 = vld [vmem:[#allocation18_spill] sm:$0xff] }
  0xd2   :  { %vm1342_vm4 = vcmp.gt.f32.partialorder %v1340_v15, %v1330_v0  ;;  %vm1343_vm7 = vcmp.gt.f32.partialorder %v1341_v45, %v1331_v25  ;;  %v1367_v49 = vrot.slane %v3160_v37, %v2353_v11  ;;  %v1381_v47 = vrot.slane %v3160_v37, %v2361_v13 }
  0xd3   :  { %v1344_v1 = vsel %vm1342_vm4, %v1340_v15, %v1330_v0  ;;  %v1345_v52 = vsel %vm1343_vm7, %v1341_v45, %v1331_v25  ;;  %v1346_v20 = vsel %vm1342_vm4, 6, %v1332_v12  ;;  %v1347_v61 = vsel %vm1343_vm7, 6, %v1333_v46  ;;  %v4291_v15 = vld [vmem:[#allocation11_spill] sm:$0xff] }
  0xd4   :  { %vm1356_vm8 = vcmp.gt.f32.partialorder %v1354_v31, %v1344_v1  ;;  %vm1357_vm9 = vcmp.gt.f32.partialorder %v1355_v63, %v1345_v52  ;;  %v1368_v6 = vadd.f32 %v2936_v41, %v1367_v49  ;;  %v1369_v9 = vadd.f32 %v2941_v26, %v1367_v49 }
  0xd5   :  { %v1358_v43 = vsel %vm1356_vm8, %v1354_v31, %v1344_v1  ;;  %v1359_v59 = vsel %vm1357_vm9, %v1355_v63, %v1345_v52  ;;  %v1360_v21 = vsel %vm1356_vm8, 7, %v1346_v20  ;;  %v1361_v29 = vsel %vm1357_vm9, 7, %v1347_v61  ;;  %v3233_v61 = vld [vmem:[%s4142_s1 + $0xe0] sm:$0xff] }
  0xd6   :  { %vm1370_vm10 = vcmp.gt.f32.partialorder %v1368_v6, %v1358_v43  ;;  %vm1371_vm11 = vcmp.gt.f32.partialorder %v1369_v9, %v1359_v59  ;;  %v1382_v39 = vadd.f32 %v2956_v48, %v1381_v47  ;;  %v1383_v24 = vadd.f32 %v2961_v57, %v1381_v47 }
  0xd7   :  { %v1372_v53 = vsel %vm1370_vm10, %v1368_v6, %v1358_v43  ;;  %v1373_v54 = vsel %vm1371_vm11, %v1369_v9, %v1359_v59  ;;  %v1374_v42 = vsel %vm1370_vm10, 8, %v1360_v21  ;;  %v1375_v5 = vsel %vm1371_vm11, 8, %v1361_v29  ;;  %v3238_v6 = vld [vmem:[%s4142_s1 + $0xe8] sm:$0xff] }
  0xd8   :  { %vm1384_vm13 = vcmp.gt.f32.partialorder %v1382_v39, %v1372_v53  ;;  %vm1385_vm14 = vcmp.gt.f32.partialorder %v1383_v24, %v1373_v54  ;;  %v1395_v41 = vrot.slane %v3160_v37, %v2364_v14  ;;  %v1409_v26 = vrot.slane %v3160_v37, %v2377_v17 }
  0xd9   :  { %v1386_v32 = vsel %vm1384_vm13, %v1382_v39, %v1372_v53  ;;  %v1387_v27 = vsel %vm1385_vm14, %v1383_v24, %v1373_v54  ;;  %v1388_v33 = vsel %vm1384_vm13, 9, %v1374_v42  ;;  %v1389_v44 = vsel %vm1385_vm14, 9, %v1375_v5 }
  0xda   :  { %v1396_v48 = vadd.f32 %v4280_v22, %v1395_v41  ;;  %v1397_v57 = vadd.f32 %v4290_v16, %v1395_v41  ;;  %v1410_v45 = vadd.f32 %v4291_v15, %v1409_v26  ;;  %v1411_v55 = vadd.f32 %v4292_v23, %v1409_v26  ;;  %v3270_v15 = vld [vmem:[%s4142_s1 + $0x18] sm:$0xff] }
  0xdb   :  { %v1423_v62 = vrot.slane %v3160_v37, %v2380_v18  ;;  %v1437_v7 = vrot.slane %v3160_v37, %v2383_v19  ;;  %v1451_v31 = vrot.slane %v3160_v37, %v2410_v28  ;;  %v1465_v22 = vrot.slane %v3160_v37, %v2429_v34 }
  0xdc   :  { %vm1398_vm0 = vcmp.gt.f32.partialorder %v1396_v48, %v1386_v32  ;;  %vm1399_vm1 = vcmp.gt.f32.partialorder %v1397_v57, %v1387_v27 }
  0xdd   :  { %v1400_v63 = vsel %vm1398_vm0, %v1396_v48, %v1386_v32  ;;  %v1401_v0 = vsel %vm1399_vm1, %v1397_v57, %v1387_v27  ;;  %v1402_v25 = vsel %vm1398_vm0, 10, %v1388_v33  ;;  %v1403_v12 = vsel %vm1399_vm1, 10, %v1389_v44  ;;  %v2239_v27 = vld [vmem:[%s4141_s0 + $0x60] sm:$0xff]  ;;  %v2241_v57 = vld [vmem:[%s4142_s1 + $0x10] sm:$0xff] }
  0xde   :  { %vm1412_vm3 = vcmp.gt.f32.partialorder %v1410_v45, %v1400_v63  ;;  %vm1413_vm4 = vcmp.gt.f32.partialorder %v1411_v55, %v1401_v0  ;;  %v1424_v46 = vadd.f32 %v4284_v58, %v1423_v62  ;;  %v1425_v49 = vadd.f32 %v3003_v3, %v1423_v62  ;;  %v3282_v62 = vld [vmem:[%s4142_s1 + $0x28] sm:$0xff] }
  0xdf   :  { %v1414_v47 = vsel %vm1412_vm3, %v1410_v45, %v1400_v63  ;;  %v1415_v1 = vsel %vm1413_vm4, %v1411_v55, %v1401_v0  ;;  %v1416_v52 = vsel %vm1412_vm3, 11, %v1402_v25  ;;  %v1417_v20 = vsel %vm1413_vm4, 11, %v1403_v12  ;;  %v2243_v55 = vld [vmem:[%s4142_s1 + $0x20] sm:$0xff] }
  0xe0   :  { %vm1426_vm7 = vcmp.gt.f32.partialorder %v1424_v46, %v1414_v47  ;;  %vm1427_vm8 = vcmp.gt.f32.partialorder %v1425_v49, %v1415_v1  ;;  %v1438_v58 = vadd.f32 %v3019_v8, %v1437_v7  ;;  %v1439_v3 = vadd.f32 %v3024_v56, %v1437_v7 }
  0xe1   :  { %v1428_v9 = vsel %vm1426_vm7, %v1424_v46, %v1414_v47  ;;  %v1429_v43 = vsel %vm1427_vm8, %v1425_v49, %v1415_v1  ;;  %v1430_v59 = vsel %vm1426_vm7, 12, %v1416_v52  ;;  %v1431_v21 = vsel %vm1427_vm8, 12, %v1417_v20  ;;  %v2247_v52 = vld [vmem:[%s4142_s1 + $0x40] sm:$0xff]  ;;  %v3319_v20 = vld [vmem:[%s4142_s1 + $0x48] sm:$0xff] }
  0xe2   :  { %vm1440_vm9 = vcmp.gt.f32.partialorder %v1438_v58, %v1428_v9  ;;  %vm1441_vm10 = vcmp.gt.f32.partialorder %v1439_v3, %v1429_v43  ;;  %v1452_v29 = vadd.f32 %v3233_v61, %v1451_v31  ;;  %v1453_v39 = vadd.f32 %v3238_v6, %v1451_v31  ;;  %v2245_v31 = vld [vmem:[%s4142_s1 + $0x30] sm:$0xff]  ;;  %4295 = vst [vmem:[#allocation11_spill] sm:$0xff] %v3319_v20 }
  0xe3   :  { %v1442_v24 = vsel %vm1440_vm9, %v1438_v58, %v1428_v9  ;;  %v1443_v53 = vsel %vm1441_vm10, %v1439_v3, %v1429_v43  ;;  %v1444_v54 = vsel %vm1440_vm9, 13, %v1430_v59  ;;  %v1445_v42 = vsel %vm1441_vm10, 13, %v1431_v21  ;;  %v2249_v43 = vld [vmem:[%s4142_s1 + $0x50] sm:$0xff]  ;;  %v3338_v59 = vld [vmem:[%s4142_s1 + $0x58] sm:$0xff] }
  0xe4   :  { %vm1454_vm11 = vcmp.gt.f32.partialorder %v1452_v29, %v1442_v24  ;;  %vm1455_vm13 = vcmp.gt.f32.partialorder %v1453_v39, %v1443_v53  ;;  %v1466_v8 = vadd.f32 %v3033_v2, %v1465_v22  ;;  %v1467_v56 = vadd.f32 %v3038_v4, %v1465_v22  ;;  %v1500_v2 = vld [vmem:[%s4142_s1] sm:$0xff]  ;;  %v3262_v4 = vld [vmem:[%s4142_s1 + $0x8] sm:$0xff]  ;;  %v3292_v22 = vld [vmem:[%s4142_s1 + $0x38] sm:$0xff]  ;;  %4296 = vst [vmem:[#allocation18_spill] sm:$0xff] %v3338_v59 }
  0xe5   :  { %v1456_v5 = vsel %vm1454_vm11, %v1452_v29, %v1442_v24  ;;  %v1457_v41 = vsel %vm1455_vm13, %v1453_v39, %v1443_v53  ;;  %v1458_v26 = vsel %vm1454_vm11, 14, %v1444_v54  ;;  %v1459_v32 = vsel %vm1455_vm13, 14, %v1445_v42  ;;  %v2240_v24 = vld [vmem:[%s4141_s0 + $0x68] sm:$0xff] }
  0xe6   :  { %vm1468_vm14 = vcmp.gt.f32.partialorder %v1466_v8, %v1456_v5  ;;  %vm1469_vm0 = vcmp.gt.f32.partialorder %v1467_v56, %v1457_v41 }
  0xe7   :  { %v1470_v33 = vsel %vm1468_vm14, %v1466_v8, %v1456_v5  ;;  %v3249_v44 = vsel %vm1468_vm14, 15, %v1458_v26  ;;  %v3252_v48 = vsel %vm1469_vm0, 15, %v1459_v32  ;;  %v1471_v21 = vsel %vm1469_vm0, %v1467_v56, %v1457_v41  ;;  %v2251_v41 = vld [vmem:[%s4142_s1 + $0x60] sm:$0xff]  ;;  %v3392_v26 = vld [vmem:[%s4142_s1 + $0x68] sm:$0xff] }
  0xe8   :  { %4293 = vst [vmem:[#allocation7_spill] sm:$0xff] %v3249_v44  ;;  %4294 = vst [vmem:[#allocation10_spill] sm:$0xff] %v3252_v48  ;;  %v3254_v16 = vadd.f32 %v2239_v27, %v1470_v33  ;;  %v3402_v33 = vadd.f32 %v2240_v24, %v1471_v21  ;;  %v2255_v21 = vld [vmem:[%s4142_s1 + $0x80] sm:$0xff]  ;;  %v3478_v24 = vld [vmem:[%s4142_s1 + $0x88] sm:$0xff] }
  0xe9   :  { %4297 = vst [vmem:[#allocation23_spill] sm:$0xff] %v3392_v26  ;;  %4300 = vst [vmem:[#allocation26_spill] sm:$0xff] %v3478_v24 }
  0xea   :  { %v1505_v45 = vrot.slane %v3254_v16, %v2353_v11  ;;  %v1513_v23 = vrot.slane %v3254_v16, %v2361_v13  ;;  %v1527_v7 = vrot.slane %v3254_v16, %v2364_v14  ;;  %v1541_v63 = vrot.slane %v3254_v16, %v2377_v17 }
  0xeb   :  { %v1555_v0 = vrot.slane %v3254_v16, %v2380_v18  ;;  %v1569_v58 = vrot.slane %v3254_v16, %v2383_v19  ;;  %v1583_v32 = vrot.slane %v3254_v16, %v2410_v28  ;;  %v1597_v27 = vrot.slane %v3254_v16, %v2429_v34 }
  0xec   :  { %v3298_v25 = vadd.f32 %v1505_v45, %v1500_v2  ;;  %v3301_v12 = vadd.f32 %v1505_v45, %v3262_v4  ;;  %v3303_v46 = vadd.f32 %v2241_v57, %v1513_v23  ;;  %v3306_v49 = vadd.f32 %v3270_v15, %v1513_v23  ;;  %v2253_v45 = vld [vmem:[%s4142_s1 + $0x70] sm:$0xff]  ;;  %v3424_v23 = vld [vmem:[%s4142_s1 + $0x78] sm:$0xff] }
  0xed   :  { %v3308_v47 = vadd.f32 %v2243_v55, %v1527_v7  ;;  %v3311_v1 = vadd.f32 %v3282_v62, %v1527_v7  ;;  %v3327_v3 = vadd.f32 %v2245_v31, %v1541_v63  ;;  %v3330_v9 = vadd.f32 %v3292_v22, %v1541_v63  ;;  %4298 = vst [vmem:[#allocation24_spill] sm:$0xff] %v3424_v23 }
  0xee   :  { %vm1516_vm1 = vcmp.gt.f32.partialorder %v3303_v46, %v3298_v25  ;;  %vm1517_vm3 = vcmp.gt.f32.partialorder %v3306_v49, %v3301_v12  ;;  %v3362_v53 = vadd.f32 %v2247_v52, %v1555_v0  ;;  %v3365_v54 = vadd.f32 %v3319_v20, %v1555_v0 }
  0xef   :  { %v3346_v29 = vsel %vm1516_vm1, %v3303_v46, %v3298_v25  ;;  %v3353_v39 = vsel %vm1517_vm3, %v3306_v49, %v3301_v12  ;;  %v3381_v56 = vadd.f32 %v2249_v43, %v1569_v58  ;;  %v3384_v5 = vadd.f32 %v3338_v59, %v1569_v58 }
  0xf0   :  { %vm1530_vm4 = vcmp.gt.f32.partialorder %v3308_v47, %v3346_v29  ;;  %vm1531_vm7 = vcmp.gt.f32.partialorder %v3311_v1, %v3353_v39  ;;  %v3430_v55 = vadd.f32 %v2251_v41, %v1583_v32  ;;  %v3433_v7 = vadd.f32 %v3392_v26, %v1583_v32 }
  0xf1   :  { %v3372_v42 = vsel %vm1530_vm4, %v3308_v47, %v3346_v29  ;;  %v3379_v8 = vsel %vm1531_vm7, %v3311_v1, %v3353_v39  ;;  %v3453_v0 = vadd.f32 %v2253_v45, %v1597_v27  ;;  %v3456_v52 = vadd.f32 %v3424_v23, %v1597_v27  ;;  %v4301_v27 = vld [vmem:[#allocation8_spill] sm:$0xff] }
  0xf2   :  { %vm1544_vm8 = vcmp.gt.f32.partialorder %v3327_v3, %v3372_v42  ;;  %vm1545_vm9 = vcmp.gt.f32.partialorder %v3330_v9, %v3379_v8  ;;  %v1611_v41 = vrot.slane %v3402_v33, %v2353_v11  ;;  %v1625_v32 = vrot.slane %v3402_v33, %v2361_v13 }
  0xf3   :  { %v3409_v2 = vsel %vm1544_vm8, %v3327_v3, %v3372_v42  ;;  %v3416_v57 = vsel %vm1545_vm9, %v3330_v9, %v3379_v8  ;;  %4299 = vst [vmem:[#allocation25_spill] sm:$0xff] %v3456_v52  ;;  %v1695_v47 = vrot.slane %v3402_v33, %v2410_v28 }
  0xf4   :  { %vm4189_vm10 = vcmp.gt.f32.partialorder %v3362_v53, %v3409_v2  ;;  %vm4186_vm11 = vcmp.gt.f32.partialorder %v3365_v54, %v3416_v57  ;;  %v3515_v30 = vadd.f32 %v2255_v21, %v1611_v41  ;;  %v3518_v48 = vadd.f32 %v3478_v24, %v1611_v41  ;;  %v2259_v24 = vld [vmem:[%s4142_s1 + $0xa0] sm:$0xff] }
  0xf5   :  { %v3440_v31 = vsel %vm4189_vm10, %v3362_v53, %v3409_v2  ;;  %v3447_v63 = vsel %vm4186_vm11, %v3365_v54, %v3416_v57  ;;  %v3538_v21 = vadd.f32 %v2257_v50, %v1625_v32  ;;  %v3541_v41 = vadd.f32 %v3509_v60, %v1625_v32  ;;  %v3566_v32 = vld [vmem:[%s4142_s1 + $0xa8] sm:$0xff]  ;;  %v2261_v60 = vld [vmem:[%s4142_s1 + $0xb0] sm:$0xff] }
  0xf6   :  { %vm4183_vm13 = vcmp.gt.f32.partialorder %v3381_v56, %v3440_v31  ;;  %vm4184_vm14 = vcmp.gt.f32.partialorder %v3384_v5, %v3447_v63  ;;  %4305 = vst [vmem:[#allocation29_spill] sm:$0xff] %v3515_v30  ;;  %4306 = vst [vmem:[#allocation30_spill] sm:$0xff] %v3518_v48  ;;  %v3736_v3 = vadd.f32 %v3233_v61, %v1695_v47 }
  0xf7   :  { %v3463_v58 = vsel %vm4183_vm13, %v3381_v56, %v3440_v31  ;;  %v3470_v43 = vsel %vm4184_vm14, %v3384_v5, %v3447_v63  ;;  %vm1491_vm14 = vcmp.eq.s32.totalorder %v4301_v27, 7  ;;  %4309 = vst [vmem:[#allocation33_spill] sm:$0xff] %v3538_v21  ;;  %4311 = vst [vmem:[#allocation35_spill] sm:$0xff] %v3566_v32  ;;  %v3739_v42 = vadd.f32 %v3238_v6, %v1695_v47 }
  0xf8   :  { %vm4185_vm0 = vcmp.gt.f32.partialorder %v3430_v55, %v3463_v58  ;;  %vm4188_vm13 = vcmp.gt.f32.partialorder %v3433_v7, %v3470_v43  ;;  %v1492_v26 = vsel %vm1491_vm14, 1, %v4244_v40  ;;  %vm1735_vm14 = vcmp.eq.s32.totalorder %v4301_v27, 8 }
  0xf9   :  { %v3494_v45 = vsel %vm4185_vm0, %v3430_v55, %v3463_v58  ;;  %v3501_v51 = vsel %vm4188_vm13, %v3433_v7, %v3470_v43 }
  0xfa   :  { %4302 = vst [vmem:[#allocation8_spill] sm:$0xff] %v3494_v45  ;;  %4303 = vst [vmem:[#allocation27_spill] sm:$0xff] %v3501_v51  ;;  %vm1600_vm0 = vcmp.gt.f32.partialorder %v3453_v0, %v3494_v45  ;;  %vm1601_vm11 = vcmp.gt.f32.partialorder %v3456_v52, %v3501_v51 }
  0xfb   :  { %v3525_v44 = vsel %vm1600_vm0, %v3453_v0, %v3494_v45  ;;  %v3532_v23 = vsel %vm1601_vm11, %v3456_v52, %v3501_v51 }
  0xfc   :  { %4307 = vst [vmem:[#allocation31_spill] sm:$0xff] %v3525_v44  ;;  %4308 = vst [vmem:[#allocation32_spill] sm:$0xff] %v3532_v23  ;;  %vm4196_vm13 = vcmp.gt.f32.partialorder %v3515_v30, %v3525_v44  ;;  %vm4195_vm10 = vcmp.gt.f32.partialorder %v3518_v48, %v3532_v23 }
  0xfd   :  { %v3554_v59 = vsel %vm4196_vm13, %v3515_v30, %v3525_v44  ;;  %v3561_v50 = vsel %vm4195_vm10, %v3518_v48, %v3532_v23  ;;  %v3574_v44 = vld [vmem:[%s4142_s1 + $0xb8] sm:$0xff]  ;;  %v1639_v23 = vrot.slane %v3402_v33, %v2364_v14  ;;  %v1653_v48 = vrot.slane %v3402_v33, %v2377_v17 }
  0xfe   :  { %4310 = vst [vmem:[#allocation34_spill] sm:$0xff] %v3554_v59  ;;  %4312 = vst [vmem:[#allocation36_spill] sm:$0xff] %v3574_v44  ;;  %vm4207_vm10 = vcmp.gt.f32.partialorder %v3538_v21, %v3554_v59  ;;  %vm4206_vm13 = vcmp.gt.f32.partialorder %v3541_v41, %v3561_v50  ;;  %v1520_v30 = vsel %vm1516_vm1, 1, %v4244_v40  ;;  %vm255_vm1 = vcmp.gt.s32.totalorder %v4301_v27, 1 }
  0xff   :  { %v3594_v20 = vsel %vm4207_vm10, %v3538_v21, %v3554_v59  ;;  %v3601_v51 = vsel %vm4206_vm13, %v3541_v41, %v3561_v50  ;;  %v3603_v52 = vadd.f32 %v2259_v24, %v1639_v23  ;;  %v3606_v45 = vadd.f32 %v3566_v32, %v1639_v23  ;;  %v2263_v21 = vld [vmem:[%s4142_s1 + $0xc0] sm:$0xff]  ;;  %v3621_v24 = vld [vmem:[%s4142_s1 + $0xc8] sm:$0xff]  ;;  %v2265_v32 = vld [vmem:[%s4142_s1 + $0xd0] sm:$0xff] }
 0x100   :  { %4313 = vst [vmem:[#allocation37_spill] sm:$0xff] %v3594_v20  ;;  %4314 = vst [vmem:[#allocation38_spill] sm:$0xff] %v3601_v51  ;;  %v3608_v25 = vadd.f32 %v2261_v60, %v1653_v48  ;;  %v3611_v46 = vadd.f32 %v3574_v44, %v1653_v48  ;;  %v1496_v59 = vrot.slane %v1492_v26, %v2353_v11  ;;  %v1736_v48 = vsel %vm1735_vm14, 1, %v4244_v40 }
 0x101   :  { %4315 = vst [vmem:[#allocation39_spill] sm:$0xff] %v3606_v45  ;;  %4316 = vst [vmem:[#allocation40_spill] sm:$0xff] %v3621_v24  ;;  %v1667_v60 = vrot.slane %v3402_v33, %v2380_v18  ;;  %v1521_v26 = vsel %vm1517_vm3, 1, %v4244_v40  ;;  %vm1642_vm13 = vcmp.gt.f32.partialorder %v3603_v52, %v3594_v20  ;;  %vm1643_vm10 = vcmp.gt.f32.partialorder %v3606_v45, %v3601_v51 }
 0x102   :  { %v1681_v23 = vrot.slane %v3402_v33, %v2383_v19  ;;  %v1534_v44 = vsel %vm1530_vm4, 2, %v1520_v30  ;;  %v3646_v12 = vsel %vm1642_vm13, %v3603_v52, %v3594_v20  ;;  %v3653_v49 = vsel %vm1643_vm10, %v3606_v45, %v3601_v51  ;;  %v3661_v30 = vld [vmem:[%s4142_s1 + $0xd8] sm:$0xff]  ;;  %v4364_v52 = vld [vmem:[#allocation28_spill] sm:$0xff] }
 0x103   :  { %4317 = vst [vmem:[#allocation41_spill] sm:$0xff] %v3653_v49  ;;  %4318 = vst [vmem:[#allocation42_spill] sm:$0xff] %v3661_v30  ;;  %vm4213_vm3 = vcmp.gt.f32.partialorder %v3608_v25, %v3646_v12  ;;  %vm1657_vm4 = vcmp.gt.f32.partialorder %v3611_v46, %v3653_v49  ;;  %v3669_v29 = vadd.f32 %v2263_v21, %v1667_v60  ;;  %v1535_v45 = vsel %vm1531_vm7, 2, %v1521_v26 }
 0x104   :  { %v3672_v51 = vadd.f32 %v3621_v24, %v1667_v60  ;;  %v3682_v20 = vsel %vm4213_vm3, %v3608_v25, %v3646_v12  ;;  %v3689_v21 = vsel %vm1657_vm4, %v3611_v46, %v3653_v49  ;;  %v1709_v60 = vrot.slane %v3402_v33, %v2429_v34 }
 0x105   :  { %vm4216_vm7 = vcmp.gt.f32.partialorder %v3669_v29, %v3682_v20  ;;  %v3697_v1 = vadd.f32 %v2265_v32, %v1681_v23  ;;  %v3700_v39 = vadd.f32 %v3661_v30, %v1681_v23  ;;  %vm3702_vm3 = vcmp.eq.s32.totalorder %v1496_v59, 1  ;;  %v2269_v32 = vld [vmem:[%s4142_s1 + $0xf0] sm:$0xff] }
 0x106   :  { %vm4218_vm14 = vcmp.gt.f32.partialorder %v3672_v51, %v3689_v21  ;;  %v1548_v24 = vsel %vm1544_vm8, 3, %v1534_v44  ;;  %v3714_v49 = vsel %vm4216_vm7, %v3669_v29, %v3682_v20  ;;  %v3729_v44 = vld [vmem:[%s4142_s1 + $0xf8] sm:$0xff]  ;;  %v1549_v23 = vsel %vm1545_vm9, 3, %v1535_v45 }
 0x107   :  { %v3721_v59 = vsel %vm4218_vm14, %v3672_v51, %v3689_v21  ;;  %4321 = vst [vmem:[#allocation43_spill] sm:$0xff] %v3729_v44  ;;  %vm4225_vm8 = vcmp.gt.f32.partialorder %v3697_v1, %v3714_v49  ;;  %v1740_v47 = vrot.slane %v1736_v48, %v2353_v11  ;;  %v3763_v9 = vadd.f32 %v2269_v32, %v1709_v60  ;;  %v2271_v32 = vld [vmem:[%s4141_s0 + $0x70] sm:$0xff] }
 0x108   :  { %vm4224_vm7 = vcmp.gt.f32.partialorder %v3700_v39, %v3721_v59  ;;  %v3749_v30 = vsel %vm4225_vm8, %v3697_v1, %v3714_v49  ;;  %v3766_v8 = vadd.f32 %v3729_v44, %v1709_v60  ;;  %v256_v60 = vsel %vm255_vm1, 1, %v4244_v40 }
 0x109   :  { %4322 = vst [vmem:[#allocation44_spill] sm:$0xff] %v3749_v30  ;;  %v3756_v61 = vsel %vm4224_vm7, %v3700_v39, %v3721_v59  ;;  %vm4223_vm14 = vcmp.gt.f32.partialorder %v3736_v3, %v3749_v30  ;;  %v4325_v44 = vsel %vm3150_vm6, %v3158_v35, %v3072_v38  ;;  %vm4327_vm7 = vcmp.gt.f32.partialorder %v3365_v54, %v3416_v57 }
 0x10a   :  { %4323 = vst [vmem:[#allocation45_spill] sm:$0xff] %v3756_v61  ;;  %vm4221_vm9 = vcmp.gt.f32.partialorder %v3739_v42, %v3756_v61  ;;  %v3773_v45 = vsel %vm4223_vm14, %v3736_v3, %v3749_v30  ;;  %v1498_v30 = vsel %vm3702_vm3, %v3254_v16, %v4325_v44  ;;  %v1563_v27 = vsel %vm4327_vm7, 4, %v1549_v23 }
 0x10b   :  { %v3780_v48 = vsel %vm4221_vm9, %v3739_v42, %v3756_v61  ;;  %vm4326_vm9 = vcmp.gt.f32.partialorder %v3362_v53, %v3409_v2  ;;  %vm4226_vm14 = vcmp.gt.f32.partialorder %v3763_v9, %v3773_v45  ;;  %vm3811_vm8 = vcmp.eq.s32.totalorder %v1740_v47, 1  ;;  %v3818_v53 = vld [vmem:[%s4143_s2] sm:$0x1] }
 0x10c   :  { %4324 = vst [vmem:[#allocation46_spill] sm:$0xff] %v3780_v48  ;;  %v1562_v61 = vsel %vm4326_vm9, 4, %v1548_v24  ;;  %vm4228_vm1 = vcmp.gt.f32.partialorder %v3766_v8, %v3780_v48  ;;  %v1714_v38 = vsel %vm4226_vm14, %v3763_v9, %v3773_v45  ;;  %vm498_vm7 = vcmp.gt.s32.totalorder %v3818_v53, 2 }
 0x10d   :  { %v1733_v16 = vadd.f32 %v2271_v32, %v1714_v38  ;;  %vm4330_vm9 = vcmp.gt.f32.partialorder %v3381_v56, %v3440_v31  ;;  %v260_v2 = vrot.slane %v256_v60, %v2353_v11  ;;  %vm4331_vm14 = vcmp.gt.f32.partialorder %v3384_v5, %v3447_v63  ;;  %v2272_v56 = vld [vmem:[%s4141_s0 + $0x78] sm:$0xff]  ;;  %v4333_v38 = vld [vmem:[#allocation3_spill] sm:$0xff] }
 0x10e   :  { %v1576_v54 = vsel %vm4330_vm9, 5, %v1562_v61  ;;  %v1577_v57 = vsel %vm4331_vm14, 5, %v1563_v27  ;;  %v1715_v24 = vsel %vm4228_vm1, %v3766_v8, %v3780_v48  ;;  %v499_v61 = vsel %vm498_vm7, 1, %v4244_v40 }
 0x10f   :  { %v1742_v44 = vsel %vm3811_vm8, %v1733_v16, %v1498_v30  ;;  %vm4332_vm14 = vcmp.gt.f32.partialorder %v3430_v55, %v3463_v58  ;;  %v3851_v16 = vadd.s32 8, %v4333_v38  ;;  %vm3853_vm9 = vcmp.eq.s32.totalorder %v260_v2, 1 }
 0x110   :  { %v1748_v31 = vrot.slane %v1742_v44, %v2353_v11  ;;  %v1754_v23 = vrot.slane %v1742_v44, %v2361_v13  ;;  %v1763_v5 = vrot.slane %v1742_v44, %v2364_v14  ;;  %v1772_v63 = vrot.slane %v1742_v44, %v2377_v17 }
 0x111   :  { %v1590_v47 = vsel %vm4332_vm14, 6, %v1576_v54  ;;  %v1781_v27 = vrot.slane %v1742_v44, %v2380_v18  ;;  %vm4336_vm7 = vcmp.gt.f32.partialorder %v3433_v7, %v3470_v43  ;;  %v1734_v58 = vadd.f32 %v2272_v56, %v1715_v24  ;;  %v4347_v7 = vld [vmem:[#allocation30_spill] sm:$0xff]  ;;  %v4348_v56 = vld [vmem:[#allocation32_spill] sm:$0xff] }
 0x112   :  { %v1749_v30 = vadd.f32 %v1748_v31, %v3262_v4  ;;  %v1755_v32 = vadd.f32 %v3270_v15, %v1754_v23  ;;  %v1764_v60 = vadd.f32 %v3282_v62, %v1763_v5  ;;  %v1591_v55 = vsel %vm4336_vm7, 6, %v1577_v57 }
 0x113   :  { %v4337_v4 = vsel %vm3150_vm6, %v3160_v37, %v3082_v10  ;;  %v1773_v62 = vadd.f32 %v3292_v22, %v1772_v63  ;;  %v1790_v54 = vrot.slane %v1742_v44, %v2383_v19  ;;  %v503_v2 = vrot.slane %v499_v61, %v2353_v11  ;;  %v4342_v63 = vld [vmem:[#allocation29_spill] sm:$0xff]  ;;  %v4343_v61 = vld [vmem:[#allocation31_spill] sm:$0xff]  ;;  %v4354_v10 = vld [vmem:[#allocation34_spill] sm:$0xff] }
 0x114   :  { %v1499_v15 = vsel %vm3702_vm3, %v3402_v33, %v4337_v4  ;;  %vm1756_vm14 = vcmp.gt.f32.partialorder %v1755_v32, %v1749_v30  ;;  %v1604_v43 = vsel %vm1600_vm0, 7, %v1590_v47  ;;  %v1605_v37 = vsel %vm1601_vm11, 7, %v1591_v55  ;;  %v4341_v33 = vld [vmem:[#allocation11_spill] sm:$0xff] }
 0x115   :  { %v1757_v57 = vsel %vm1756_vm14, %v1755_v32, %v1749_v30  ;;  %v1758_v24 = vsel %vm1756_vm14, 1, %v4244_v40  ;;  %v1782_v31 = vadd.f32 %v4341_v33, %v1781_v27  ;;  %v1799_v22 = vrot.slane %v1742_v44, %v2410_v28  ;;  %v4345_v30 = vld [vmem:[#allocation18_spill] sm:$0xff] }
 0x116   :  { %vm1765_vm7 = vcmp.gt.f32.partialorder %v1764_v60, %v1757_v57  ;;  %vm742_vm1 = vcmp.gt.s32.totalorder %v3818_v53, 3  ;;  %v3883_v23 = vsel %vm3811_vm8, %v1734_v58, %v1499_v15  ;;  %vm4344_vm0 = vcmp.gt.f32.partialorder %v4342_v63, %v4343_v61  ;;  %v4346_v27 = vld [vmem:[#allocation14_spill] sm:$0xff]  ;;  %v4358_v63 = vld [vmem:[#allocation15_spill] sm:$0xff] }
 0x117   :  { %v1766_v0 = vsel %vm1765_vm7, %v1764_v60, %v1757_v57  ;;  %v1767_v5 = vsel %vm1765_vm7, 2, %v1758_v24  ;;  %v1618_v47 = vsel %vm4344_vm0, 8, %v1604_v43  ;;  %v1791_v32 = vadd.f32 %v4345_v30, %v1790_v54  ;;  %v4352_v43 = vld [vmem:[#allocation23_spill] sm:$0xff]  ;;  %v4353_v24 = vld [vmem:[#allocation33_spill] sm:$0xff]  ;;  %v4359_v30 = vld [vmem:[#allocation12_spill] sm:$0xff] }
 0x118   :  { %vm1774_vm14 = vcmp.gt.f32.partialorder %v1773_v62, %v1766_v0  ;;  %v1808_v55 = vrot.slane %v1742_v44, %v2429_v34  ;;  %v262_v4 = vsel %vm3853_vm9, %v4346_v27, 0  ;;  %vm4349_vm11 = vcmp.gt.f32.partialorder %v4347_v7, %v4348_v56 }
 0x119   :  { %v1619_v35 = vsel %vm4349_vm11, 8, %v1605_v37  ;;  %v1775_v58 = vsel %vm1774_vm14, %v1773_v62, %v1766_v0  ;;  %v1776_v60 = vsel %vm1774_vm14, 3, %v1767_v5  ;;  %vm3896_vm8 = vcmp.eq.s32.totalorder %v503_v2, 1 }
 0x11a   :  { %vm1783_vm7 = vcmp.gt.f32.partialorder %v1782_v31, %v1775_v58  ;;  %v1800_v57 = vadd.f32 %v4352_v43, %v1799_v22  ;;  %v1817_v44 = vrot.slane %v3883_v23, %v2353_v11  ;;  %v3906_v54 = vsel %vm742_vm1, 1, %v4244_v40  ;;  %v4357_v22 = vld [vmem:[#allocation24_spill] sm:$0xff] }
 0x11b   :  { %vm4355_vm0 = vcmp.gt.f32.partialorder %v4353_v24, %v4354_v10  ;;  %v1784_v37 = vsel %vm1783_vm7, %v1782_v31, %v1775_v58  ;;  %v1785_v2 = vsel %vm1783_vm7, 4, %v1776_v60  ;;  %vm4356_vm14 = vcmp.gt.f32.partialorder %v3541_v41, %v3561_v50  ;;  %v4361_v50 = vld [vmem:[#allocation26_spill] sm:$0xff] }
 0x11c   :  { %v1632_v62 = vsel %vm4355_vm0, 9, %v1618_v47  ;;  %v1633_v33 = vsel %vm4356_vm14, 9, %v1619_v35  ;;  %vm1792_vm11 = vcmp.gt.f32.partialorder %v1791_v32, %v1784_v37  ;;  %v1809_v0 = vadd.f32 %v4357_v22, %v1808_v55  ;;  %v4374_v58 = vld [vmem:[#allocation42_spill] sm:$0xff] }
 0x11d   :  { %v1826_v5 = vrot.slane %v3883_v23, %v2361_v13  ;;  %v263_v61 = vsel %vm3853_vm9, %v4358_v63, 0  ;;  %v505_v47 = vsel %vm3896_vm8, %v4359_v30, 0  ;;  %v1793_v31 = vsel %vm1792_vm11, %v1791_v32, %v1784_v37  ;;  %v4379_v37 = vld [vmem:[#allocation43_spill] sm:$0xff] }
 0x11e   :  { %v1794_v7 = vsel %vm1792_vm11, 5, %v1785_v2  ;;  %v1646_v41 = vsel %vm1642_vm13, 10, %v1632_v62  ;;  %vm1801_vm1 = vcmp.gt.f32.partialorder %v1800_v57, %v1793_v31  ;;  %v1818_v55 = vadd.f32 %v4361_v50, %v1817_v44  ;;  %v4367_v2 = vld [vmem:[#allocation35_spill] sm:$0xff] }
 0x11f   :  { %v1835_v13 = vrot.slane %v3883_v23, %v2364_v14  ;;  %v747_v35 = vrot.slane %v3906_v54, %v2353_v11  ;;  %v1647_v43 = vsel %vm1643_vm10, 10, %v1633_v33  ;;  %v1802_v24 = vsel %vm1801_vm1, %v1800_v57, %v1793_v31 }
 0x120   :  { %v1803_v32 = vsel %vm1801_vm1, 6, %v1794_v7  ;;  %vm986_vm7 = vcmp.gt.s32.totalorder %v3818_v53, 4  ;;  %vm1810_vm0 = vcmp.gt.f32.partialorder %v1809_v0, %v1802_v24  ;;  %v1827_v10 = vadd.f32 %v4364_v52, %v1826_v5 }
 0x121   :  { %v1844_v44 = vrot.slane %v3883_v23, %v2377_v17  ;;  %vm1230_vm13 = vcmp.gt.s32.totalorder %v3818_v53, 5  ;;  %vm4365_vm14 = vcmp.gt.f32.partialorder %v3608_v25, %v3646_v12  ;;  %v1811_v54 = vsel %vm1810_vm0, %v1809_v0, %v1802_v24  ;;  %v4369_v12 = vld [vmem:[#allocation36_spill] sm:$0xff] }
 0x122   :  { %v1660_v14 = vsel %vm4365_vm14, 11, %v1646_v41  ;;  %v1812_v62 = vsel %vm1810_vm0, 7, %v1803_v32  ;;  %v1661_v57 = vsel %vm1657_vm4, 11, %v1647_v43  ;;  %vm1819_vm10 = vcmp.gt.f32.partialorder %v1818_v55, %v1811_v54 }
 0x123   :  { %v1836_v33 = vadd.f32 %v4367_v2, %v1835_v13  ;;  %v1853_v22 = vrot.slane %v3883_v23, %v2380_v18  ;;  %vm1474_vm11 = vcmp.gt.s32.totalorder %v3818_v53, 6  ;;  %vm1718_vm1 = vcmp.gt.s32.totalorder %v3818_v53, 7 }
 0x124   :  { %v1820_v17 = vsel %vm1819_vm10, %v1818_v55, %v1811_v54  ;;  %v1821_v5 = vsel %vm1819_vm10, 8, %v1812_v62  ;;  %vm4368_vm14 = vcmp.gt.f32.partialorder %v3669_v29, %v3682_v20  ;;  %v1845_v46 = vadd.f32 %v4369_v12, %v1844_v44  ;;  %v4371_v20 = vld [vmem:[#allocation40_spill] sm:$0xff] }
 0x125   :  { %v1674_v25 = vsel %vm4368_vm14, 12, %v1660_v14  ;;  %vm1828_vm0 = vcmp.gt.f32.partialorder %v1827_v10, %v1820_v17  ;;  %v1862_v0 = vrot.slane %v3883_v23, %v2383_v19  ;;  %v987_v18 = vsel %vm986_vm7, 1, %v4244_v40 }
 0x126   :  { %vm4370_vm4 = vcmp.gt.f32.partialorder %v3672_v51, %v3689_v21  ;;  %v1829_v7 = vsel %vm1828_vm0, %v1827_v10, %v1820_v17  ;;  %v1830_v56 = vsel %vm1828_vm0, 9, %v1821_v5  ;;  %v1475_v41 = vsel %vm1474_vm11, 1, %v4244_v40 }
 0x127   :  { %v1675_v31 = vsel %vm4370_vm4, 12, %v1661_v57  ;;  %vm1837_vm10 = vcmp.gt.f32.partialorder %v1836_v33, %v1829_v7  ;;  %v1854_v29 = vadd.f32 %v4371_v20, %v1853_v22  ;;  %v1871_v50 = vrot.slane %v3883_v23, %v2410_v28  ;;  %v4396_v20 = vld [vmem:[#allocation7_spill] sm:$0xff] }
 0x128   :  { %vm4372_vm14 = vcmp.gt.f32.partialorder %v3697_v1, %v3714_v49  ;;  %v1719_v55 = vsel %vm1718_vm1, 1, %v4244_v40  ;;  %v1838_v51 = vsel %vm1837_vm10, %v1836_v33, %v1829_v7  ;;  %v1839_v21 = vsel %vm1837_vm10, 10, %v1830_v56  ;;  %v4383_v33 = vld [vmem:[#allocation46_spill] sm:$0xff] }
 0x129   :  { %v1688_v19 = vsel %vm4372_vm14, 13, %v1674_v25  ;;  %vm4373_vm7 = vcmp.gt.f32.partialorder %v3700_v39, %v3721_v59  ;;  %vm1846_vm11 = vcmp.gt.f32.partialorder %v1845_v46, %v1838_v51  ;;  %v1863_v60 = vadd.f32 %v4374_v58, %v1862_v0  ;;  %v4375_v59 = vld [vmem:[#allocation44_spill] sm:$0xff]  ;;  %v4395_v56 = vld [vmem:[#allocation6_spill] sm:$0xff]  ;;  %v4400_v58 = vld [vmem:[#allocation9_spill] sm:$0xff] }
 0x12a   :  { %v1689_v13 = vsel %vm4373_vm7, 13, %v1675_v31  ;;  %v1880_v28 = vrot.slane %v3883_v23, %v2429_v34  ;;  %v1231_v49 = vsel %vm1230_vm13, 1, %v4244_v40  ;;  %v1479_v1 = vrot.slane %v1475_v41, %v2353_v11  ;;  %v4377_v23 = vld [vmem:[#allocation45_spill] sm:$0xff] }
 0x12b   :  { %v1847_v43 = vsel %vm1846_vm11, %v1845_v46, %v1838_v51  ;;  %v1848_v24 = vsel %vm1846_vm11, 11, %v1839_v21  ;;  %v1723_v32 = vrot.slane %v1719_v55, %v2353_v11  ;;  %v1872_v39 = vadd.f32 %v3238_v6, %v1871_v50  ;;  %v4394_v46 = vld [vmem:[#allocation5_spill] sm:$0xff]  ;;  %v4398_v55 = vld [vmem:[#allocation20_spill] sm:$0xff] }
 0x12c   :  { %vm1855_vm1 = vcmp.gt.f32.partialorder %v1854_v29, %v1847_v43  ;;  %vm2018_vm0 = vcmp.eq.s32.totalorder %v3818_v53, 1  ;;  %vm4376_vm4 = vcmp.gt.f32.partialorder %v3736_v3, %v4375_v59  ;;  %vm4378_vm10 = vcmp.gt.f32.partialorder %v3739_v42, %v4377_v23  ;;  %v4399_v21 = vld [vmem:[#allocation21_spill] sm:$0xff] }
 0x12d   :  { %v1702_v52 = vsel %vm4376_vm4, 14, %v1688_v19  ;;  %v1703_v10 = vsel %vm4378_vm10, 14, %v1689_v13  ;;  %v1856_v44 = vsel %vm1855_vm1, %v1854_v29, %v1847_v43  ;;  %v1857_v14 = vsel %vm1855_vm1, 12, %v1848_v24 }
 0x12e   :  { %v991_v54 = vrot.slane %v987_v18, %v2353_v11  ;;  %v1235_v62 = vrot.slane %v1231_v49, %v2353_v11  ;;  %vm1864_vm13 = vcmp.gt.f32.partialorder %v1863_v60, %v1856_v44  ;;  %v1881_v57 = vadd.f32 %v4379_v37, %v1880_v28  ;;  %v4401_v28 = vld [vmem:[#allocation19_spill] sm:$0xff] }
 0x12f   :  { %vm3994_vm14 = vcmp.eq.s32.totalorder %v747_v35, 1  ;;  %v1865_v53 = vsel %vm1864_vm13, %v1863_v60, %v1856_v44  ;;  %v1866_v3 = vsel %vm1864_vm13, 13, %v1857_v14  ;;  %v2019_v2 = vsel %vm2018_vm0, 1, %v4244_v40  ;;  %v4387_v35 = vld [vmem:[#allocation16_spill] sm:$0xff] }
 0x130   :  { %vm4382_vm7 = vcmp.gt.f32.partialorder %v3763_v9, %v3773_v45  ;;  %vm4384_vm11 = vcmp.gt.f32.partialorder %v3766_v8, %v4383_v33  ;;  %vm4005_vm1 = vcmp.eq.s32.totalorder %v1723_v32, 1  ;;  %vm1873_vm4 = vcmp.gt.f32.partialorder %v1872_v39, %v1865_v53 }
 0x131   :  { %v1716_v42 = vsel %vm4382_vm7, 15, %v1702_v52  ;;  %v1717_v22 = vsel %vm4384_vm11, 15, %v1703_v10  ;;  %v506_v5 = vsel %vm3896_vm8, %v4387_v35, 0  ;;  %vm4012_vm10 = vcmp.eq.s32.totalorder %v1479_v1, 1 }
 0x132   :  { %v1874_v40 = vsel %vm1873_vm4, %v1872_v39, %v1865_v53  ;;  %v1875_v9 = vsel %vm1873_vm4, 14, %v1866_v3  ;;  %vm4016_vm0 = vcmp.eq.s32.totalorder %v991_v54, 1  ;;  %vm4020_vm13 = vcmp.eq.s32.totalorder %v1235_v62, 1 }
 0x133   :  { %vm1882_vm7 = vcmp.gt.f32.partialorder %v1881_v57, %v1874_v40  ;;  %v2023_v12 = vrot.slane %v2019_v2, %v2353_v11  ;;  %v749_v0 = vsel %vm3994_vm14, %v4394_v46, 0  ;;  %v1725_v18 = vsel %vm4005_vm1, %v1716_v42, 0  ;;  %v4397_v11 = vld [vmem:[#allocation10_spill] sm:$0xff] }
 0x134   :  { %v1726_v31 = vsel %vm4005_vm1, %v1717_v22, 0  ;;  %v1883_v7 = vsel %vm1882_vm7, 15, %v1875_v9  ;;  %v750_v41 = vsel %vm3994_vm14, %v4395_v56, 0  ;;  %v1481_v29 = vsel %vm4012_vm10, %v4396_v20, 0 }
 0x135   :  { %v1482_v50 = vsel %vm4012_vm10, %v4397_v11, 0  ;;  %v1888_v19 = vrot.slane %v1883_v7, %v2429_v34  ;;  %v993_v51 = vsel %vm4016_vm0, %v4398_v55, 0  ;;  %v994_v13 = vsel %vm4016_vm0, %v4399_v21, 0 }
 0x136   :  { %v1237_v60 = vsel %vm4020_vm13, %v4400_v58, 0  ;;  %v1238_v49 = vsel %vm4020_vm13, %v4401_v28, 0  ;;  %vm4059_vm11 = vcmp.eq.s32.totalorder %v2023_v12, 1  ;;  %vm1930_vm13 = vcmp.eq.s32.totalorder %v4333_v38, 5 }
 0x137   :  { %v1892_v1 = vsel %vm3702_vm3, %v1888_v19, %v1725_v18  ;;  %v1893_v34 = vsel %vm3702_vm3, %v1888_v19, %v1726_v31  ;;  %vm1894_vm14 = vcmp.eq.s32.totalorder %v4333_v38, %v1888_v19  ;;  %vm1895_vm1 = vcmp.eq.s32.totalorder %v3851_v16, %v1888_v19 }
 0x138   :  { %v1896_v24 = vsel %vm1894_vm14, %v1892_v1, 0  ;;  %v1913_v32 = vsel %vm3150_vm6, %v1888_v19, %v1481_v29  ;;  %v1914_v39 = vsel %vm3150_vm6, %v1888_v19, %v1482_v50  ;;  %v1897_v59 = vsel %vm1895_vm1, %v1893_v34, 0 }
 0x139   :  { %v1934_v26 = vsel %vm3058_vm12, %v1888_v19, %v1237_v60  ;;  %v1935_v23 = vsel %vm3058_vm12, %v1888_v19, %v1238_v49  ;;  %v1955_v44 = vsel %vm2799_vm5, %v1888_v19, %v993_v51  ;;  %vm1898_vm3 = vcmp.gt.s32.totalorder %v1896_v24, %v1897_v59 }
 0x13a   :  { %v1956_v14 = vsel %vm2799_vm5, %v1888_v19, %v994_v13  ;;  %v4078_v62 = vsel %vm2697_vm2, %v1888_v19, %v749_v0  ;;  %v4082_v36 = vsel %vm2697_vm2, %v1888_v19, %v750_v41  ;;  %v1899_v37 = vsel %vm1898_vm3, %v1896_v24, %v1897_v59 }
 0x13b   :  { %v4090_v6 = vsel %vm2593_vm15, %v1888_v19, %v505_v47  ;;  %v4094_v53 = vsel %vm2593_vm15, %v1888_v19, %v506_v5  ;;  %v4102_v3 = vsel %vm4059_vm11, %v1888_v19, %v262_v4  ;;  %v1900_v2 = vrot.slane %v1899_v37, 4 }
 0x13c   :  { %v4110_v15 = vsel %vm4059_vm11, %v1888_v19, %v263_v61  ;;  %vm1884_vm15 = vcmp.eq.s32.totalorder %v4333_v38, 7  ;;  %vm1909_vm12 = vcmp.eq.s32.totalorder %v4333_v38, 6 }
 0x13d   :  { %vm1901_vm2 = vcmp.gt.s32.totalorder %v1899_v37, %v1900_v2  ;;  %v1889_v33 = vsel %vm1884_vm15, %v1888_v19, 0  ;;  %vm1951_vm15 = vcmp.eq.s32.totalorder %v4333_v38, 4 }
 0x13e   :  { %v1902_v30 = vsel %vm1901_vm2, %v1899_v37, %v1900_v2 }
 0x13f   :  { %v1903_v47 = vrot.slane %v1902_v30, 2 }
 0x141   :  { %vm1904_vm5 = vcmp.gt.s32.totalorder %v1902_v30, %v1903_v47 }
 0x142   :  { %v1905_v27 = vsel %vm1904_vm5, %v1902_v30, %v1903_v47 }
 0x143   :  { %v1906_v42 = vrot.slane %v1905_v27, 1 }
 0x145   :  { %vm1907_vm6 = vcmp.gt.s32.totalorder %v1905_v27, %v1906_v42 }
 0x146   :  { %v1908_v4 = vsel %vm1907_vm6, %v1905_v27, %v1906_v42 }
 0x147   :  { %v1910_v48 = vsel %vm1909_vm12, %v1908_v4, %v1889_v33  ;;  %vm1915_vm9 = vcmp.eq.s32.totalorder %v4333_v38, %v1908_v4  ;;  %vm1916_vm8 = vcmp.eq.s32.totalorder %v3851_v16, %v1908_v4 }
 0x148   :  { %v1917_v63 = vsel %vm1915_vm9, %v1913_v32, 0  ;;  %v1918_v61 = vsel %vm1916_vm8, %v1914_v39, 0 }
 0x149   :  { %vm1919_vm4 = vcmp.gt.s32.totalorder %v1917_v63, %v1918_v61 }
 0x14a   :  { %v1920_v22 = vsel %vm1919_vm4, %v1917_v63, %v1918_v61 }
 0x14b   :  { %v1921_v17 = vrot.slane %v1920_v22, 4 }
 0x14d   :  { %vm1922_vm10 = vcmp.gt.s32.totalorder %v1920_v22, %v1921_v17 }
 0x14e   :  { %v1923_v35 = vsel %vm1922_vm10, %v1920_v22, %v1921_v17  ;;  %vm1972_vm10 = vcmp.eq.s32.totalorder %v4333_v38, 3 }
 0x14f   :  { %v1924_v5 = vrot.slane %v1923_v35, 2 }
 0x151   :  { %vm1925_vm0 = vcmp.gt.s32.totalorder %v1923_v35, %v1924_v5 }
 0x152   :  { %v1926_v25 = vsel %vm1925_vm0, %v1923_v35, %v1924_v5 }
 0x153   :  { %v1927_v40 = vrot.slane %v1926_v25, 1 }
 0x155   :  { %vm1928_vm7 = vcmp.gt.s32.totalorder %v1926_v25, %v1927_v40 }
 0x156   :  { %v1929_v9 = vsel %vm1928_vm7, %v1926_v25, %v1927_v40 }
 0x157   :  { %v1931_v45 = vsel %vm1930_vm13, %v1929_v9, %v1910_v48  ;;  %vm1936_vm14 = vcmp.eq.s32.totalorder %v4333_v38, %v1929_v9  ;;  %vm1937_vm11 = vcmp.eq.s32.totalorder %v3851_v16, %v1929_v9 }
 0x158   :  { %v1938_v8 = vsel %vm1936_vm14, %v1934_v26, 0  ;;  %v1939_v12 = vsel %vm1937_vm11, %v1935_v23, 0 }
 0x159   :  { %vm1940_vm1 = vcmp.gt.s32.totalorder %v1938_v8, %v1939_v12 }
 0x15a   :  { %v1941_v46 = vsel %vm1940_vm1, %v1938_v8, %v1939_v12 }
 0x15b   :  { %v1942_v0 = vrot.slane %v1941_v46, 4 }
 0x15d   :  { %vm1943_vm3 = vcmp.gt.s32.totalorder %v1941_v46, %v1942_v0 }
 0x15e   :  { %v1944_v18 = vsel %vm1943_vm3, %v1941_v46, %v1942_v0  ;;  %vm1993_vm3 = vcmp.eq.s32.totalorder %v4333_v38, 2 }
 0x15f   :  { %v1945_v31 = vrot.slane %v1944_v18, 2 }
 0x161   :  { %vm1946_vm2 = vcmp.gt.s32.totalorder %v1944_v18, %v1945_v31 }
 0x162   :  { %v1947_v7 = vsel %vm1946_vm2, %v1944_v18, %v1945_v31 }
 0x163   :  { %v1948_v56 = vrot.slane %v1947_v7, 1 }
 0x165   :  { %vm1949_vm5 = vcmp.gt.s32.totalorder %v1947_v7, %v1948_v56 }
 0x166   :  { %v1950_v41 = vsel %vm1949_vm5, %v1947_v7, %v1948_v56 }
 0x167   :  { %v1952_v20 = vsel %vm1951_vm15, %v1950_v41, %v1931_v45  ;;  %vm1957_vm12 = vcmp.eq.s32.totalorder %v4333_v38, %v1950_v41  ;;  %vm1958_vm6 = vcmp.eq.s32.totalorder %v3851_v16, %v1950_v41 }
 0x168   :  { %v1959_v29 = vsel %vm1957_vm12, %v1955_v44, 0  ;;  %v1960_v11 = vsel %vm1958_vm6, %v1956_v14, 0 }
 0x169   :  { %vm1961_vm9 = vcmp.gt.s32.totalorder %v1959_v29, %v1960_v11 }
 0x16a   :  { %v1962_v50 = vsel %vm1961_vm9, %v1959_v29, %v1960_v11 }
 0x16b   :  { %v1963_v19 = vrot.slane %v1962_v50, 4 }
 0x16d   :  { %vm1964_vm8 = vcmp.gt.s32.totalorder %v1962_v50, %v1963_v19 }
 0x16e   :  { %v1965_v55 = vsel %vm1964_vm8, %v1962_v50, %v1963_v19  ;;  %vm2014_vm8 = vcmp.eq.s32.totalorder %v4333_v38, 1 }
 0x16f   :  { %v1966_v51 = vrot.slane %v1965_v55, 2 }
 0x171   :  { %vm1967_vm4 = vcmp.gt.s32.totalorder %v1965_v55, %v1966_v51 }
 0x172   :  { %v1968_v21 = vsel %vm1967_vm4, %v1965_v55, %v1966_v51 }
 0x173   :  { %v1969_v13 = vrot.slane %v1968_v21, 1 }
 0x175   :  { %vm1970_vm0 = vcmp.gt.s32.totalorder %v1968_v21, %v1969_v13 }
 0x176   :  { %v1971_v58 = vsel %vm1970_vm0, %v1968_v21, %v1969_v13 }
 0x177   :  { %v1973_v60 = vsel %vm1972_vm10, %v1971_v58, %v1952_v20  ;;  %vm1978_vm13 = vcmp.eq.s32.totalorder %v4333_v38, %v1971_v58  ;;  %vm1979_vm7 = vcmp.eq.s32.totalorder %v3851_v16, %v1971_v58 }
 0x178   :  { %v1980_v28 = vsel %vm1978_vm13, %v4078_v62, 0  ;;  %v1981_v49 = vsel %vm1979_vm7, %v4082_v36, 0 }
 0x179   :  { %vm1982_vm14 = vcmp.gt.s32.totalorder %v1980_v28, %v1981_v49 }
 0x17a   :  { %v1983_v1 = vsel %vm1982_vm14, %v1980_v28, %v1981_v49 }
 0x17b   :  { %v1984_v34 = vrot.slane %v1983_v1, 4 }
 0x17d   :  { %vm1985_vm11 = vcmp.gt.s32.totalorder %v1983_v1, %v1984_v34 }
 0x17e   :  { %v1986_v43 = vsel %vm1985_vm11, %v1983_v1, %v1984_v34  ;;  %vm2042_vm11 = vcmp.eq.s32.totalorder %v4333_v38, 0 }
 0x17f   :  { %v1987_v24 = vrot.slane %v1986_v43, 2 }
 0x181   :  { %vm1988_vm1 = vcmp.gt.s32.totalorder %v1986_v43, %v1987_v24 }
 0x182   :  { %v1989_v32 = vsel %vm1988_vm1, %v1986_v43, %v1987_v24 }
 0x183   :  { %v1990_v39 = vrot.slane %v1989_v32, 1 }
 0x185   :  { %vm1991_vm2 = vcmp.gt.s32.totalorder %v1989_v32, %v1990_v39 }
 0x186   :  { %v1992_v59 = vsel %vm1991_vm2, %v1989_v32, %v1990_v39 }
 0x187   :  { %v1994_v52 = vsel %vm1993_vm3, %v1992_v59, %v1973_v60  ;;  %vm1999_vm15 = vcmp.eq.s32.totalorder %v4333_v38, %v1992_v59  ;;  %vm2000_vm5 = vcmp.eq.s32.totalorder %v3851_v16, %v1992_v59 }
 0x188   :  { %v2001_v26 = vsel %vm1999_vm15, %v4090_v6, 0  ;;  %v2002_v23 = vsel %vm2000_vm5, %v4094_v53, 0 }
 0x189   :  { %vm2003_vm12 = vcmp.gt.s32.totalorder %v2001_v26, %v2002_v23 }
 0x18a   :  { %v2004_v10 = vsel %vm2003_vm12, %v2001_v26, %v2002_v23 }
 0x18b   :  { %v2005_v44 = vrot.slane %v2004_v10, 4 }
 0x18d   :  { %vm2006_vm6 = vcmp.gt.s32.totalorder %v2004_v10, %v2005_v44 }
 0x18e   :  { %v2007_v14 = vsel %vm2006_vm6, %v2004_v10, %v2005_v44 }
 0x18f   :  { %v2008_v54 = vrot.slane %v2007_v14, 2 }
 0x191   :  { %vm2009_vm9 = vcmp.gt.s32.totalorder %v2007_v14, %v2008_v54 }
 0x192   :  { %v2010_v62 = vsel %vm2009_vm9, %v2007_v14, %v2008_v54 }
 0x193   :  { %v2011_v36 = vrot.slane %v2010_v62, 1 }
 0x195   :  { %vm2012_vm4 = vcmp.gt.s32.totalorder %v2010_v62, %v2011_v36 }
 0x196   :  { %v2013_v37 = vsel %vm2012_vm4, %v2010_v62, %v2011_v36 }
 0x197   :  { %v2015_v57 = vsel %vm2014_vm8, %v2013_v37, %v1994_v52  ;;  %vm2027_vm10 = vcmp.eq.s32.totalorder %v4333_v38, %v2013_v37  ;;  %vm2028_vm0 = vcmp.eq.s32.totalorder %v3851_v16, %v2013_v37 }
 0x198   :  { %v2029_v6 = vsel %vm2027_vm10, %v4102_v3, 0  ;;  %v2030_v53 = vsel %vm2028_vm0, %v4110_v15, 0 }
 0x199   :  { %vm2031_vm13 = vcmp.gt.s32.totalorder %v2029_v6, %v2030_v53 }
 0x19a   :  { %v2032_v2 = vsel %vm2031_vm13, %v2029_v6, %v2030_v53 }
 0x19b   :  { %v2033_v30 = vrot.slane %v2032_v2, 4 }
 0x19d   :  { %vm2034_vm7 = vcmp.gt.s32.totalorder %v2032_v2, %v2033_v30 }
 0x19e   :  { %v2035_v47 = vsel %vm2034_vm7, %v2032_v2, %v2033_v30 }
 0x19f   :  { %v2036_v27 = vrot.slane %v2035_v47, 2 }
 0x1a1   :  { %vm2037_vm14 = vcmp.gt.s32.totalorder %v2035_v47, %v2036_v27 }
 0x1a2   :  { %v2038_v42 = vsel %vm2037_vm14, %v2035_v47, %v2036_v27 }
 0x1a3   :  { %v2039_v33 = vrot.slane %v2038_v42, 1 }
 0x1a5   :  { %vm2040_vm1 = vcmp.gt.s32.totalorder %v2038_v42, %v2039_v33 }
 0x1a6   :  { %v2041_v4 = vsel %vm2040_vm1, %v2038_v42, %v2039_v33 }
 0x1a7   :  { %v2043_v48 = vsel %vm2042_vm11, %v2041_v4, %v2015_v57 }
 0x1a8   :  { %2044 = vst [vmem:[%s4144_s3] sm:$0xff] %v2043_v48 }

</bundles_post_ra>
